<compile_context>
chip_gen: v5e
topology: v5e:2x2
jax: 0.10.0
libtpu: 0.0.40
codegen_flags: <defaults>
</compile_context>

<pallas_src>
import jax
import jax.numpy as jnp
import numpy as np
from jax import lax
from jax.experimental import pallas as pl
from jax.experimental.pallas import tpu as pltpu

BN_EPS = 1e-5


def _round_up(x, m):
    return (x + m - 1) // m * m


# --------------------------------------------------------------------------
# Kernel 1: conv1 (3x3, pad=1) + bias, plus per-image partial BN statistics.
# --------------------------------------------------------------------------
def _conv_stats_kernel(xp_ref, w_ref, b_ref, y_ref, st_ref, xpad_ref):
    # xp_ref:  [1, Hh, Wh, Cip]   pooled input, bf16, NHWC, channel-padded
    # w_ref:   [9, Cip, Cp]       tap-major conv weights, bf16
    # b_ref:   [1, Cp]            conv bias, f32
    # y_ref:   [1, Hh*Wh, Cp]     pre-BN conv output (f32) -- also the accumulator
    # st_ref:  [1, 2, Cp]         per-image (sum, sum-of-squares) partial stats
    # xpad_ref: VMEM scratch [Hh+2, Wh+2, Cip] bf16 (spatial pad=1 halo)
    _, hh, wh, cin = xp_ref.shape
    hw, cp = y_ref.shape[1], y_ref.shape[2]

    # Zero-padded activation lives in VMEM; no HBM round trip for the padding.
    xpad_ref[...] = jnp.zeros(xpad_ref.shape, xpad_ref.dtype)
    xpad_ref[1:hh + 1, 1:wh + 1, :] = xp_ref[0]

    # 3x3 conv = 9 shifted [HW, Cin] @ [Cin, Cp] MXU matmuls (bf16 in, f32 acc),
    # accumulated directly into the VMEM-resident output block (no vreg-held
    # full-tile accumulator).  Taps are read from the VMEM scratch, not HBM.
    y_ref[0] = jnp.broadcast_to(b_ref[...], (hw, cp))
    for t in range(9):
        kh, kw = t // 3, t % 3
        patch = xpad_ref[kh:kh + hh, kw:kw + wh, :].reshape(hw, cin)
        y_ref[0] += jnp.dot(patch, w_ref[t], preferred_element_type=jnp.float32)

    # Per-image partial reductions for training-mode BatchNorm batch statistics;
    # finalized across the batch in the wrapper (tiny [C]-sized math).
    y = y_ref[0]
    st_ref[0, 0:1, :] = jnp.sum(y, axis=0, keepdims=True)
    st_ref[0, 1:2, :] = jnp.sum(y * y, axis=0, keepdims=True)


# --------------------------------------------------------------------------
# Kernel 2: apply BN1 (precomputed scale/shift) + ReLU, then conv2 + bias,
#           plus per-image partial BN2 statistics.
# --------------------------------------------------------------------------
def _bn_relu_conv_stats_kernel(y1_ref, a_ref, c_ref, w_ref, b_ref,
                               y2_ref, st_ref, zpad_ref):
    # y1_ref: [1, Hh*Wh, Cp] f32   stage-1 pre-BN activation
    # a_ref/c_ref: [1, Cp] f32     BN1 scale / shift (gamma*rsqrt(var+eps), ...)
    # w_ref:  [9, Cp, Cp] bf16     conv2 weights
    # b_ref:  [1, Cp] f32          conv2 bias
    # y2_ref: [1, Hh*Wh, Cp] f32   stage-2 pre-BN output (accumulator)
    # st_ref: [1, 2, Cp] f32       per-image (sum, sumsq) for BN2
    # zpad_ref: VMEM scratch [Hh+2, Wh+2, Cp] bf16
    hh, wh = zpad_ref.shape[0] - 2, zpad_ref.shape[1] - 2
    hw, cp = y2_ref.shape[1], y2_ref.shape[2]

    # BN + ReLU in f32; downcast to bf16 only for the MXU operands.
    z = jnp.maximum(y1_ref[0] * a_ref[...] + c_ref[...], 0.0)

    zpad_ref[...] = jnp.zeros(zpad_ref.shape, zpad_ref.dtype)
    zpad_ref[1:hh + 1, 1:wh + 1, :] = z.astype(zpad_ref.dtype).reshape(hh, wh, cp)

    y2_ref[0] = jnp.broadcast_to(b_ref[...], (hw, cp))
    for t in range(9):
        kh, kw = t // 3, t % 3
        patch = zpad_ref[kh:kh + hh, kw:kw + wh, :].reshape(hw, cp)
        y2_ref[0] += jnp.dot(patch, w_ref[t], preferred_element_type=jnp.float32)

    y2 = y2_ref[0]
    st_ref[0, 0:1, :] = jnp.sum(y2, axis=0, keepdims=True)
    st_ref[0, 1:2, :] = jnp.sum(y2 * y2, axis=0, keepdims=True)


# --------------------------------------------------------------------------
# Kernel 3: lightweight apply pass -- BN2 + ReLU, drop the channel padding.
# --------------------------------------------------------------------------
def _bn_relu_kernel(y2_ref, a_ref, c_ref, o_ref):
    cout = o_ref.shape[-1]
    z = jnp.maximum(y2_ref[0] * a_ref[...] + c_ref[...], 0.0)
    # For real UNet down blocks Cout % 128 == 0 so this store is lane-dense;
    # only tiny toy channel counts fall back to a masked store here.
    o_ref[0] = z[:, :cout]


# --------------------------------------------------------------------------
# Wrapper
# --------------------------------------------------------------------------
def _prep_conv_w(w_oihw, cin_p, cout_p):
    co, ci, _, _ = w_oihw.shape
    w = jnp.transpose(w_oihw, (2, 3, 1, 0))                      # [3,3,Cin,Cout]
    w = jnp.pad(w, ((0, 0), (0, 0), (0, cin_p - ci), (0, cout_p - co)))
    return w.reshape(9, cin_p, cout_p).astype(jnp.bfloat16)


def _pad_vec(v, cp):
    return jnp.pad(v, (0, cp - v.shape[0])).astype(jnp.float32)


def _bn_affine(stats, gamma_p, beta_p, count):
    """Finalize streaming BN stats -> per-channel scale/shift (tiny [C] math)."""
    s = jnp.sum(stats[:, 0, :], axis=0)
    q = jnp.sum(stats[:, 1, :], axis=0)
    mean = s / count
    var = jnp.maximum(q / count - mean * mean, 0.0)   # biased batch variance
    scale = gamma_p * lax.rsqrt(var + BN_EPS)
    shift = beta_p - mean * scale
    return scale.reshape(1, -1), shift.reshape(1, -1)


@jax.jit
def down_forward(x_nchw, params):
    """Matches down(in_ch, out_ch).forward (training-mode BN) on NCHW input."""
    N, Cin, H, W = x_nchw.shape
    Cout = params["w1"].shape[0]
    Hh, Wh = H // 2, W // 2
    HW = Hh * Wh
    Cp = _round_up(Cout, 128)   # lane-dense channel dim
    Cip = _round_up(Cin, 8)

    # MaxPool2d(2) + NCHW->NHWC + channel pad + bf16 cast: one fused XLA pass
    # over the (4x smaller) pooled tensor; layout conversion only at the
    # PyTorch-facing boundary -- data stays NHWC inside the module.
    xp = x_nchw[:, :, :Hh * 2, :Wh * 2].reshape(N, Cin, Hh, 2, Wh, 2).max(axis=(3, 5))
    xp = jnp.transpose(xp, (0, 2, 3, 1))
    xp = jnp.pad(xp, ((0, 0), (0, 0), (0, 0), (0, Cip - Cin))).astype(jnp.bfloat16)

    w1 = _prep_conv_w(params["w1"], Cip, Cp)
    b1 = _pad_vec(params["b1"], Cp).reshape(1, Cp)
    w2 = _prep_conv_w(params["w2"], Cp, Cp)
    b2 = _pad_vec(params["b2"], Cp).reshape(1, Cp)

    cparams = pltpu.CompilerParams(
        dimension_semantics=("parallel",),          # v7x: shard batch over 2 TCs
        vmem_limit_bytes=32 * 1024 * 1024)          # sized for v7x (64 MiB phys)

    # ---- pass 1: conv1 + per-image BN1 partial stats ------------------------
    y1, st1 = pl.pallas_call(
        _conv_stats_kernel,
        grid=(N,),
        in_specs=[
            pl.BlockSpec((1, Hh, Wh, Cip), lambda n: (n, 0, 0, 0)),
            pl.BlockSpec((9, Cip, Cp), lambda n: (0, 0, 0)),
            pl.BlockSpec((1, Cp), lambda n: (0, 0)),
        ],
        out_specs=(
            pl.BlockSpec((1, HW, Cp), lambda n: (n, 0, 0)),
            pl.BlockSpec((1, 2, Cp), lambda n: (n, 0, 0)),
        ),
        out_shape=(
            jax.ShapeDtypeStruct((N, HW, Cp), jnp.float32),
            jax.ShapeDtypeStruct((N, 2, Cp), jnp.float32),
        ),
        scratch_shapes=[pltpu.VMEM((Hh + 2, Wh + 2, Cip), jnp.bfloat16)],
        compiler_params=cparams,
    )(xp, w1, b1)

    a1, c1 = _bn_affine(st1, _pad_vec(params["g1"], Cp),
                        _pad_vec(params["be1"], Cp), float(N * HW))

    # ---- pass 2: BN1 + ReLU -> conv2 + per-image BN2 partial stats ----------
    y2, st2 = pl.pallas_call(
        _bn_relu_conv_stats_kernel,
        grid=(N,),
        in_specs=[
            pl.BlockSpec((1, HW, Cp), lambda n: (n, 0, 0)),
            pl.BlockSpec((1, Cp), lambda n: (0, 0)),
            pl.BlockSpec((1, Cp), lambda n: (0, 0)),
            pl.BlockSpec((9, Cp, Cp), lambda n: (0, 0, 0)),
            pl.BlockSpec((1, Cp), lambda n: (0, 0)),
        ],
        out_specs=(
            pl.BlockSpec((1, HW, Cp), lambda n: (n, 0, 0)),
            pl.BlockSpec((1, 2, Cp), lambda n: (n, 0, 0)),
        ),
        out_shape=(
            jax.ShapeDtypeStruct((N, HW, Cp), jnp.float32),
            jax.ShapeDtypeStruct((N, 2, Cp), jnp.float32),
        ),
        scratch_shapes=[pltpu.VMEM((Hh + 2, Wh + 2, Cp), jnp.bfloat16)],
        compiler_params=cparams,
    )(y1, a1, c1, w2, b2)

    a2, c2 = _bn_affine(st2, _pad_vec(params["g2"], Cp),
                        _pad_vec(params["be2"], Cp), float(N * HW))

    # ---- pass 3: lightweight BN2 + ReLU apply --------------------------------
    out_nhwc = pl.pallas_call(
        _bn_relu_kernel,
        grid=(N,),
        in_specs=[
            pl.BlockSpec((1, HW, Cp), lambda n: (n, 0, 0)),
            pl.BlockSpec((1, Cp), lambda n: (0, 0)),
            pl.BlockSpec((1, Cp), lambda n: (0, 0)),
        ],
        out_specs=pl.BlockSpec((1, HW, Cout), lambda n: (n, 0, 0)),
        out_shape=jax.ShapeDtypeStruct((N, HW, Cout), jnp.float32),
        compiler_params=cparams,
    )(y2, a2, c2)

    # Single NHWC -> NCHW conversion at the module boundary.
    return jnp.transpose(out_nhwc.reshape(N, Hh, Wh, Cout), (0, 3, 1, 2))


# --------------------------------------------------------------------------
# Parameters and pure-JAX references
# --------------------------------------------------------------------------
def init_params(key, in_ch, out_ch):
    k1, k2, k3, k4 = jax.random.split(key, 4)
    bound1 = 1.0 / np.sqrt(in_ch * 9)
    bound2 = 1.0 / np.sqrt(out_ch * 9)
    return {
        "w1": jax.random.uniform(k1, (out_ch, in_ch, 3, 3), jnp.float32, -bound1, bound1),
        "b1": jax.random.uniform(k2, (out_ch,), jnp.float32, -bound1, bound1),
        "g1": jnp.ones((out_ch,), jnp.float32),
        "be1": jnp.zeros((out_ch,), jnp.float32),
        "w2": jax.random.uniform(k3, (out_ch, out_ch, 3, 3), jnp.float32, -bound2, bound2),
        "b2": jax.random.uniform(k4, (out_ch,), jnp.float32, -bound2, bound2),
        "g2": jnp.ones((out_ch,), jnp.float32),
        "be2": jnp.zeros((out_ch,), jnp.float32),
    }


def _maxpool2_ref(x):
    n, c, h, w = x.shape
    return x[:, :, :(h // 2) * 2, :(w // 2) * 2].reshape(
        n, c, h // 2, 2, w // 2, 2).max(axis=(3, 5))


def _conv_bn_relu_ref(x, w, b, g, be, conv_dtype):
    y = lax.conv_general_dilated(
        x.astype(conv_dtype), w.astype(conv_dtype),
        window_strides=(1, 1), padding=((1, 1), (1, 1)),
        dimension_numbers=("NCHW", "OIHW", "NCHW"),
        preferred_element_type=jnp.float32)
    y = y + b.reshape(1, -1, 1, 1)
    m = jnp.mean(y, axis=(0, 2, 3), keepdims=True)
    v = jnp.mean((y - m) ** 2, axis=(0, 2, 3), keepdims=True)   # biased batch var
    y = (y - m) * lax.rsqrt(v + BN_EPS) * g.reshape(1, -1, 1, 1) + be.reshape(1, -1, 1, 1)
    return jnp.maximum(y, 0.0)


def _reference(x, params, conv_dtype):
    x = _maxpool2_ref(x)
    x = _conv_bn_relu_ref(x, params["w1"], params["b1"], params["g1"], params["be1"], conv_dtype)
    x = _conv_bn_relu_ref(x, params["w2"], params["b2"], params["g2"], params["be2"], conv_dtype)
    return x


if __name__ == "__main__":
    key = jax.random.PRNGKey(0)
    kx, kp = jax.random.split(key)

    N, IN_CH, OUT_CH, H, W = 2, 4, 8, 16, 16
    x = jax.random.normal(kx, (N, IN_CH, H, W), jnp.float32)
    params = init_params(kp, IN_CH, OUT_CH)

    out = jax.block_until_ready(down_forward(x, params))
    assert out.shape == (N, OUT_CH, H // 2, W // 2), out.shape

    # Strict check against a reference with matched matmul precision
    # (bf16 conv operands, f32 accumulation; BN/ReLU entirely in f32).
    ref_bf16 = _reference(x, params, conv_dtype=jnp.bfloat16)
    np.testing.assert_allclose(np.asarray(out), np.asarray(ref_bf16),
                               rtol=1e-2, atol=1e-2)

    # Loose sanity check against the pure-f32 PyTorch-semantics reference
    # (deviation = bf16 conv-operand quantization amplified by the two BNs).
    ref_f32 = _reference(x, params, conv_dtype=jnp.float32)
    np.testing.assert_allclose(np.asarray(out), np.asarray(ref_f32),
                               rtol=5e-2, atol=5e-2)

    print("KERNEL_OK")
</pallas_src>

<mosaic_0001>
module attributes {stable_mosaic.version = 11 : i64} {
  func.func @_conv_stats_kernel(%arg0: i32, %arg1: memref<1x8x8x8xbf16, #tpu.memory_space<vmem>>, %arg2: memref<9x8x128xbf16, #tpu.memory_space<vmem>>, %arg3: memref<1x128xf32, #tpu.memory_space<vmem>>, %arg4: memref<1x64x128xf32, #tpu.memory_space<vmem>>, %arg5: memref<1x2x128xf32, #tpu.memory_space<vmem>>, %arg6: memref<10x10x8xbf16, #tpu.memory_space<vmem>>) attributes {dimension_semantics = [#tpu.dimension_semantics<parallel>], iteration_bounds = array<i64: 2>, scalar_prefetch = 0 : i64, scratch_operands = 1 : i64, tpu.core_type = #tpu.core_type<tc>, window_params = [{transform_indices = @transform_0, window_bounds = array<i64: 1, 8, 8, 8>}, {pipeline_mode = #tpu.pipeline_mode<synchronous>, transform_indices = @transform_1, window_bounds = array<i64: 9, 8, 128>}, {pipeline_mode = #tpu.pipeline_mode<synchronous>, transform_indices = @transform_2, window_bounds = array<i64: 1, 128>}, {transform_indices = @transform_3, window_bounds = array<i64: 1, 64, 128>}, {transform_indices = @transform_4, window_bounds = array<i64: 1, 2, 128>}]} {
    %cst = arith.constant 0.000000e+00 : bf16
    %0 = vector.broadcast %cst : bf16 to vector<10x10x8xbf16>
    %c0 = arith.constant 0 : index
    %c0_0 = arith.constant 0 : index
    %c0_1 = arith.constant 0 : index
    %1 = vector.load %arg6[%c0, %c0_0, %c0_1] : memref<10x10x8xbf16, #tpu.memory_space<vmem>>, vector<10x10x8xbf16>
    tpu.vector_store %arg6[%c0, %c0_0, %c0_1], %0 {strides = array<i32>} : memref<10x10x8xbf16, #tpu.memory_space<vmem>>, vector<10x10x8xbf16>,
    %c0_2 = arith.constant 0 : index
    %c0_3 = arith.constant 0 : index
    %c0_4 = arith.constant 0 : index
    %c0_5 = arith.constant 0 : index
    %2 = vector.load %arg1[%c0_2, %c0_3, %c0_4, %c0_5] : memref<1x8x8x8xbf16, #tpu.memory_space<vmem>>, vector<1x8x8x8xbf16>
    %3 = vector.shape_cast %2 : vector<1x8x8x8xbf16> to vector<8x8x8xbf16>
    %c1 = arith.constant 1 : index
    %c1_6 = arith.constant 1 : index
    %c0_7 = arith.constant 0 : index
    %4 = vector.load %arg6[%c1, %c1_6, %c0_7] : memref<10x10x8xbf16, #tpu.memory_space<vmem>>, vector<8x8x8xbf16>
    tpu.vector_store %arg6[%c1, %c1_6, %c0_7], %3 {strides = array<i32>} : memref<10x10x8xbf16, #tpu.memory_space<vmem>>, vector<8x8x8xbf16>,
    %c0_8 = arith.constant 0 : index
    %c0_9 = arith.constant 0 : index
    %5 = vector.load %arg3[%c0_8, %c0_9] : memref<1x128xf32, #tpu.memory_space<vmem>>, vector<1x128xf32>
    %6 = vector.shape_cast %5 : vector<1x128xf32> to vector<1x128xf32>
    %7 = vector.broadcast %6 : vector<1x128xf32> to vector<64x128xf32>
    %c0_10 = arith.constant 0 : index
    %c0_11 = arith.constant 0 : index
    %c0_12 = arith.constant 0 : index
    %8 = vector.load %arg4[%c0_10, %c0_11, %c0_12] : memref<1x64x128xf32, #tpu.memory_space<vmem>>, vector<1x64x128xf32>
    %9 = vector.shape_cast %8 : vector<1x64x128xf32> to vector<64x128xf32>
    %10 = vector.shape_cast %7 : vector<64x128xf32> to vector<1x64x128xf32>
    tpu.vector_store %arg4[%c0_10, %c0_11, %c0_12], %10 {strides = array<i32>} : memref<1x64x128xf32, #tpu.memory_space<vmem>>, vector<1x64x128xf32>,
    %c0_13 = arith.constant 0 : index
    %c0_14 = arith.constant 0 : index
    %c0_15 = arith.constant 0 : index
    %11 = vector.load %arg6[%c0_13, %c0_14, %c0_15] : memref<10x10x8xbf16, #tpu.memory_space<vmem>>, vector<8x8x8xbf16>
    %12 = vector.shape_cast %11 : vector<8x8x8xbf16> to vector<64x8xbf16>
    %c0_16 = arith.constant 0 : index
    %c0_17 = arith.constant 0 : index
    %c0_18 = arith.constant 0 : index
    %13 = vector.load %arg4[%c0_16, %c0_17, %c0_18] : memref<1x64x128xf32, #tpu.memory_space<vmem>>, vector<1x64x128xf32>
    %14 = vector.shape_cast %13 : vector<1x64x128xf32> to vector<64x128xf32>
    %c0_19 = arith.constant 0 : index
    %c0_20 = arith.constant 0 : index
    %c0_21 = arith.constant 0 : index
    %15 = vector.load %arg2[%c0_19, %c0_20, %c0_21] : memref<9x8x128xbf16, #tpu.memory_space<vmem>>, vector<1x8x128xbf16>
    %16 = vector.shape_cast %15 : vector<1x8x128xbf16> to vector<8x128xbf16>
    %cst_22 = arith.constant dense<0.000000e+00> : vector<64x128xf32>
    %17 = tpu.matmul %12, %16, %cst_22 {dimension_numbers = #tpu.dot_dimension_numbers<[1], [0], [0], [1], [0, 0, 1, 1], [], []>} : vector<64x8xbf16>, vector<8x128xbf16>, vector<64x128xf32> -> vector<64x128xf32>
    %18 = arith.addf %14, %17 : vector<64x128xf32>
    %c0_23 = arith.constant 0 : index
    %c0_24 = arith.constant 0 : index
    %c0_25 = arith.constant 0 : index
    %19 = vector.load %arg4[%c0_23, %c0_24, %c0_25] : memref<1x64x128xf32, #tpu.memory_space<vmem>>, vector<1x64x128xf32>
    %20 = vector.shape_cast %19 : vector<1x64x128xf32> to vector<64x128xf32>
    %21 = vector.shape_cast %18 : vector<64x128xf32> to vector<1x64x128xf32>
    tpu.vector_store %arg4[%c0_23, %c0_24, %c0_25], %21 {strides = array<i32>} : memref<1x64x128xf32, #tpu.memory_space<vmem>>, vector<1x64x128xf32>,
    %c0_26 = arith.constant 0 : index
    %c1_27 = arith.constant 1 : index
    %c0_28 = arith.constant 0 : index
    %22 = vector.load %arg6[%c0_26, %c1_27, %c0_28] : memref<10x10x8xbf16, #tpu.memory_space<vmem>>, vector<8x8x8xbf16>
    %23 = vector.shape_cast %22 : vector<8x8x8xbf16> to vector<64x8xbf16>
    %c0_29 = arith.constant 0 : index
    %c0_30 = arith.constant 0 : index
    %c0_31 = arith.constant 0 : index
    %24 = vector.load %arg4[%c0_29, %c0_30, %c0_31] : memref<1x64x128xf32, #tpu.memory_space<vmem>>, vector<1x64x128xf32>
    %25 = vector.shape_cast %24 : vector<1x64x128xf32> to vector<64x128xf32>
    %c1_32 = arith.constant 1 : index
    %c0_33 = arith.constant 0 : index
    %c0_34 = arith.constant 0 : index
    %26 = vector.load %arg2[%c1_32, %c0_33, %c0_34] : memref<9x8x128xbf16, #tpu.memory_space<vmem>>, vector<1x8x128xbf16>
    %27 = vector.shape_cast %26 : vector<1x8x128xbf16> to vector<8x128xbf16>
    %cst_35 = arith.constant dense<0.000000e+00> : vector<64x128xf32>
    %28 = tpu.matmul %23, %27, %cst_35 {dimension_numbers = #tpu.dot_dimension_numbers<[1], [0], [0], [1], [0, 0, 1, 1], [], []>} : vector<64x8xbf16>, vector<8x128xbf16>, vector<64x128xf32> -> vector<64x128xf32>
    %29 = arith.addf %25, %28 : vector<64x128xf32>
    %c0_36 = arith.constant 0 : index
    %c0_37 = arith.constant 0 : index
    %c0_38 = arith.constant 0 : index
    %30 = vector.load %arg4[%c0_36, %c0_37, %c0_38] : memref<1x64x128xf32, #tpu.memory_space<vmem>>, vector<1x64x128xf32>
    %31 = vector.shape_cast %30 : vector<1x64x128xf32> to vector<64x128xf32>
    %32 = vector.shape_cast %29 : vector<64x128xf32> to vector<1x64x128xf32>
    tpu.vector_store %arg4[%c0_36, %c0_37, %c0_38], %32 {strides = array<i32>} : memref<1x64x128xf32, #tpu.memory_space<vmem>>, vector<1x64x128xf32>,
    %c0_39 = arith.constant 0 : index
    %c2 = arith.constant 2 : index
    %c0_40 = arith.constant 0 : index
    %33 = vector.load %arg6[%c0_39, %c2, %c0_40] : memref<10x10x8xbf16, #tpu.memory_space<vmem>>, vector<8x8x8xbf16>
    %34 = vector.shape_cast %33 : vector<8x8x8xbf16> to vector<64x8xbf16>
    %c0_41 = arith.constant 0 : index
    %c0_42 = arith.constant 0 : index
    %c0_43 = arith.constant 0 : index
    %35 = vector.load %arg4[%c0_41, %c0_42, %c0_43] : memref<1x64x128xf32, #tpu.memory_space<vmem>>, vector<1x64x128xf32>
    %36 = vector.shape_cast %35 : vector<1x64x128xf32> to vector<64x128xf32>
    %c2_44 = arith.constant 2 : index
    %c0_45 = arith.constant 0 : index
    %c0_46 = arith.constant 0 : index
    %37 = vector.load %arg2[%c2_44, %c0_45, %c0_46] : memref<9x8x128xbf16, #tpu.memory_space<vmem>>, vector<1x8x128xbf16>
    %38 = vector.shape_cast %37 : vector<1x8x128xbf16> to vector<8x128xbf16>
    %cst_47 = arith.constant dense<0.000000e+00> : vector<64x128xf32>
    %39 = tpu.matmul %34, %38, %cst_47 {dimension_numbers = #tpu.dot_dimension_numbers<[1], [0], [0], [1], [0, 0, 1, 1], [], []>} : vector<64x8xbf16>, vector<8x128xbf16>, vector<64x128xf32> -> vector<64x128xf32>
    %40 = arith.addf %36, %39 : vector<64x128xf32>
    %c0_48 = arith.constant 0 : index
    %c0_49 = arith.constant 0 : index
    %c0_50 = arith.constant 0 : index
    %41 = vector.load %arg4[%c0_48, %c0_49, %c0_50] : memref<1x64x128xf32, #tpu.memory_space<vmem>>, vector<1x64x128xf32>
    %42 = vector.shape_cast %41 : vector<1x64x128xf32> to vector<64x128xf32>
    %43 = vector.shape_cast %40 : vector<64x128xf32> to vector<1x64x128xf32>
    tpu.vector_store %arg4[%c0_48, %c0_49, %c0_50], %43 {strides = array<i32>} : memref<1x64x128xf32, #tpu.memory_space<vmem>>, vector<1x64x128xf32>,
    %c1_51 = arith.constant 1 : index
    %c0_52 = arith.constant 0 : index
    %c0_53 = arith.constant 0 : index
    %44 = vector.load %arg6[%c1_51, %c0_52, %c0_53] : memref<10x10x8xbf16, #tpu.memory_space<vmem>>, vector<8x8x8xbf16>
    %45 = vector.shape_cast %44 : vector<8x8x8xbf16> to vector<64x8xbf16>
    %c0_54 = arith.constant 0 : index
    %c0_55 = arith.constant 0 : index
    %c0_56 = arith.constant 0 : index
    %46 = vector.load %arg4[%c0_54, %c0_55, %c0_56] : memref<1x64x128xf32, #tpu.memory_space<vmem>>, vector<1x64x128xf32>
    %47 = vector.shape_cast %46 : vector<1x64x128xf32> to vector<64x128xf32>
    %c3 = arith.constant 3 : index
    %c0_57 = arith.constant 0 : index
    %c0_58 = arith.constant 0 : index
    %48 = vector.load %arg2[%c3, %c0_57, %c0_58] : memref<9x8x128xbf16, #tpu.memory_space<vmem>>, vector<1x8x128xbf16>
    %49 = vector.shape_cast %48 : vector<1x8x128xbf16> to vector<8x128xbf16>
    %cst_59 = arith.constant dense<0.000000e+00> : vector<64x128xf32>
    %50 = tpu.matmul %45, %49, %cst_59 {dimension_numbers = #tpu.dot_dimension_numbers<[1], [0], [0], [1], [0, 0, 1, 1], [], []>} : vector<64x8xbf16>, vector<8x128xbf16>, vector<64x128xf32> -> vector<64x128xf32>
    %51 = arith.addf %47, %50 : vector<64x128xf32>
    %c0_60 = arith.constant 0 : index
    %c0_61 = arith.constant 0 : index
    %c0_62 = arith.constant 0 : index
    %52 = vector.load %arg4[%c0_60, %c0_61, %c0_62] : memref<1x64x128xf32, #tpu.memory_space<vmem>>, vector<1x64x128xf32>
    %53 = vector.shape_cast %52 : vector<1x64x128xf32> to vector<64x128xf32>
    %54 = vector.shape_cast %51 : vector<64x128xf32> to vector<1x64x128xf32>
    tpu.vector_store %arg4[%c0_60, %c0_61, %c0_62], %54 {strides = array<i32>} : memref<1x64x128xf32, #tpu.memory_space<vmem>>, vector<1x64x128xf32>,
    %c1_63 = arith.constant 1 : index
    %c1_64 = arith.constant 1 : index
    %c0_65 = arith.constant 0 : index
    %55 = vector.load %arg6[%c1_63, %c1_64, %c0_65] : memref<10x10x8xbf16, #tpu.memory_space<vmem>>, vector<8x8x8xbf16>
    %56 = vector.shape_cast %55 : vector<8x8x8xbf16> to vector<64x8xbf16>
    %c0_66 = arith.constant 0 : index
    %c0_67 = arith.constant 0 : index
    %c0_68 = arith.constant 0 : index
    %57 = vector.load %arg4[%c0_66, %c0_67, %c0_68] : memref<1x64x128xf32, #tpu.memory_space<vmem>>, vector<1x64x128xf32>
    %58 = vector.shape_cast %57 : vector<1x64x128xf32> to vector<64x128xf32>
    %c4 = arith.constant 4 : index
    %c0_69 = arith.constant 0 : index
    %c0_70 = arith.constant 0 : index
    %59 = vector.load %arg2[%c4, %c0_69, %c0_70] : memref<9x8x128xbf16, #tpu.memory_space<vmem>>, vector<1x8x128xbf16>
    %60 = vector.shape_cast %59 : vector<1x8x128xbf16> to vector<8x128xbf16>
    %cst_71 = arith.constant dense<0.000000e+00> : vector<64x128xf32>
    %61 = tpu.matmul %56, %60, %cst_71 {dimension_numbers = #tpu.dot_dimension_numbers<[1], [0], [0], [1], [0, 0, 1, 1], [], []>} : vector<64x8xbf16>, vector<8x128xbf16>, vector<64x128xf32> -> vector<64x128xf32>
    %62 = arith.addf %58, %61 : vector<64x128xf32>
    %c0_72 = arith.constant 0 : index
    %c0_73 = arith.constant 0 : index
    %c0_74 = arith.constant 0 : index
    %63 = vector.load %arg4[%c0_72, %c0_73, %c0_74] : memref<1x64x128xf32, #tpu.memory_space<vmem>>, vector<1x64x128xf32>
    %64 = vector.shape_cast %63 : vector<1x64x128xf32> to vector<64x128xf32>
    %65 = vector.shape_cast %62 : vector<64x128xf32> to vector<1x64x128xf32>
    tpu.vector_store %arg4[%c0_72, %c0_73, %c0_74], %65 {strides = array<i32>} : memref<1x64x128xf32, #tpu.memory_space<vmem>>, vector<1x64x128xf32>,
    %c1_75 = arith.constant 1 : index
    %c2_76 = arith.constant 2 : index
    %c0_77 = arith.constant 0 : index
    %66 = vector.load %arg6[%c1_75, %c2_76, %c0_77] : memref<10x10x8xbf16, #tpu.memory_space<vmem>>, vector<8x8x8xbf16>
    %67 = vector.shape_cast %66 : vector<8x8x8xbf16> to vector<64x8xbf16>
    %c0_78 = arith.constant 0 : index
    %c0_79 = arith.constant 0 : index
    %c0_80 = arith.constant 0 : index
    %68 = vector.load %arg4[%c0_78, %c0_79, %c0_80] : memref<1x64x128xf32, #tpu.memory_space<vmem>>, vector<1x64x128xf32>
    %69 = vector.shape_cast %68 : vector<1x64x128xf32> to vector<64x128xf32>
    %c5 = arith.constant 5 : index
    %c0_81 = arith.constant 0 : index
    %c0_82 = arith.constant 0 : index
    %70 = vector.load %arg2[%c5, %c0_81, %c0_82] : memref<9x8x128xbf16, #tpu.memory_space<vmem>>, vector<1x8x128xbf16>
    %71 = vector.shape_cast %70 : vector<1x8x128xbf16> to vector<8x128xbf16>
    %cst_83 = arith.constant dense<0.000000e+00> : vector<64x128xf32>
    %72 = tpu.matmul %67, %71, %cst_83 {dimension_numbers = #tpu.dot_dimension_numbers<[1], [0], [0], [1], [0, 0, 1, 1], [], []>} : vector<64x8xbf16>, vector<8x128xbf16>, vector<64x128xf32> -> vector<64x128xf32>
    %73 = arith.addf %69, %72 : vector<64x128xf32>
    %c0_84 = arith.constant 0 : index
    %c0_85 = arith.constant 0 : index
    %c0_86 = arith.constant 0 : index
    %74 = vector.load %arg4[%c0_84, %c0_85, %c0_86] : memref<1x64x128xf32, #tpu.memory_space<vmem>>, vector<1x64x128xf32>
    %75 = vector.shape_cast %74 : vector<1x64x128xf32> to vector<64x128xf32>
    %76 = vector.shape_cast %73 : vector<64x128xf32> to vector<1x64x128xf32>
    tpu.vector_store %arg4[%c0_84, %c0_85, %c0_86], %76 {strides = array<i32>} : memref<1x64x128xf32, #tpu.memory_space<vmem>>, vector<1x64x128xf32>,
    %c2_87 = arith.constant 2 : index
    %c0_88 = arith.constant 0 : index
    %c0_89 = arith.constant 0 : index
    %77 = vector.load %arg6[%c2_87, %c0_88, %c0_89] : memref<10x10x8xbf16, #tpu.memory_space<vmem>>, vector<8x8x8xbf16>
    %78 = vector.shape_cast %77 : vector<8x8x8xbf16> to vector<64x8xbf16>
    %c0_90 = arith.constant 0 : index
    %c0_91 = arith.constant 0 : index
    %c0_92 = arith.constant 0 : index
    %79 = vector.load %arg4[%c0_90, %c0_91, %c0_92] : memref<1x64x128xf32, #tpu.memory_space<vmem>>, vector<1x64x128xf32>
    %80 = vector.shape_cast %79 : vector<1x64x128xf32> to vector<64x128xf32>
    %c6 = arith.constant 6 : index
    %c0_93 = arith.constant 0 : index
    %c0_94 = arith.constant 0 : index
    %81 = vector.load %arg2[%c6, %c0_93, %c0_94] : memref<9x8x128xbf16, #tpu.memory_space<vmem>>, vector<1x8x128xbf16>
    %82 = vector.shape_cast %81 : vector<1x8x128xbf16> to vector<8x128xbf16>
    %cst_95 = arith.constant dense<0.000000e+00> : vector<64x128xf32>
    %83 = tpu.matmul %78, %82, %cst_95 {dimension_numbers = #tpu.dot_dimension_numbers<[1], [0], [0], [1], [0, 0, 1, 1], [], []>} : vector<64x8xbf16>, vector<8x128xbf16>, vector<64x128xf32> -> vector<64x128xf32>
    %84 = arith.addf %80, %83 : vector<64x128xf32>
    %c0_96 = arith.constant 0 : index
    %c0_97 = arith.constant 0 : index
    %c0_98 = arith.constant 0 : index
    %85 = vector.load %arg4[%c0_96, %c0_97, %c0_98] : memref<1x64x128xf32, #tpu.memory_space<vmem>>, vector<1x64x128xf32>
    %86 = vector.shape_cast %85 : vector<1x64x128xf32> to vector<64x128xf32>
    %87 = vector.shape_cast %84 : vector<64x128xf32> to vector<1x64x128xf32>
    tpu.vector_store %arg4[%c0_96, %c0_97, %c0_98], %87 {strides = array<i32>} : memref<1x64x128xf32, #tpu.memory_space<vmem>>, vector<1x64x128xf32>,
    %c2_99 = arith.constant 2 : index
    %c1_100 = arith.constant 1 : index
    %c0_101 = arith.constant 0 : index
    %88 = vector.load %arg6[%c2_99, %c1_100, %c0_101] : memref<10x10x8xbf16, #tpu.memory_space<vmem>>, vector<8x8x8xbf16>
    %89 = vector.shape_cast %88 : vector<8x8x8xbf16> to vector<64x8xbf16>
    %c0_102 = arith.constant 0 : index
    %c0_103 = arith.constant 0 : index
    %c0_104 = arith.constant 0 : index
    %90 = vector.load %arg4[%c0_102, %c0_103, %c0_104] : memref<1x64x128xf32, #tpu.memory_space<vmem>>, vector<1x64x128xf32>
    %91 = vector.shape_cast %90 : vector<1x64x128xf32> to vector<64x128xf32>
    %c7 = arith.constant 7 : index
    %c0_105 = arith.constant 0 : index
    %c0_106 = arith.constant 0 : index
    %92 = vector.load %arg2[%c7, %c0_105, %c0_106] : memref<9x8x128xbf16, #tpu.memory_space<vmem>>, vector<1x8x128xbf16>
    %93 = vector.shape_cast %92 : vector<1x8x128xbf16> to vector<8x128xbf16>
    %cst_107 = arith.constant dense<0.000000e+00> : vector<64x128xf32>
    %94 = tpu.matmul %89, %93, %cst_107 {dimension_numbers = #tpu.dot_dimension_numbers<[1], [0], [0], [1], [0, 0, 1, 1], [], []>} : vector<64x8xbf16>, vector<8x128xbf16>, vector<64x128xf32> -> vector<64x128xf32>
    %95 = arith.addf %91, %94 : vector<64x128xf32>
    %c0_108 = arith.constant 0 : index
    %c0_109 = arith.constant 0 : index
    %c0_110 = arith.constant 0 : index
    %96 = vector.load %arg4[%c0_108, %c0_109, %c0_110] : memref<1x64x128xf32, #tpu.memory_space<vmem>>, vector<1x64x128xf32>
    %97 = vector.shape_cast %96 : vector<1x64x128xf32> to vector<64x128xf32>
    %98 = vector.shape_cast %95 : vector<64x128xf32> to vector<1x64x128xf32>
    tpu.vector_store %arg4[%c0_108, %c0_109, %c0_110], %98 {strides = array<i32>} : memref<1x64x128xf32, #tpu.memory_space<vmem>>, vector<1x64x128xf32>,
    %c2_111 = arith.constant 2 : index
    %c2_112 = arith.constant 2 : index
    %c0_113 = arith.constant 0 : index
    %99 = vector.load %arg6[%c2_111, %c2_112, %c0_113] : memref<10x10x8xbf16, #tpu.memory_space<vmem>>, vector<8x8x8xbf16>
    %100 = vector.shape_cast %99 : vector<8x8x8xbf16> to vector<64x8xbf16>
    %c0_114 = arith.constant 0 : index
    %c0_115 = arith.constant 0 : index
    %c0_116 = arith.constant 0 : index
    %101 = vector.load %arg4[%c0_114, %c0_115, %c0_116] : memref<1x64x128xf32, #tpu.memory_space<vmem>>, vector<1x64x128xf32>
    %102 = vector.shape_cast %101 : vector<1x64x128xf32> to vector<64x128xf32>
    %c8 = arith.constant 8 : index
    %c0_117 = arith.constant 0 : index
    %c0_118 = arith.constant 0 : index
    %103 = vector.load %arg2[%c8, %c0_117, %c0_118] : memref<9x8x128xbf16, #tpu.memory_space<vmem>>, vector<1x8x128xbf16>
    %104 = vector.shape_cast %103 : vector<1x8x128xbf16> to vector<8x128xbf16>
    %cst_119 = arith.constant dense<0.000000e+00> : vector<64x128xf32>
    %105 = tpu.matmul %100, %104, %cst_119 {dimension_numbers = #tpu.dot_dimension_numbers<[1], [0], [0], [1], [0, 0, 1, 1], [], []>} : vector<64x8xbf16>, vector<8x128xbf16>, vector<64x128xf32> -> vector<64x128xf32>
    %106 = arith.addf %102, %105 : vector<64x128xf32>
    %c0_120 = arith.constant 0 : index
    %c0_121 = arith.constant 0 : index
    %c0_122 = arith.constant 0 : index
    %107 = vector.load %arg4[%c0_120, %c0_121, %c0_122] : memref<1x64x128xf32, #tpu.memory_space<vmem>>, vector<1x64x128xf32>
    %108 = vector.shape_cast %107 : vector<1x64x128xf32> to vector<64x128xf32>
    %109 = vector.shape_cast %106 : vector<64x128xf32> to vector<1x64x128xf32>
    tpu.vector_store %arg4[%c0_120, %c0_121, %c0_122], %109 {strides = array<i32>} : memref<1x64x128xf32, #tpu.memory_space<vmem>>, vector<1x64x128xf32>,
    %c0_123 = arith.constant 0 : index
    %c0_124 = arith.constant 0 : index
    %c0_125 = arith.constant 0 : index
    %110 = vector.load %arg4[%c0_123, %c0_124, %c0_125] : memref<1x64x128xf32, #tpu.memory_space<vmem>>, vector<1x64x128xf32>
    %111 = vector.shape_cast %110 : vector<1x64x128xf32> to vector<64x128xf32>
    %cst_126 = arith.constant dense<0.000000e+00> : vector<128xf32>
    %112 = vector.multi_reduction <add>, %111, %cst_126 [0] : vector<64x128xf32> to vector<128xf32>
    %113 = vector.shape_cast %112 : vector<128xf32> to vector<1x128xf32>
    %c0_127 = arith.constant 0 : index
    %c0_128 = arith.constant 0 : index
    %c0_129 = arith.constant 0 : index
    %114 = vector.load %arg5[%c0_127, %c0_128, %c0_129] : memref<1x2x128xf32, #tpu.memory_space<vmem>>, vector<1x1x128xf32>
    %115 = vector.shape_cast %114 : vector<1x1x128xf32> to vector<1x128xf32>
    %116 = vector.shape_cast %113 : vector<1x128xf32> to vector<1x1x128xf32>
    tpu.vector_store %arg5[%c0_127, %c0_128, %c0_129], %116 {strides = array<i32>} : memref<1x2x128xf32, #tpu.memory_space<vmem>>, vector<1x1x128xf32>,
    %117 = arith.mulf %111, %111 : vector<64x128xf32>
    %cst_130 = arith.constant dense<0.000000e+00> : vector<128xf32>
    %118 = vector.multi_reduction <add>, %117, %cst_130 [0] : vector<64x128xf32> to vector<128xf32>
    %119 = vector.shape_cast %118 : vector<128xf32> to vector<1x128xf32>
    %c0_131 = arith.constant 0 : index
    %c1_132 = arith.constant 1 : index
    %c0_133 = arith.constant 0 : index
    %120 = vector.load %arg5[%c0_131, %c1_132, %c0_133] : memref<1x2x128xf32, #tpu.memory_space<vmem>>, vector<1x1x128xf32>
    %121 = vector.shape_cast %120 : vector<1x1x128xf32> to vector<1x128xf32>
    %122 = vector.shape_cast %119 : vector<1x128xf32> to vector<1x1x128xf32>
    tpu.vector_store %arg5[%c0_131, %c1_132, %c0_133], %122 {strides = array<i32>} : memref<1x2x128xf32, #tpu.memory_space<vmem>>, vector<1x1x128xf32>,
    return
  }
  func.func @transform_0(%arg0: i32) -> (i32, i32, i32, i32) {
    %c0_i32 = arith.constant 0 : i32
    %c0_i32_0 = arith.constant 0 : i32
    %c0_i32_1 = arith.constant 0 : i32
    %c0_i32_2 = arith.constant 0 : i32
    return %arg0, %c0_i32, %c0_i32_0, %c0_i32_1 : i32, i32, i32, i32
  }
  func.func @transform_1(%arg0: i32) -> (i32, i32, i32) {
    %c0_i32 = arith.constant 0 : i32
    %c0_i32_0 = arith.constant 0 : i32
    %c0_i32_1 = arith.constant 0 : i32
    %c0_i32_2 = arith.constant 0 : i32
    return %c0_i32, %c0_i32_0, %c0_i32_1 : i32, i32, i32
  }
  func.func @transform_2(%arg0: i32) -> (i32, i32) {
    %c0_i32 = arith.constant 0 : i32
    %c0_i32_0 = arith.constant 0 : i32
    %c0_i32_1 = arith.constant 0 : i32
    return %c0_i32, %c0_i32_0 : i32, i32
  }
  func.func @transform_3(%arg0: i32) -> (i32, i32, i32) {
    %c0_i32 = arith.constant 0 : i32
    %c0_i32_0 = arith.constant 0 : i32
    %c0_i32_1 = arith.constant 0 : i32
    return %arg0, %c0_i32, %c0_i32_0 : i32, i32, i32
  }
  func.func @transform_4(%arg0: i32) -> (i32, i32, i32) {
    %c0_i32 = arith.constant 0 : i32
    %c0_i32_0 = arith.constant 0 : i32
    %c0_i32_1 = arith.constant 0 : i32
    return %arg0, %c0_i32, %c0_i32_0 : i32, i32, i32
  }
}

module attributes {stable_mosaic.version = 11 : i64} {
  func.func @_bn_relu_conv_stats_kernel(%arg0: i32, %arg1: memref<1x64x128xf32, #tpu.memory_space<vmem>>, %arg2: memref<1x128xf32, #tpu.memory_space<vmem>>, %arg3: memref<1x128xf32, #tpu.memory_space<vmem>>, %arg4: memref<9x128x128xbf16, #tpu.memory_space<vmem>>, %arg5: memref<1x128xf32, #tpu.memory_space<vmem>>, %arg6: memref<1x64x128xf32, #tpu.memory_space<vmem>>, %arg7: memref<1x2x128xf32, #tpu.memory_space<vmem>>, %arg8: memref<10x10x128xbf16, #tpu.memory_space<vmem>>) attributes {dimension_semantics = [#tpu.dimension_semantics<parallel>], iteration_bounds = array<i64: 2>, scalar_prefetch = 0 : i64, scratch_operands = 1 : i64, tpu.core_type = #tpu.core_type<tc>, window_params = [{transform_indices = @transform_0, window_bounds = array<i64: 1, 64, 128>}, {pipeline_mode = #tpu.pipeline_mode<synchronous>, transform_indices = @transform_1, window_bounds = array<i64: 1, 128>}, {pipeline_mode = #tpu.pipeline_mode<synchronous>, transform_indices = @transform_2, window_bounds = array<i64: 1, 128>}, {pipeline_mode = #tpu.pipeline_mode<synchronous>, transform_indices = @transform_3, window_bounds = array<i64: 9, 128, 128>}, {pipeline_mode = #tpu.pipeline_mode<synchronous>, transform_indices = @transform_4, window_bounds = array<i64: 1, 128>}, {transform_indices = @transform_5, window_bounds = array<i64: 1, 64, 128>}, {transform_indices = @transform_6, window_bounds = array<i64: 1, 2, 128>}]} {
    %c0 = arith.constant 0 : index
    %c0_0 = arith.constant 0 : index
    %c0_1 = arith.constant 0 : index
    %0 = vector.load %arg1[%c0, %c0_0, %c0_1] : memref<1x64x128xf32, #tpu.memory_space<vmem>>, vector<1x64x128xf32>
    %1 = vector.shape_cast %0 : vector<1x64x128xf32> to vector<64x128xf32>
    %c0_2 = arith.constant 0 : index
    %c0_3 = arith.constant 0 : index
    %2 = vector.load %arg2[%c0_2, %c0_3] : memref<1x128xf32, #tpu.memory_space<vmem>>, vector<1x128xf32>
    %3 = vector.broadcast %2 : vector<1x128xf32> to vector<64x128xf32>
    %4 = arith.mulf %1, %3 : vector<64x128xf32>
    %c0_4 = arith.constant 0 : index
    %c0_5 = arith.constant 0 : index
    %5 = vector.load %arg3[%c0_4, %c0_5] : memref<1x128xf32, #tpu.memory_space<vmem>>, vector<1x128xf32>
    %6 = vector.broadcast %5 : vector<1x128xf32> to vector<64x128xf32>
    %7 = arith.addf %4, %6 : vector<64x128xf32>
    %cst = arith.constant 0.000000e+00 : f32
    %8 = vector.broadcast %cst : f32 to vector<64x128xf32>
    %9 = arith.maximumf %7, %8 : vector<64x128xf32>
    %cst_6 = arith.constant 0.000000e+00 : bf16
    %10 = vector.broadcast %cst_6 : bf16 to vector<10x10x128xbf16>
    %c0_7 = arith.constant 0 : index
    %c0_8 = arith.constant 0 : index
    %c0_9 = arith.constant 0 : index
    %11 = vector.load %arg8[%c0_7, %c0_8, %c0_9] : memref<10x10x128xbf16, #tpu.memory_space<vmem>>, vector<10x10x128xbf16>
    tpu.vector_store %arg8[%c0_7, %c0_8, %c0_9], %10 {strides = array<i32>} : memref<10x10x128xbf16, #tpu.memory_space<vmem>>, vector<10x10x128xbf16>,
    %12 = arith.truncf %9 : vector<64x128xf32> to vector<64x128xbf16>
    %13 = vector.shape_cast %12 : vector<64x128xbf16> to vector<8x8x128xbf16>
    %c1 = arith.constant 1 : index
    %c1_10 = arith.constant 1 : index
    %c0_11 = arith.constant 0 : index
    %14 = vector.load %arg8[%c1, %c1_10, %c0_11] : memref<10x10x128xbf16, #tpu.memory_space<vmem>>, vector<8x8x128xbf16>
    tpu.vector_store %arg8[%c1, %c1_10, %c0_11], %13 {strides = array<i32>} : memref<10x10x128xbf16, #tpu.memory_space<vmem>>, vector<8x8x128xbf16>,
    %c0_12 = arith.constant 0 : index
    %c0_13 = arith.constant 0 : index
    %15 = vector.load %arg5[%c0_12, %c0_13] : memref<1x128xf32, #tpu.memory_space<vmem>>, vector<1x128xf32>
    %16 = vector.shape_cast %15 : vector<1x128xf32> to vector<1x128xf32>
    %17 = vector.broadcast %16 : vector<1x128xf32> to vector<64x128xf32>
    %c0_14 = arith.constant 0 : index
    %c0_15 = arith.constant 0 : index
    %c0_16 = arith.constant 0 : index
    %18 = vector.load %arg6[%c0_14, %c0_15, %c0_16] : memref<1x64x128xf32, #tpu.memory_space<vmem>>, vector<1x64x128xf32>
    %19 = vector.shape_cast %18 : vector<1x64x128xf32> to vector<64x128xf32>
    %20 = vector.shape_cast %17 : vector<64x128xf32> to vector<1x64x128xf32>
    tpu.vector_store %arg6[%c0_14, %c0_15, %c0_16], %20 {strides = array<i32>} : memref<1x64x128xf32, #tpu.memory_space<vmem>>, vector<1x64x128xf32>,
    %c0_17 = arith.constant 0 : index
    %c0_18 = arith.constant 0 : index
    %c0_19 = arith.constant 0 : index
    %21 = vector.load %arg8[%c0_17, %c0_18, %c0_19] : memref<10x10x128xbf16, #tpu.memory_space<vmem>>, vector<8x8x128xbf16>
    %22 = vector.shape_cast %21 : vector<8x8x128xbf16> to vector<64x128xbf16>
    %c0_20 = arith.constant 0 : index
    %c0_21 = arith.constant 0 : index
    %c0_22 = arith.constant 0 : index
    %23 = vector.load %arg6[%c0_20, %c0_21, %c0_22] : memref<1x64x128xf32, #tpu.memory_space<vmem>>, vector<1x64x128xf32>
    %24 = vector.shape_cast %23 : vector<1x64x128xf32> to vector<64x128xf32>
    %c0_23 = arith.constant 0 : index
    %c0_24 = arith.constant 0 : index
    %c0_25 = arith.constant 0 : index
    %25 = vector.load %arg4[%c0_23, %c0_24, %c0_25] : memref<9x128x128xbf16, #tpu.memory_space<vmem>>, vector<1x128x128xbf16>
    %26 = vector.shape_cast %25 : vector<1x128x128xbf16> to vector<128x128xbf16>
    %cst_26 = arith.constant dense<0.000000e+00> : vector<64x128xf32>
    %27 = tpu.matmul %22, %26, %cst_26 {dimension_numbers = #tpu.dot_dimension_numbers<[1], [0], [0], [1], [0, 0, 1, 1], [], []>} : vector<64x128xbf16>, vector<128x128xbf16>, vector<64x128xf32> -> vector<64x128xf32>
    %28 = arith.addf %24, %27 : vector<64x128xf32>
    %c0_27 = arith.constant 0 : index
    %c0_28 = arith.constant 0 : index
    %c0_29 = arith.constant 0 : index
    %29 = vector.load %arg6[%c0_27, %c0_28, %c0_29] : memref<1x64x128xf32, #tpu.memory_space<vmem>>, vector<1x64x128xf32>
    %30 = vector.shape_cast %29 : vector<1x64x128xf32> to vector<64x128xf32>
    %31 = vector.shape_cast %28 : vector<64x128xf32> to vector<1x64x128xf32>
    tpu.vector_store %arg6[%c0_27, %c0_28, %c0_29], %31 {strides = array<i32>} : memref<1x64x128xf32, #tpu.memory_space<vmem>>, vector<1x64x128xf32>,
    %c0_30 = arith.constant 0 : index
    %c1_31 = arith.constant 1 : index
    %c0_32 = arith.constant 0 : index
    %32 = vector.load %arg8[%c0_30, %c1_31, %c0_32] : memref<10x10x128xbf16, #tpu.memory_space<vmem>>, vector<8x8x128xbf16>
    %33 = vector.shape_cast %32 : vector<8x8x128xbf16> to vector<64x128xbf16>
    %c0_33 = arith.constant 0 : index
    %c0_34 = arith.constant 0 : index
    %c0_35 = arith.constant 0 : index
    %34 = vector.load %arg6[%c0_33, %c0_34, %c0_35] : memref<1x64x128xf32, #tpu.memory_space<vmem>>, vector<1x64x128xf32>
    %35 = vector.shape_cast %34 : vector<1x64x128xf32> to vector<64x128xf32>
    %c1_36 = arith.constant 1 : index
    %c0_37 = arith.constant 0 : index
    %c0_38 = arith.constant 0 : index
    %36 = vector.load %arg4[%c1_36, %c0_37, %c0_38] : memref<9x128x128xbf16, #tpu.memory_space<vmem>>, vector<1x128x128xbf16>
    %37 = vector.shape_cast %36 : vector<1x128x128xbf16> to vector<128x128xbf16>
    %cst_39 = arith.constant dense<0.000000e+00> : vector<64x128xf32>
    %38 = tpu.matmul %33, %37, %cst_39 {dimension_numbers = #tpu.dot_dimension_numbers<[1], [0], [0], [1], [0, 0, 1, 1], [], []>} : vector<64x128xbf16>, vector<128x128xbf16>, vector<64x128xf32> -> vector<64x128xf32>
    %39 = arith.addf %35, %38 : vector<64x128xf32>
    %c0_40 = arith.constant 0 : index
    %c0_41 = arith.constant 0 : index
    %c0_42 = arith.constant 0 : index
    %40 = vector.load %arg6[%c0_40, %c0_41, %c0_42] : memref<1x64x128xf32, #tpu.memory_space<vmem>>, vector<1x64x128xf32>
    %41 = vector.shape_cast %40 : vector<1x64x128xf32> to vector<64x128xf32>
    %42 = vector.shape_cast %39 : vector<64x128xf32> to vector<1x64x128xf32>
    tpu.vector_store %arg6[%c0_40, %c0_41, %c0_42], %42 {strides = array<i32>} : memref<1x64x128xf32, #tpu.memory_space<vmem>>, vector<1x64x128xf32>,
    %c0_43 = arith.constant 0 : index
    %c2 = arith.constant 2 : index
    %c0_44 = arith.constant 0 : index
    %43 = vector.load %arg8[%c0_43, %c2, %c0_44] : memref<10x10x128xbf16, #tpu.memory_space<vmem>>, vector<8x8x128xbf16>
    %44 = vector.shape_cast %43 : vector<8x8x128xbf16> to vector<64x128xbf16>
    %c0_45 = arith.constant 0 : index
    %c0_46 = arith.constant 0 : index
    %c0_47 = arith.constant 0 : index
    %45 = vector.load %arg6[%c0_45, %c0_46, %c0_47] : memref<1x64x128xf32, #tpu.memory_space<vmem>>, vector<1x64x128xf32>
    %46 = vector.shape_cast %45 : vector<1x64x128xf32> to vector<64x128xf32>
    %c2_48 = arith.constant 2 : index
    %c0_49 = arith.constant 0 : index
    %c0_50 = arith.constant 0 : index
    %47 = vector.load %arg4[%c2_48, %c0_49, %c0_50] : memref<9x128x128xbf16, #tpu.memory_space<vmem>>, vector<1x128x128xbf16>
    %48 = vector.shape_cast %47 : vector<1x128x128xbf16> to vector<128x128xbf16>
    %cst_51 = arith.constant dense<0.000000e+00> : vector<64x128xf32>
    %49 = tpu.matmul %44, %48, %cst_51 {dimension_numbers = #tpu.dot_dimension_numbers<[1], [0], [0], [1], [0, 0, 1, 1], [], []>} : vector<64x128xbf16>, vector<128x128xbf16>, vector<64x128xf32> -> vector<64x128xf32>
    %50 = arith.addf %46, %49 : vector<64x128xf32>
    %c0_52 = arith.constant 0 : index
    %c0_53 = arith.constant 0 : index
    %c0_54 = arith.constant 0 : index
    %51 = vector.load %arg6[%c0_52, %c0_53, %c0_54] : memref<1x64x128xf32, #tpu.memory_space<vmem>>, vector<1x64x128xf32>
    %52 = vector.shape_cast %51 : vector<1x64x128xf32> to vector<64x128xf32>
    %53 = vector.shape_cast %50 : vector<64x128xf32> to vector<1x64x128xf32>
    tpu.vector_store %arg6[%c0_52, %c0_53, %c0_54], %53 {strides = array<i32>} : memref<1x64x128xf32, #tpu.memory_space<vmem>>, vector<1x64x128xf32>,
    %c1_55 = arith.constant 1 : index
    %c0_56 = arith.constant 0 : index
    %c0_57 = arith.constant 0 : index
    %54 = vector.load %arg8[%c1_55, %c0_56, %c0_57] : memref<10x10x128xbf16, #tpu.memory_space<vmem>>, vector<8x8x128xbf16>
    %55 = vector.shape_cast %54 : vector<8x8x128xbf16> to vector<64x128xbf16>
    %c0_58 = arith.constant 0 : index
    %c0_59 = arith.constant 0 : index
    %c0_60 = arith.constant 0 : index
    %56 = vector.load %arg6[%c0_58, %c0_59, %c0_60] : memref<1x64x128xf32, #tpu.memory_space<vmem>>, vector<1x64x128xf32>
    %57 = vector.shape_cast %56 : vector<1x64x128xf32> to vector<64x128xf32>
    %c3 = arith.constant 3 : index
    %c0_61 = arith.constant 0 : index
    %c0_62 = arith.constant 0 : index
    %58 = vector.load %arg4[%c3, %c0_61, %c0_62] : memref<9x128x128xbf16, #tpu.memory_space<vmem>>, vector<1x128x128xbf16>
    %59 = vector.shape_cast %58 : vector<1x128x128xbf16> to vector<128x128xbf16>
    %cst_63 = arith.constant dense<0.000000e+00> : vector<64x128xf32>
    %60 = tpu.matmul %55, %59, %cst_63 {dimension_numbers = #tpu.dot_dimension_numbers<[1], [0], [0], [1], [0, 0, 1, 1], [], []>} : vector<64x128xbf16>, vector<128x128xbf16>, vector<64x128xf32> -> vector<64x128xf32>
    %61 = arith.addf %57, %60 : vector<64x128xf32>
    %c0_64 = arith.constant 0 : index
    %c0_65 = arith.constant 0 : index
    %c0_66 = arith.constant 0 : index
    %62 = vector.load %arg6[%c0_64, %c0_65, %c0_66] : memref<1x64x128xf32, #tpu.memory_space<vmem>>, vector<1x64x128xf32>
    %63 = vector.shape_cast %62 : vector<1x64x128xf32> to vector<64x128xf32>
    %64 = vector.shape_cast %61 : vector<64x128xf32> to vector<1x64x128xf32>
    tpu.vector_store %arg6[%c0_64, %c0_65, %c0_66], %64 {strides = array<i32>} : memref<1x64x128xf32, #tpu.memory_space<vmem>>, vector<1x64x128xf32>,
    %c1_67 = arith.constant 1 : index
    %c1_68 = arith.constant 1 : index
    %c0_69 = arith.constant 0 : index
    %65 = vector.load %arg8[%c1_67, %c1_68, %c0_69] : memref<10x10x128xbf16, #tpu.memory_space<vmem>>, vector<8x8x128xbf16>
    %66 = vector.shape_cast %65 : vector<8x8x128xbf16> to vector<64x128xbf16>
    %c0_70 = arith.constant 0 : index
    %c0_71 = arith.constant 0 : index
    %c0_72 = arith.constant 0 : index
    %67 = vector.load %arg6[%c0_70, %c0_71, %c0_72] : memref<1x64x128xf32, #tpu.memory_space<vmem>>, vector<1x64x128xf32>
    %68 = vector.shape_cast %67 : vector<1x64x128xf32> to vector<64x128xf32>
    %c4 = arith.constant 4 : index
    %c0_73 = arith.constant 0 : index
    %c0_74 = arith.constant 0 : index
    %69 = vector.load %arg4[%c4, %c0_73, %c0_74] : memref<9x128x128xbf16, #tpu.memory_space<vmem>>, vector<1x128x128xbf16>
    %70 = vector.shape_cast %69 : vector<1x128x128xbf16> to vector<128x128xbf16>
    %cst_75 = arith.constant dense<0.000000e+00> : vector<64x128xf32>
    %71 = tpu.matmul %66, %70, %cst_75 {dimension_numbers = #tpu.dot_dimension_numbers<[1], [0], [0], [1], [0, 0, 1, 1], [], []>} : vector<64x128xbf16>, vector<128x128xbf16>, vector<64x128xf32> -> vector<64x128xf32>
    %72 = arith.addf %68, %71 : vector<64x128xf32>
    %c0_76 = arith.constant 0 : index
    %c0_77 = arith.constant 0 : index
    %c0_78 = arith.constant 0 : index
    %73 = vector.load %arg6[%c0_76, %c0_77, %c0_78] : memref<1x64x128xf32, #tpu.memory_space<vmem>>, vector<1x64x128xf32>
    %74 = vector.shape_cast %73 : vector<1x64x128xf32> to vector<64x128xf32>
    %75 = vector.shape_cast %72 : vector<64x128xf32> to vector<1x64x128xf32>
    tpu.vector_store %arg6[%c0_76, %c0_77, %c0_78], %75 {strides = array<i32>} : memref<1x64x128xf32, #tpu.memory_space<vmem>>, vector<1x64x128xf32>,
    %c1_79 = arith.constant 1 : index
    %c2_80 = arith.constant 2 : index
    %c0_81 = arith.constant 0 : index
    %76 = vector.load %arg8[%c1_79, %c2_80, %c0_81] : memref<10x10x128xbf16, #tpu.memory_space<vmem>>, vector<8x8x128xbf16>
    %77 = vector.shape_cast %76 : vector<8x8x128xbf16> to vector<64x128xbf16>
    %c0_82 = arith.constant 0 : index
    %c0_83 = arith.constant 0 : index
    %c0_84 = arith.constant 0 : index
    %78 = vector.load %arg6[%c0_82, %c0_83, %c0_84] : memref<1x64x128xf32, #tpu.memory_space<vmem>>, vector<1x64x128xf32>
    %79 = vector.shape_cast %78 : vector<1x64x128xf32> to vector<64x128xf32>
    %c5 = arith.constant 5 : index
    %c0_85 = arith.constant 0 : index
    %c0_86 = arith.constant 0 : index
    %80 = vector.load %arg4[%c5, %c0_85, %c0_86] : memref<9x128x128xbf16, #tpu.memory_space<vmem>>, vector<1x128x128xbf16>
    %81 = vector.shape_cast %80 : vector<1x128x128xbf16> to vector<128x128xbf16>
    %cst_87 = arith.constant dense<0.000000e+00> : vector<64x128xf32>
    %82 = tpu.matmul %77, %81, %cst_87 {dimension_numbers = #tpu.dot_dimension_numbers<[1], [0], [0], [1], [0, 0, 1, 1], [], []>} : vector<64x128xbf16>, vector<128x128xbf16>, vector<64x128xf32> -> vector<64x128xf32>
    %83 = arith.addf %79, %82 : vector<64x128xf32>
    %c0_88 = arith.constant 0 : index
    %c0_89 = arith.constant 0 : index
    %c0_90 = arith.constant 0 : index
    %84 = vector.load %arg6[%c0_88, %c0_89, %c0_90] : memref<1x64x128xf32, #tpu.memory_space<vmem>>, vector<1x64x128xf32>
    %85 = vector.shape_cast %84 : vector<1x64x128xf32> to vector<64x128xf32>
    %86 = vector.shape_cast %83 : vector<64x128xf32> to vector<1x64x128xf32>
    tpu.vector_store %arg6[%c0_88, %c0_89, %c0_90], %86 {strides = array<i32>} : memref<1x64x128xf32, #tpu.memory_space<vmem>>, vector<1x64x128xf32>,
    %c2_91 = arith.constant 2 : index
    %c0_92 = arith.constant 0 : index
    %c0_93 = arith.constant 0 : index
    %87 = vector.load %arg8[%c2_91, %c0_92, %c0_93] : memref<10x10x128xbf16, #tpu.memory_space<vmem>>, vector<8x8x128xbf16>
    %88 = vector.shape_cast %87 : vector<8x8x128xbf16> to vector<64x128xbf16>
    %c0_94 = arith.constant 0 : index
    %c0_95 = arith.constant 0 : index
    %c0_96 = arith.constant 0 : index
    %89 = vector.load %arg6[%c0_94, %c0_95, %c0_96] : memref<1x64x128xf32, #tpu.memory_space<vmem>>, vector<1x64x128xf32>
    %90 = vector.shape_cast %89 : vector<1x64x128xf32> to vector<64x128xf32>
    %c6 = arith.constant 6 : index
    %c0_97 = arith.constant 0 : index
    %c0_98 = arith.constant 0 : index
    %91 = vector.load %arg4[%c6, %c0_97, %c0_98] : memref<9x128x128xbf16, #tpu.memory_space<vmem>>, vector<1x128x128xbf16>
    %92 = vector.shape_cast %91 : vector<1x128x128xbf16> to vector<128x128xbf16>
    %cst_99 = arith.constant dense<0.000000e+00> : vector<64x128xf32>
    %93 = tpu.matmul %88, %92, %cst_99 {dimension_numbers = #tpu.dot_dimension_numbers<[1], [0], [0], [1], [0, 0, 1, 1], [], []>} : vector<64x128xbf16>, vector<128x128xbf16>, vector<64x128xf32> -> vector<64x128xf32>
    %94 = arith.addf %90, %93 : vector<64x128xf32>
    %c0_100 = arith.constant 0 : index
    %c0_101 = arith.constant 0 : index
    %c0_102 = arith.constant 0 : index
    %95 = vector.load %arg6[%c0_100, %c0_101, %c0_102] : memref<1x64x128xf32, #tpu.memory_space<vmem>>, vector<1x64x128xf32>
    %96 = vector.shape_cast %95 : vector<1x64x128xf32> to vector<64x128xf32>
    %97 = vector.shape_cast %94 : vector<64x128xf32> to vector<1x64x128xf32>
    tpu.vector_store %arg6[%c0_100, %c0_101, %c0_102], %97 {strides = array<i32>} : memref<1x64x128xf32, #tpu.memory_space<vmem>>, vector<1x64x128xf32>,
    %c2_103 = arith.constant 2 : index
    %c1_104 = arith.constant 1 : index
    %c0_105 = arith.constant 0 : index
    %98 = vector.load %arg8[%c2_103, %c1_104, %c0_105] : memref<10x10x128xbf16, #tpu.memory_space<vmem>>, vector<8x8x128xbf16>
    %99 = vector.shape_cast %98 : vector<8x8x128xbf16> to vector<64x128xbf16>
    %c0_106 = arith.constant 0 : index
    %c0_107 = arith.constant 0 : index
    %c0_108 = arith.constant 0 : index
    %100 = vector.load %arg6[%c0_106, %c0_107, %c0_108] : memref<1x64x128xf32, #tpu.memory_space<vmem>>, vector<1x64x128xf32>
    %101 = vector.shape_cast %100 : vector<1x64x128xf32> to vector<64x128xf32>
    %c7 = arith.constant 7 : index
    %c0_109 = arith.constant 0 : index
    %c0_110 = arith.constant 0 : index
    %102 = vector.load %arg4[%c7, %c0_109, %c0_110] : memref<9x128x128xbf16, #tpu.memory_space<vmem>>, vector<1x128x128xbf16>
    %103 = vector.shape_cast %102 : vector<1x128x128xbf16> to vector<128x128xbf16>
    %cst_111 = arith.constant dense<0.000000e+00> : vector<64x128xf32>
    %104 = tpu.matmul %99, %103, %cst_111 {dimension_numbers = #tpu.dot_dimension_numbers<[1], [0], [0], [1], [0, 0, 1, 1], [], []>} : vector<64x128xbf16>, vector<128x128xbf16>, vector<64x128xf32> -> vector<64x128xf32>
    %105 = arith.addf %101, %104 : vector<64x128xf32>
    %c0_112 = arith.constant 0 : index
    %c0_113 = arith.constant 0 : index
    %c0_114 = arith.constant 0 : index
    %106 = vector.load %arg6[%c0_112, %c0_113, %c0_114] : memref<1x64x128xf32, #tpu.memory_space<vmem>>, vector<1x64x128xf32>
    %107 = vector.shape_cast %106 : vector<1x64x128xf32> to vector<64x128xf32>
    %108 = vector.shape_cast %105 : vector<64x128xf32> to vector<1x64x128xf32>
    tpu.vector_store %arg6[%c0_112, %c0_113, %c0_114], %108 {strides = array<i32>} : memref<1x64x128xf32, #tpu.memory_space<vmem>>, vector<1x64x128xf32>,
    %c2_115 = arith.constant 2 : index
    %c2_116 = arith.constant 2 : index
    %c0_117 = arith.constant 0 : index
    %109 = vector.load %arg8[%c2_115, %c2_116, %c0_117] : memref<10x10x128xbf16, #tpu.memory_space<vmem>>, vector<8x8x128xbf16>
    %110 = vector.shape_cast %109 : vector<8x8x128xbf16> to vector<64x128xbf16>
    %c0_118 = arith.constant 0 : index
    %c0_119 = arith.constant 0 : index
    %c0_120 = arith.constant 0 : index
    %111 = vector.load %arg6[%c0_118, %c0_119, %c0_120] : memref<1x64x128xf32, #tpu.memory_space<vmem>>, vector<1x64x128xf32>
    %112 = vector.shape_cast %111 : vector<1x64x128xf32> to vector<64x128xf32>
    %c8 = arith.constant 8 : index
    %c0_121 = arith.constant 0 : index
    %c0_122 = arith.constant 0 : index
    %113 = vector.load %arg4[%c8, %c0_121, %c0_122] : memref<9x128x128xbf16, #tpu.memory_space<vmem>>, vector<1x128x128xbf16>
    %114 = vector.shape_cast %113 : vector<1x128x128xbf16> to vector<128x128xbf16>
    %cst_123 = arith.constant dense<0.000000e+00> : vector<64x128xf32>
    %115 = tpu.matmul %110, %114, %cst_123 {dimension_numbers = #tpu.dot_dimension_numbers<[1], [0], [0], [1], [0, 0, 1, 1], [], []>} : vector<64x128xbf16>, vector<128x128xbf16>, vector<64x128xf32> -> vector<64x128xf32>
    %116 = arith.addf %112, %115 : vector<64x128xf32>
    %c0_124 = arith.constant 0 : index
    %c0_125 = arith.constant 0 : index
    %c0_126 = arith.constant 0 : index
    %117 = vector.load %arg6[%c0_124, %c0_125, %c0_126] : memref<1x64x128xf32, #tpu.memory_space<vmem>>, vector<1x64x128xf32>
    %118 = vector.shape_cast %117 : vector<1x64x128xf32> to vector<64x128xf32>
    %119 = vector.shape_cast %116 : vector<64x128xf32> to vector<1x64x128xf32>
    tpu.vector_store %arg6[%c0_124, %c0_125, %c0_126], %119 {strides = array<i32>} : memref<1x64x128xf32, #tpu.memory_space<vmem>>, vector<1x64x128xf32>,
    %c0_127 = arith.constant 0 : index
    %c0_128 = arith.constant 0 : index
    %c0_129 = arith.constant 0 : index
    %120 = vector.load %arg6[%c0_127, %c0_128, %c0_129] : memref<1x64x128xf32, #tpu.memory_space<vmem>>, vector<1x64x128xf32>
    %121 = vector.shape_cast %120 : vector<1x64x128xf32> to vector<64x128xf32>
    %cst_130 = arith.constant dense<0.000000e+00> : vector<128xf32>
    %122 = vector.multi_reduction <add>, %121, %cst_130 [0] : vector<64x128xf32> to vector<128xf32>
    %123 = vector.shape_cast %122 : vector<128xf32> to vector<1x128xf32>
    %c0_131 = arith.constant 0 : index
    %c0_132 = arith.constant 0 : index
    %c0_133 = arith.constant 0 : index
    %124 = vector.load %arg7[%c0_131, %c0_132, %c0_133] : memref<1x2x128xf32, #tpu.memory_space<vmem>>, vector<1x1x128xf32>
    %125 = vector.shape_cast %124 : vector<1x1x128xf32> to vector<1x128xf32>
    %126 = vector.shape_cast %123 : vector<1x128xf32> to vector<1x1x128xf32>
    tpu.vector_store %arg7[%c0_131, %c0_132, %c0_133], %126 {strides = array<i32>} : memref<1x2x128xf32, #tpu.memory_space<vmem>>, vector<1x1x128xf32>,
    %127 = arith.mulf %121, %121 : vector<64x128xf32>
    %cst_134 = arith.constant dense<0.000000e+00> : vector<128xf32>
    %128 = vector.multi_reduction <add>, %127, %cst_134 [0] : vector<64x128xf32> to vector<128xf32>
    %129 = vector.shape_cast %128 : vector<128xf32> to vector<1x128xf32>
    %c0_135 = arith.constant 0 : index
    %c1_136 = arith.constant 1 : index
    %c0_137 = arith.constant 0 : index
    %130 = vector.load %arg7[%c0_135, %c1_136, %c0_137] : memref<1x2x128xf32, #tpu.memory_space<vmem>>, vector<1x1x128xf32>
    %131 = vector.shape_cast %130 : vector<1x1x128xf32> to vector<1x128xf32>
    %132 = vector.shape_cast %129 : vector<1x128xf32> to vector<1x1x128xf32>
    tpu.vector_store %arg7[%c0_135, %c1_136, %c0_137], %132 {strides = array<i32>} : memref<1x2x128xf32, #tpu.memory_space<vmem>>, vector<1x1x128xf32>,
    return
  }
  func.func @transform_0(%arg0: i32) -> (i32, i32, i32) {
    %c0_i32 = arith.constant 0 : i32
    %c0_i32_0 = arith.constant 0 : i32
    %c0_i32_1 = arith.constant 0 : i32
    return %arg0, %c0_i32, %c0_i32_0 : i32, i32, i32
  }
  func.func @transform_1(%arg0: i32) -> (i32, i32) {
    %c0_i32 = arith.constant 0 : i32
    %c0_i32_0 = arith.constant 0 : i32
    %c0_i32_1 = arith.constant 0 : i32
    return %c0_i32, %c0_i32_0 : i32, i32
  }
  func.func @transform_2(%arg0: i32) -> (i32, i32) {
    %c0_i32 = arith.constant 0 : i32
    %c0_i32_0 = arith.constant 0 : i32
    %c0_i32_1 = arith.constant 0 : i32
    return %c0_i32, %c0_i32_0 : i32, i32
  }
  func.func @transform_3(%arg0: i32) -> (i32, i32, i32) {
    %c0_i32 = arith.constant 0 : i32
    %c0_i32_0 = arith.constant 0 : i32
    %c0_i32_1 = arith.constant 0 : i32
    %c0_i32_2 = arith.constant 0 : i32
    return %c0_i32, %c0_i32_0, %c0_i32_1 : i32, i32, i32
  }
  func.func @transform_4(%arg0: i32) -> (i32, i32) {
    %c0_i32 = arith.constant 0 : i32
    %c0_i32_0 = arith.constant 0 : i32
    %c0_i32_1 = arith.constant 0 : i32
    return %c0_i32, %c0_i32_0 : i32, i32
  }
  func.func @transform_5(%arg0: i32) -> (i32, i32, i32) {
    %c0_i32 = arith.constant 0 : i32
    %c0_i32_0 = arith.constant 0 : i32
    %c0_i32_1 = arith.constant 0 : i32
    return %arg0, %c0_i32, %c0_i32_0 : i32, i32, i32
  }
  func.func @transform_6(%arg0: i32) -> (i32, i32, i32) {
    %c0_i32 = arith.constant 0 : i32
    %c0_i32_0 = arith.constant 0 : i32
    %c0_i32_1 = arith.constant 0 : i32
    return %arg0, %c0_i32, %c0_i32_0 : i32, i32, i32
  }
}

module attributes {stable_mosaic.version = 11 : i64} {
  func.func @_bn_relu_kernel(%arg0: i32, %arg1: memref<1x64x128xf32, #tpu.memory_space<vmem>>, %arg2: memref<1x128xf32, #tpu.memory_space<vmem>>, %arg3: memref<1x128xf32, #tpu.memory_space<vmem>>, %arg4: memref<1x64x8xf32, #tpu.memory_space<vmem>>) attributes {dimension_semantics = [#tpu.dimension_semantics<parallel>], iteration_bounds = array<i64: 2>, scalar_prefetch = 0 : i64, scratch_operands = 0 : i64, tpu.core_type = #tpu.core_type<tc>, window_params = [{transform_indices = @transform_0, window_bounds = array<i64: 1, 64, 128>}, {pipeline_mode = #tpu.pipeline_mode<synchronous>, transform_indices = @transform_1, window_bounds = array<i64: 1, 128>}, {pipeline_mode = #tpu.pipeline_mode<synchronous>, transform_indices = @transform_2, window_bounds = array<i64: 1, 128>}, {transform_indices = @transform_3, window_bounds = array<i64: 1, 64, 8>}]} {
    %c0 = arith.constant 0 : index
    %c0_0 = arith.constant 0 : index
    %c0_1 = arith.constant 0 : index
    %0 = vector.load %arg1[%c0, %c0_0, %c0_1] : memref<1x64x128xf32, #tpu.memory_space<vmem>>, vector<1x64x128xf32>
    %1 = vector.shape_cast %0 : vector<1x64x128xf32> to vector<64x128xf32>
    %c0_2 = arith.constant 0 : index
    %c0_3 = arith.constant 0 : index
    %2 = vector.load %arg2[%c0_2, %c0_3] : memref<1x128xf32, #tpu.memory_space<vmem>>, vector<1x128xf32>
    %3 = vector.broadcast %2 : vector<1x128xf32> to vector<64x128xf32>
    %4 = arith.mulf %1, %3 : vector<64x128xf32>
    %c0_4 = arith.constant 0 : index
    %c0_5 = arith.constant 0 : index
    %5 = vector.load %arg3[%c0_4, %c0_5] : memref<1x128xf32, #tpu.memory_space<vmem>>, vector<1x128xf32>
    %6 = vector.broadcast %5 : vector<1x128xf32> to vector<64x128xf32>
    %7 = arith.addf %4, %6 : vector<64x128xf32>
    %cst = arith.constant 0.000000e+00 : f32
    %8 = vector.broadcast %cst : f32 to vector<64x128xf32>
    %9 = arith.maximumf %7, %8 : vector<64x128xf32>
    %10 = vector.extract_strided_slice %9 {offsets = [0, 0], sizes = [64, 8], strides = [1, 1]} : vector<64x128xf32> to vector<64x8xf32>
    %c0_6 = arith.constant 0 : index
    %c0_7 = arith.constant 0 : index
    %c0_8 = arith.constant 0 : index
    %11 = vector.load %arg4[%c0_6, %c0_7, %c0_8] : memref<1x64x8xf32, #tpu.memory_space<vmem>>, vector<1x64x8xf32>
    %12 = vector.shape_cast %11 : vector<1x64x8xf32> to vector<64x8xf32>
    %13 = vector.shape_cast %10 : vector<64x8xf32> to vector<1x64x8xf32>
    tpu.vector_store %arg4[%c0_6, %c0_7, %c0_8], %13 {strides = array<i32>} : memref<1x64x8xf32, #tpu.memory_space<vmem>>, vector<1x64x8xf32>,
    return
  }
  func.func @transform_0(%arg0: i32) -> (i32, i32, i32) {
    %c0_i32 = arith.constant 0 : i32
    %c0_i32_0 = arith.constant 0 : i32
    %c0_i32_1 = arith.constant 0 : i32
    return %arg0, %c0_i32, %c0_i32_0 : i32, i32, i32
  }
  func.func @transform_1(%arg0: i32) -> (i32, i32) {
    %c0_i32 = arith.constant 0 : i32
    %c0_i32_0 = arith.constant 0 : i32
    %c0_i32_1 = arith.constant 0 : i32
    return %c0_i32, %c0_i32_0 : i32, i32
  }
  func.func @transform_2(%arg0: i32) -> (i32, i32) {
    %c0_i32 = arith.constant 0 : i32
    %c0_i32_0 = arith.constant 0 : i32
    %c0_i32_1 = arith.constant 0 : i32
    return %c0_i32, %c0_i32_0 : i32, i32
  }
  func.func @transform_3(%arg0: i32) -> (i32, i32, i32) {
    %c0_i32 = arith.constant 0 : i32
    %c0_i32_0 = arith.constant 0 : i32
    %c0_i32_1 = arith.constant 0 : i32
    return %arg0, %c0_i32, %c0_i32_0 : i32, i32, i32
  }
}

</mosaic_0001>

<bundles_post_ra>
// kernel: down_forward.5
= control target key start
LH: loop header
LB: loop body
LE: loop exit
PB: predicated region body
PF: predicated region fallthrough
CT: control target
= control target key end

     0   :  { %s326_s12 = smov 0   ;;  %s357_s0 = inlined_call_operand.vmem [shape: f32[2,64,128], index: 0, kind: input, shape index: {}]   ;;  %s358_s1 = inlined_call_operand.vmem [shape: f32[1,128], index: 1, kind: input, shape index: {}]   ;;  %s359_s2 = inlined_call_operand.vmem [shape: f32[1,128], index: 2, kind: input, shape index: {}]   ;;  %s360_s3 = inlined_call_operand.vmem [shape: f32[2,64,8], index: 3, kind: output, shape index: {}]  }
   0x1 LB: > { %s275_s13 = sadd.s32 4294967295, %s304_s12   ;;  %p279_p0 = scmp.ge.s32.totalorder %s304_s12, 1  ;;  %s304_s12 = sphi %s326_s12, %s13_s12  }
   0x2   : > { %p137_p1 = scmp.lt.s32.totalorder %s304_s12, 3 }
   0x4   : > { %p138_p2 = pnand %p279_p0, %p137_p1 }
   0x5   : > { %p161_p3 = scmp.lt.s32.totalorder (!%p138_p2), %s275_s13, 1 }
   0x6   : > { %141 = sbr.rel (%p138_p2) target bundleno = 29 (0x1d), region = 32 }
   0xb   : > { %s362_s13 = smov (!%p161_p3, %s275_s13), 1  ;;  %v296_v0 = vld [vmem:[%s358_s1] ss:$0 sm:$0xff]  ;;  %vm211_vm0 = vcmask 64512  }
   0xc   : > { %s286_s16 = sshll.u32 %s362_s13, 6  ;;  %v297_v1 = vld [vmem:[%s359_s2] ss:$0 sm:$0xff] }
   0xd   : > { %s165_s19 = scalar_lea.vmem %s357_s0, %s286_s16  ;;  %s170_s24 = scalar_lea.vmem %s360_s3, %s286_s16 }
   0xe   : > { %v171_v2 = vld [vmem:[%s165_s19] sm:$0xff]  ;;  %v172_v3 = vld [vmem:[%s165_s19 + $0x8] sm:$0xff]  ;;  %v173_v4 = vld [vmem:[%s165_s19 + $0x10] sm:$0xff] }
   0xf   : > { %v183_v5 = vmul.f32 %v296_v0, %v171_v2  ;;  %v184_v6 = vmul.f32 %v296_v0, %v172_v3  ;;  %v185_v7 = vmul.f32 %v296_v0, %v173_v4  ;;  %v174_v8 = vld [vmem:[%s165_s19 + $0x18] sm:$0xff]  ;;  %v175_v9 = vld [vmem:[%s165_s19 + $0x20] sm:$0xff]  ;;  %v176_v10 = vld [vmem:[%s165_s19 + $0x28] sm:$0xff] }
  0x10   : > { %v186_v11 = vmul.f32 %v296_v0, %v174_v8  ;;  %v187_v12 = vmul.f32 %v296_v0, %v175_v9  ;;  %v188_v13 = vmul.f32 %v296_v0, %v176_v10  ;;  %v177_v14 = vld [vmem:[%s165_s19 + $0x30] sm:$0xff]  ;;  %v178_v15 = vld [vmem:[%s165_s19 + $0x38] sm:$0xff] }
  0x11   : > { %v195_v16 = vadd.f32 %v297_v1, %v183_v5  ;;  %v196_v17 = vadd.f32 %v297_v1, %v184_v6  ;;  %v197_v18 = vadd.f32 %v297_v1, %v185_v7  ;;  %v189_v19 = vmul.f32 %v296_v0, %v177_v14 }
  0x12   : > { %v198_v20 = vadd.f32 %v297_v1, %v186_v11  ;;  %v199_v21 = vadd.f32 %v297_v1, %v187_v12  ;;  %v200_v22 = vadd.f32 %v297_v1, %v188_v13  ;;  %v190_v23 = vmul.f32 %v296_v0, %v178_v15 }
  0x13   : > { %v203_v24 = vmax.f32 %v195_v16, 0.0  ;;  %v204_v25 = vmax.f32 %v196_v17, 0.0  ;;  %v205_v26 = vmax.f32 %v197_v18, 0.0  ;;  %v201_v27 = vadd.f32 %v297_v1, %v189_v19 }
  0x14   : > { %v206_v28 = vmax.f32 %v198_v20, 0.0  ;;  %v202_v29 = vadd.f32 %v297_v1, %v190_v23  ;;  %v207_v30 = vmax.f32 %v199_v21, 0.0  ;;  %v208_v31 = vmax.f32 %v200_v22, 0.0 }
  0x15   : > { %212 = vst.msk [vmem:[%s170_s24] sm:$0xff] %vm211_vm0, %v203_v24  ;;  %v209_v32 = vmax.f32 %v201_v27, 0.0 }
  0x16   : > { %213 = vst.msk [vmem:[%s170_s24 + $0x8] sm:$0xff] %vm211_vm0, %v204_v25  ;;  %v210_v33 = vmax.f32 %v202_v29, 0.0 }
  0x17   : > { %214 = vst.msk [vmem:[%s170_s24 + $0x10] sm:$0xff] %vm211_vm0, %v205_v26 }
  0x18   : > { %215 = vst.msk [vmem:[%s170_s24 + $0x18] sm:$0xff] %vm211_vm0, %v206_v28 }
  0x19   : > { %216 = vst.msk [vmem:[%s170_s24 + $0x20] sm:$0xff] %vm211_vm0, %v207_v30 }
  0x1a   : > { %217 = vst.msk [vmem:[%s170_s24 + $0x28] sm:$0xff] %vm211_vm0, %v208_v31 }
  0x1b   : > { %218 = vst.msk [vmem:[%s170_s24 + $0x30] sm:$0xff] %vm211_vm0, %v209_v32 }
  0x1c   : > { %219 = vst.msk [vmem:[%s170_s24 + $0x38] sm:$0xff] %vm211_vm0, %v210_v33 }
  0x1d PF: > { %s13_s12 = sadd.s32 1, %s304_s12  }
  0x1e   : > { %p10_p4 = scmp.ge.s32.totalorder %s13_s12, 4  }
  0x20   :  { %12 = sbr.rel (!%p10_p4) target bundleno = 1 (0x1), region = 62 }

// kernel: down_forward.3
= control target key start
LH: loop header
LB: loop body
LE: loop exit
PB: predicated region body
PF: predicated region fallthrough
CT: control target
= control target key end

     0   :  { %s2076_s15 = smov 0   ;;  %s2512_s0 = inlined_call_operand.vmem [shape: bf16[2,8,8,8], index: 0, kind: input, shape index: {}]   ;;  %s2513_s1 = inlined_call_operand.vmem [shape: bf16[9,8,128], index: 1, kind: input, shape index: {}]   ;;  %s2514_s2 = inlined_call_operand.vmem [shape: f32[1,128], index: 2, kind: input, shape index: {}]   ;;  %s2515_s3 = inlined_call_operand.vmem [shape: f32[2,64,128], index: 3, kind: output, shape index: {0}]   ;;  %s2516_s4 = inlined_call_operand.vmem [shape: f32[2,2,128], index: 4, kind: output, shape index: {1}]  }
   0x1 LB: > { %s1887_s16 = sadd.s32 4294967295, %s2048_s15   ;;  %p1891_p0 = scmp.ge.s32.totalorder %s2048_s15, 1  ;;  %s2048_s15 = sphi %s2076_s15, %s15_s15  }
   0x2   : > { %p165_p1 = scmp.lt.s32.totalorder %s2048_s15, 3 }
   0x4   : > { %p166_p2 = pnand %p1891_p0, %p165_p1 }
   0x5   : > { %p195_p3 = scmp.lt.s32.totalorder (!%p166_p2), %s1887_s16, 1 }
   0x6   : > { %169 = sbr.rel (%p166_p2) target bundleno = 337 (0x151), region = 32 }
   0xb   : > { %v403_v0 = vld [vmem:[%s2513_s1] sm:$0xf]  ;;  %vm437_vm0 = vcmask 1043456   ;;  %vm210_vm1 = vcmask 60416   ;;  %v2050_v2 = vmov 0   ;;  %s2526_s16 = smov (!%p195_p3, %s1887_s16), 1 }
   0xc   : > { %v439_v1 = vsel %vm437_vm0, %v403_v0, 0  ;;  %216 = vst.msk [vmem:[#allocation2 + $0x10] sm:$0xf] %vm210_vm1, %v2050_v2  ;;  %v1917_v3 = vld [vmem:[%s2513_s1 + $0x4] sm:$0xf]  ;;  %s2015_s23 = sshll.u32 %s2526_s16, 5 }
   0xd   : > { %2029 = vmatpush.bf16.msra.mxu1 %v439_v1  ;;  %2030 = vmatpush.bf16.msra.mxu2 %v439_v1  ;;  %218 = vst.msk [vmem:[#allocation2 + $0x18] sm:$0xf] %vm210_vm1, %v2050_v2  ;;  %v652_v4 = vsel %vm437_vm0, %v1917_v3, 0  ;;  %v1930_v5 = vld [vmem:[%s2513_s1 + $0x8] sm:$0xf]  ;;  %s2110_s26 = scalar_lea.vmem %s2512_s0, %s2015_s23  ;;  %vm212_vm5 = vcmask 57344  }
   0xe   : > { %211 = vst.msk [vmem:[#allocation2] sm:$0xf] %vm210_vm1, %v2050_v2  ;;  %448 = vmatpush.bf16.msra.mxu0 %v439_v1  ;;  %2031 = vmatpush.bf16.msra.mxu3 %v439_v1  ;;  %v801_v6 = vsel %vm437_vm0, %v1930_v5, 0  ;;  %vm322_vm2 = vsmask.f32 7938  ;;  %vm424_vm6 = vcmask 64512  }
   0xf   : > { %214 = vst.msk [vmem:[#allocation2 + $0x8] sm:$0xf] %vm210_vm1, %v2050_v2  ;;  %v233_v7 = vld [vmem:[%s2110_s26 + $0x4] sm:$0xf]  ;;  %v234_v8 = vld [vmem:[%s2110_s26 + $0x8] sm:$0xf]  ;;  %vm2134_vm3 = vmand %vm210_vm1, %vm322_vm2 }
  0x10   : > { %220 = vst.msk [vmem:[#allocation2 + $0x20] sm:$0xf] %vm210_vm1, %v2050_v2  ;;  %v249_v9 = vshrl.u32 %v233_v7, 16  ;;  %v252_v10 = vshll.u32 %v233_v7, 16  ;;  %v257_v11 = vshrl.u32 %v234_v8, 16  ;;  %v260_v12 = vshll.u32 %v234_v8, 16 }
  0x11   : > { %661 = vmatpush.bf16.msrb.mxu1 %v652_v4  ;;  %810 = vmatpush.bf16.msrb.mxu2 %v801_v6  ;;  %222 = vst.msk [vmem:[#allocation2 + $0x28] sm:$0xf] %vm210_vm1, %v2050_v2  ;;  %v235_v14 = vld [vmem:[%s2110_s26 + $0xc] sm:$0xf]  ;;  %v236_v20 = vld [vmem:[%s2110_s26 + $0x10] sm:$0xf] }
  0x12   : > { %224 = vst.msk [vmem:[#allocation2 + $0x30] sm:$0xf] %vm210_vm1, %v2050_v2  ;;  %v1935_v15 = vld [vmem:[%s2513_s1 + $0xc] sm:$0xf]  ;;  %v2126_v16 = vrot.slane %v249_v9, 7  ;;  %v2128_v17 = vrot.slane %v257_v11, 7 }
  0x13   : > { %v333_v13 = vld [vmem:[#allocation2 + $0x10] sm:$0xf]  ;;  %226 = vst.msk [vmem:[#allocation2 + $0x38] sm:$0xf] %vm210_vm1, %v2050_v2  ;;  %v265_v21 = vshrl.u32 %v235_v14, 16  ;;  %v268_v22 = vshll.u32 %v235_v14, 16 }
  0x14   : > { %v339_v18 = vld [vmem:[#allocation2 + $0x18] sm:$0xf]  ;;  %228 = vst.msk [vmem:[#allocation2 + $0x40] sm:$0xf] %vm210_vm1, %v2050_v2  ;;  %v254_v23 = vor.u32 %v252_v10, %v2126_v16  ;;  %v262_v24 = vor.u32 %v260_v12, %v2128_v17  ;;  %v232_v25 = vld [vmem:[%s2110_s26] sm:$0xf] }
  0x15   : > { %230 = vst.msk [vmem:[#allocation2 + $0x48] sm:$0xf] %vm210_vm1, %v2050_v2  ;;  %v2144_v26 = vrot.slane %v265_v21, 7  ;;  %v273_v27 = vshrl.u32 %v236_v20, 16  ;;  %v276_v28 = vshll.u32 %v236_v20, 16  ;;  %v241_v29 = vshrl.u32 %v232_v25, 16 }
  0x16   : > { %v334_v30 = vsel %vm2134_vm3, %v254_v23, %v333_v13  ;;  %v340_v31 = vsel %vm2134_vm3, %v262_v24, %v339_v18  ;;  %v244_v33 = vshll.u32 %v232_v25, 16  ;;  %v324_v34 = vld [vmem:[#allocation2 + $0x8] sm:$0xf]  ;;  %v899_v35 = vsel %vm437_vm0, %v1935_v15, 0  ;;  %v237_v40 = vld [vmem:[%s2110_s26 + $0x14] sm:$0xf] }
  0x17   : > { %v345_v32 = vld [vmem:[#allocation2 + $0x20] sm:$0xf]  ;;  %335 = vst [vmem:[#allocation2 + $0x10] sm:$0xf] %v334_v30  ;;  %v270_v36 = vor.u32 %v268_v22, %v2144_v26  ;;  %v2152_v37 = vrot.slane %v273_v27, 7  ;;  %v2154_v39 = vrot.slane %v241_v29, 7  ;;  %908 = vmatpush.bf16.msrb.mxu3 %v899_v35 }
  0x18   : > { %v351_v38 = vld [vmem:[#allocation2 + $0x28] sm:$0xf]  ;;  %341 = vst [vmem:[#allocation2 + $0x18] sm:$0xf] %v340_v31  ;;  %v238_v41 = vld [vmem:[%s2110_s26 + $0x18] sm:$0xf] }
  0x19   : > { %v278_v42 = vor.u32 %v276_v28, %v2152_v37  ;;  %v346_v43 = vsel %vm2134_vm3, %v270_v36, %v345_v32  ;;  %v246_v44 = vor.u32 %v244_v33, %v2154_v39  ;;  %vm328_vm4 = vsmask.f32 256  ;;  %213 = vst.msk [vmem:[#allocation2 + $0x4] sm:$0x1] %vm212_vm5, %v2050_v2  ;;  %v486_v51 = vld [vmem:[#allocation2] sm:$0xf] }
  0x1a   : > { %347 = vst [vmem:[#allocation2 + $0x20] sm:$0xf] %v346_v43  ;;  %v281_v45 = vshrl.u32 %v237_v40, 16  ;;  %v284_v46 = vshll.u32 %v237_v40, 16  ;;  %v289_v47 = vshrl.u32 %v238_v41, 16  ;;  %v292_v50 = vshll.u32 %v238_v41, 16  ;;  %vm2189_vm9 = vmand %vm212_vm5, %vm328_vm4 }
  0x1b   : > { %v352_v48 = vsel %vm2134_vm3, %v278_v42, %v351_v38  ;;  %v325_v49 = vsel %vm2134_vm3, %v246_v44, %v324_v34  ;;  %v357_v54 = vld [vmem:[#allocation2 + $0x30] sm:$0xf]  ;;  %v363_v55 = vld [vmem:[#allocation2 + $0x38] sm:$0xf]  ;;  %v506_v56 = vshrl.u32 %v486_v51, 16  ;;  %v509_v57 = vshll.u32 %v486_v51, 16 }
  0x1c   : > { %353 = vst [vmem:[#allocation2 + $0x28] sm:$0xf] %v352_v48  ;;  %v2168_v52 = vrot.slane %v281_v45, 7  ;;  %v2170_v53 = vrot.slane %v289_v47, 7  ;;  %v255_v58 = vrot.slane %v2126_v16, 4  ;;  %v247_v63 = vrot.slane %v2154_v39, 4 }
  0x1d   : > { %326 = vst [vmem:[#allocation2 + $0x8] sm:$0xf] %v325_v49  ;;  %vm731_vm7 = vcmask 1042432   ;;  %v1899_v1 = vld [vmem:[#allocation2] sm:$0xf]  ;;  %v508_v6 = vrot.slane %v506_v56, 4 }
  0x1e   : > { %v1903_v59 = vld [vmem:[#allocation2 + $0x10] sm:$0xf]  ;;  %v286_v60 = vor.u32 %v284_v46, %v2168_v52  ;;  %v294_v61 = vor.u32 %v292_v50, %v2170_v53  ;;  %215 = vst.msk [vmem:[#allocation2 + $0xc] sm:$0x1] %vm212_vm5, %v2050_v2  ;;  %vm502_vm8 = vsmask.f32 3328 }
  0x1f   : > { %v2018_v62 = vld [vmem:[#allocation2 + $0x14] sm:$0xf0]  ;;  %217 = vst.msk [vmem:[#allocation2 + $0x14] sm:$0x1] %vm212_vm5, %v2050_v2  ;;  %v511_v7 = vrot.slane %v509_v57, 5  ;;  %vm732_vm11 = vcmask 1046532  }
  0x20   : > { %v1904_v0 = vor.u32 %v2018_v62, %v1903_v59  ;;  %v358_v3 = vsel %vm2134_vm3, %v286_v60, %v357_v54  ;;  %v364_v4 = vsel %vm2134_vm3, %v294_v61, %v363_v55  ;;  %219 = vst.msk [vmem:[#allocation2 + $0x1c] sm:$0x1] %vm212_vm5, %v2050_v2  ;;  %v487_v8 = vld [vmem:[#allocation2 + $0x4] sm:$0x1]  ;;  %v699_v9 = vld [vmem:[#allocation2] sm:$0xe]  ;;  %vm2213_vm12 = vmor %vm731_vm7, %vm732_vm11 }
  0x21   : > { %v1907_v5 = vld [vmem:[#allocation2 + $0x20] sm:$0xf]  ;;  %359 = vst [vmem:[#allocation2 + $0x30] sm:$0xf] %v358_v3  ;;  %v700_v12 = vld [vmem:[#allocation2 + $0x4] sm:$0x1]  ;;  %v512_v24 = vor.u32 %v511_v7, %v508_v6 }
  0x22   : > { %1914 = vmatmul.msk.bf16.vlgmr.msra.gmra.mxu1 %vm424_vm6, %v1904_v0  ;;  %365 = vst [vmem:[#allocation2 + $0x38] sm:$0xf] %v364_v4  ;;  %vm503_vm10 = vsmask.f32 7440  ;;  %v515_v25 = vshll.u32 %v487_v8, 16  ;;  %v1922_v30 = vrot.slane %v699_v9, 9 }
  0x23   : > { %v2019_v10 = vld [vmem:[#allocation2 + $0x24] sm:$0xf0]  ;;  %221 = vst.msk [vmem:[#allocation2 + $0x24] sm:$0x1] %vm212_vm5, %v2050_v2  ;;  %v736_v31 = vrot.slane %v700_v12, 5  ;;  %v263_v34 = vrot.slane %v2128_v17, 4  ;;  %vm2226_vm13 = vmor %vm502_vm8, %vm503_vm10 }
  0x24   : > { %v1908_v13 = vor.u32 %v2019_v10, %v1907_v5  ;;  %v2017_v14 = vld [vmem:[#allocation2 + $0x4] sm:$0xf0]  ;;  %223 = vst.msk [vmem:[#allocation2 + $0x2c] sm:$0x1] %vm212_vm5, %v2050_v2  ;;  %v1969_v33 = vld [vmem:[%s2513_s1 + $0x14] sm:$0xf] }
  0x25   : > { %v488_v15 = vld [vmem:[#allocation2 + $0x8] sm:$0xf]  ;;  %v1900_v18 = vor.u32 %v2017_v14, %v1899_v1  ;;  %v330_v20 = vld [vmem:[#allocation2 + $0xc] sm:$0x1]  ;;  %225 = vst.msk [vmem:[#allocation2 + $0x34] sm:$0x1] %vm212_vm5, %v2050_v2 }
  0x26   : > { %v520_v21 = vshrl.u32 %v488_v15, 16  ;;  %v523_v22 = vshll.u32 %v488_v15, 16  ;;  %1915 = vmatmul.msk.bf16.vlgmr.msra.gmra.mxu2 %vm424_vm6, %v1908_v13  ;;  %v331_v23 = vsel %vm2189_vm9, %v247_v63, %v330_v20  ;;  %v701_v29 = vld [vmem:[#allocation2 + $0x8] sm:$0xe]  ;;  %227 = vst.msk [vmem:[#allocation2 + $0x3c] sm:$0x1] %vm212_vm5, %v2050_v2 }
  0x27   : > { %1913 = vmatmul.msk.bf16.vlgmr.msra.gmra.mxu0 %vm424_vm6, %v1900_v18  ;;  %332 = vst [vmem:[#allocation2 + $0xc] sm:$0x1] %v331_v23  ;;  %v1255_v39 = vsel %vm437_vm0, %v1969_v33, 0  ;;  %v513_v41 = vrot.slane %v512_v24, 4  ;;  %v517_v42 = vrot.slane %v515_v25, 5  ;;  %v271_v43 = vrot.slane %v2144_v26, 4 }
  0x28   : > { %v522_v27 = vrot.slane %v520_v21, 4  ;;  %v525_v28 = vrot.slane %v523_v22, 5  ;;  %v1911_v32 = vld [vmem:[#allocation2 + $0x30] sm:$0xf]  ;;  %229 = vst.msk [vmem:[#allocation2 + $0x44] sm:$0x1] %vm212_vm5, %v2050_v2  ;;  %1264 = vmatpush.bf16.msra.mxu1 %v1255_v39 }
  0x29   : > { %v2020_v35 = vld [vmem:[#allocation2 + $0x34] sm:$0xf0]  ;;  %231 = vst.msk [vmem:[#allocation2 + $0x4c] sm:$0x1] %vm212_vm5, %v2050_v2  ;;  %v1956_v46 = vld [vmem:[%s2513_s1 + $0x10] sm:$0xf]  ;;  %v737_v2 = vsel %vm2213_vm12, %v1922_v30, %v736_v31  ;;  %v518_v60 = vsel %vm2226_vm13, %v513_v41, %v517_v42 }
  0x2a   : > { %v526_v36 = vor.u32 %v525_v28, %v522_v27  ;;  %v1912_v40 = vor.u32 %v2020_v35, %v1911_v32  ;;  %v1974_v17 = vld [vmem:[%s2513_s1 + $0x18] sm:$0xf]  ;;  %v1923_v47 = vrot.slane %v701_v29, 9  ;;  %v1109_v48 = vsel %vm437_vm0, %v1956_v46, 0  ;;  %v1995_v49 = vld [vmem:[%s2513_s1 + $0x1c] sm:$0xf] }
  0x2b   : > { %v1354_v45 = vsel %vm437_vm0, %v1974_v17, 0  ;;  %v336_v50 = vld [vmem:[#allocation2 + $0x14] sm:$0x1]  ;;  %1118 = vmatpush.bf16.msrb.mxu0 %v1109_v48  ;;  %v1564_v54 = vsel %vm437_vm0, %v1995_v49, 0  ;;  %v342_v56 = vld [vmem:[#allocation2 + $0x1c] sm:$0x1]  ;;  %v776_v1 = vunpack.c.l.b16 %v737_v2  ;;  %v627_v9 = vunpack.c.l.b16 %v518_v60 }
  0x2c   : > { %1916 = vmatmul.msk.bf16.vlgmr.msra.gmra.mxu3 %vm424_vm6, %v1912_v40  ;;  %1363 = vmatpush.bf16.msra.mxu2 %v1354_v45  ;;  %v527_v51 = vrot.slane %v526_v36, 4  ;;  %v337_v55 = vsel %vm2189_vm9, %v255_v58, %v336_v50  ;;  %v490_v57 = vld [vmem:[#allocation2 + $0x10] sm:$0xf]  ;;  %v343_v62 = vsel %vm2189_vm9, %v263_v34, %v342_v56  ;;  %v492_v16 = vld [vmem:[#allocation2 + $0x18] sm:$0xf]  ;;  %v279_v7 = vrot.slane %v2152_v37, 4 }
  0x2d   : > { %1573 = vmatpush.bf16.msra.mxu3 %v1564_v54  ;;  %338 = vst [vmem:[#allocation2 + $0x14] sm:$0x1] %v337_v55  ;;  %v534_v3 = vshrl.u32 %v490_v57, 16  ;;  %v537_v4 = vshll.u32 %v490_v57, 16  ;;  %v548_v58 = vshrl.u32 %v492_v16, 16  ;;  %v551_v5 = vshll.u32 %v492_v16, 16 }
  0x2e   : > { %v489_v59 = vld [vmem:[#allocation2 + $0xc] sm:$0x1]  ;;  %344 = vst [vmem:[#allocation2 + $0x1c] sm:$0x1] %v343_v62  ;;  %v703_v6 = vld [vmem:[#allocation2 + $0x10] sm:$0xe] }
  0x2f   : > { %v702_v61 = vld [vmem:[#allocation2 + $0xc] sm:$0x1]  ;;  %v529_v63 = vshll.u32 %v489_v59, 16  ;;  %v1938_v12 = vld [vmem:[#allocation2 + $0x8] sm:$0xf]  ;;  %v536_v18 = vrot.slane %v534_v3, 4 }
  0x30   : > { %v740_v0 = vrot.slane %v702_v61, 5  ;;  %v705_v13 = vld [vmem:[#allocation2 + $0x18] sm:$0xe]  ;;  %v2021_v15 = vld [vmem:[#allocation2 + $0xc] sm:$0xf0]  ;;  %v539_v20 = vrot.slane %v537_v4, 5 }
  0x31   : > { %v531_v8 = vrot.slane %v529_v63, 5  ;;  %v550_v21 = vrot.slane %v548_v58, 4  ;;  %v553_v23 = vrot.slane %v551_v5, 5  ;;  %v1924_v24 = vrot.slane %v703_v6, 9  ;;  %v946_v27 = vld [vmem:[#allocation2 + $0x8] sm:$0xf] }
  0x32   : > { %v741_v10 = vsel %vm2213_vm12, %v1923_v47, %v740_v0  ;;  %v1925_v25 = vrot.slane %v705_v13, 9  ;;  %v540_v30 = vor.u32 %v539_v20, %v536_v18  ;;  %v947_v31 = vld [vmem:[#allocation2 + $0xc] sm:$0x1]  ;;  %v963_v32 = vshrl.u32 %v946_v27, 16  ;;  %v948_v36 = vld [vmem:[#allocation2 + $0x10] sm:$0xf] }
  0x33   : > { %v777_v14 = vunpack.c.l.b16 %v741_v10  ;;  %v532_v22 = vsel %vm2226_vm13, %v527_v51, %v531_v8  ;;  %v554_v34 = vor.u32 %v553_v23, %v550_v21  ;;  %v1939_v40 = vor.u32 %v2021_v15, %v1938_v12  ;;  %v2008_v61 = vld [vmem:[%s2513_s1 + $0x20] sm:$0xf]  ;;  %v354_v16 = vld [vmem:[#allocation2 + $0x2c] sm:$0x1]  ;;  %v496_v13 = vld [vmem:[#allocation2 + $0x28] sm:$0xf] }
  0x34   : > { %v628_v28 = vunpack.c.l.b16 %v532_v22  ;;  %v491_v33 = vld [vmem:[#allocation2 + $0x14] sm:$0x1]  ;;  %v541_v42 = vrot.slane %v540_v30, 4  ;;  %v965_v50 = vrot.slane %v963_v32, 4  ;;  %v966_v51 = vshll.u32 %v946_v27, 16  ;;  %s2016_s17 = sshll.u32 %s2526_s16, 6 }
  0x35   : > { %v784_v29 = vpack.c.b16 %v777_v14, %v776_v1  ;;  %v704_v35 = vld [vmem:[#allocation2 + $0x14] sm:$0x1]  ;;  %v493_v41 = vld [vmem:[#allocation2 + $0x1c] sm:$0x1]  ;;  %v543_v17 = vshll.u32 %v491_v33, 16  ;;  %v555_v46 = vrot.slane %v554_v34, 4  ;;  %v355_v20 = vsel %vm2189_vm9, %v279_v7, %v354_v16  ;;  %s2468_s20 = scalar_lea.vmem %s2515_s3, %s2016_s17 }
  0x36   : > { %v635_v39 = vpack.c.b16 %v628_v28, %v627_v9  ;;  %v706_v45 = vld [vmem:[#allocation2 + $0x1c] sm:$0x1]  ;;  %v557_v2 = vshll.u32 %v493_v41, 16  ;;  %v744_v47 = vrot.slane %v704_v35, 5  ;;  %v972_v54 = vshll.u32 %v947_v31, 16  ;;  %s1896_s21 = sshll.u32 %s2526_s16, 1 }
  0x37   : > { %1931 = vmatmul.msk.bf16.vlgmr.msrb.gmra.mxu2 %vm424_vm6, %v784_v29  ;;  %v748_v48 = vrot.slane %v706_v45, 5  ;;  %v545_v49 = vrot.slane %v543_v17, 5  ;;  %v949_v59 = vld [vmem:[#allocation2 + $0x14] sm:$0x1]  ;;  %v977_v60 = vshrl.u32 %v948_v36, 16  ;;  %v287_v62 = vrot.slane %v2168_v52, 4  ;;  %s208_s24 = scalar_lea.vmem %s2516_s4, %s1896_s21 }
  0x38   : > { %1918 = vmatmul.msk.bf16.vlgmr.msrb.gmra.mxu1 %vm424_vm6, %v635_v39  ;;  %v559_v55 = vrot.slane %v557_v2, 5  ;;  %v745_v56 = vsel %vm2213_vm12, %v1924_v24, %v744_v47  ;;  %v968_v0 = vrot.slane %v966_v51, 5  ;;  %v348_v1 = vld [vmem:[#allocation2 + $0x24] sm:$0x1]  ;;  %v494_v6 = vld [vmem:[#allocation2 + $0x20] sm:$0xf] }
  0x39   : > { %v749_v57 = vsel %vm2213_vm12, %v1925_v25, %v748_v48  ;;  %v546_v63 = vsel %vm2226_vm13, %v541_v42, %v545_v49  ;;  %v778_v58 = vunpack.c.l.b16 %v745_v56  ;;  %v974_v9 = vrot.slane %v972_v54, 5  ;;  %v2281_v21 = vld [vmem:[#allocation2 + $0x20] sm:$0xe]  ;;  %v950_v22 = vld [vmem:[#allocation2 + $0x18] sm:$0xf] }
  0x3a   : > { %v560_v3 = vsel %vm2226_vm13, %v555_v46, %v559_v55  ;;  %v2269_v4 = vunpack.c.l.b16 %v546_v63  ;;  %v779_v5 = vunpack.c.l.b16 %v749_v57  ;;  %v969_v8 = vor.u32 %v968_v0, %v965_v50  ;;  %356 = vst [vmem:[#allocation2 + $0x2c] sm:$0x1] %v355_v20  ;;  %v709_v32 = vld [vmem:[#allocation2 + $0x28] sm:$0xe]  ;;  %v951_v33 = vld [vmem:[#allocation2 + $0x1c] sm:$0x1] }
  0x3b   : > { %v979_v10 = vrot.slane %v977_v60, 4  ;;  %v980_v12 = vshll.u32 %v948_v36, 16  ;;  %v986_v14 = vshll.u32 %v949_v59, 16  ;;  %v1710_v15 = vsel %vm437_vm0, %v2008_v61, 0  ;;  %v1942_v35 = vld [vmem:[#allocation2 + $0x18] sm:$0xf] }
  0x3c   : > { %1952 = vmatmul.msk.bf16.vlgmr.msrb.gmra.mxu3 %vm424_vm6, %v1939_v40  ;;  %v349_v18 = vsel %vm2189_vm9, %v271_v43, %v348_v1  ;;  %v630_v23 = vunpack.c.l.b16 %v560_v3  ;;  %v970_v24 = vrot.slane %v969_v8, 4  ;;  %1719 = vmatpush.bf16.msra.mxu0 %v1710_v15  ;;  %v562_v27 = vshrl.u32 %v494_v6, 16  ;;  %v952_v41 = vld [vmem:[#allocation2 + $0x20] sm:$0xf]  ;;  %v360_v46 = vld [vmem:[#allocation2 + $0x34] sm:$0x1] }
  0x3d   : > { %v982_v25 = vrot.slane %v980_v12, 5  ;;  %350 = vst [vmem:[#allocation2 + $0x24] sm:$0x1] %v349_v18  ;;  %v295_v28 = vrot.slane %v2170_v53, 4  ;;  %v565_v26 = vshll.u32 %v494_v6, 16  ;;  %v576_v29 = vshrl.u32 %v496_v13, 16 }
  0x3e   : > { %v579_v43 = vshll.u32 %v496_v13, 16  ;;  %v975_v37 = vsel %vm2226_vm13, %v970_v24, %v974_v9  ;;  %v988_v7 = vrot.slane %v986_v14, 5  ;;  %v564_v31 = vrot.slane %v562_v27, 4  ;;  %v2022_v2 = vld [vmem:[#allocation2 + $0x1c] sm:$0xf0] }
  0x3f   : > { %v983_v30 = vor.u32 %v982_v25, %v979_v10  ;;  %v785_v34 = vpack.c.b16 %v779_v5, %v778_v58  ;;  %v567_v36 = vrot.slane %v565_v26, 5  ;;  %v578_v39 = vrot.slane %v576_v29, 4  ;;  %v366_v51 = vld [vmem:[#allocation2 + $0x3c] sm:$0x1]  ;;  %v498_v8 = vld [vmem:[#allocation2 + $0x30] sm:$0xf] }
  0x40   : > { %v581_v40 = vrot.slane %v579_v43, 5  ;;  %v636_v53 = vpack.c.b16 %v630_v23, %v2269_v4  ;;  %v1926_v17 = vrot.slane %v2281_v21, 9  ;;  %v991_v45 = vshrl.u32 %v950_v22, 16 }
  0x41   : > { %v984_v42 = vrot.slane %v983_v30, 4  ;;  %v1084_v47 = vunpack.c.l.b16 %v975_v37  ;;  %v568_v48 = vor.u32 %v567_v36, %v564_v31  ;;  %v1927_v49 = vrot.slane %v709_v32, 9  ;;  %v497_v3 = vld [vmem:[#allocation2 + $0x2c] sm:$0x1] }
  0x42   : > { %v994_v50 = vshll.u32 %v950_v22, 16  ;;  %v582_v55 = vor.u32 %v581_v40, %v578_v39  ;;  %v1000_v56 = vshll.u32 %v951_v33, 16  ;;  %v1005_v57 = vshrl.u32 %v952_v41, 16  ;;  %v710_v58 = vld [vmem:[#allocation2 + $0x2c] sm:$0x1] }
  0x43   : > { %v989_v54 = vsel %vm2226_vm13, %v984_v42, %v988_v7  ;;  %v993_v63 = vrot.slane %v991_v45, 4  ;;  %v1008_v0 = vshll.u32 %v952_v41, 16  ;;  %v361_v1 = vsel %vm2189_vm9, %v287_v62, %v360_v46  ;;  %v2310_v42 = vld [vmem:[#allocation2 + $0x28] sm:$0xf]  ;;  %v2023_v46 = vld [vmem:[#allocation2 + $0x2c] sm:$0xf0] }
  0x44   : > { %v1085_v59 = vunpack.c.l.b16 %v989_v54  ;;  %v495_v60 = vld [vmem:[#allocation2 + $0x24] sm:$0x1]  ;;  %v1943_v16 = vor.u32 %v2022_v2, %v1942_v35  ;;  %v367_v6 = vsel %vm2189_vm9, %v295_v28, %v366_v51  ;;  %v585_v10 = vshll.u32 %v497_v3, 16  ;;  %362 = vst [vmem:[#allocation2 + $0x34] sm:$0x1] %v361_v1 }
  0x45   : > { %v708_v61 = vld [vmem:[#allocation2 + $0x24] sm:$0x1]  ;;  %v571_v4 = vshll.u32 %v495_v60, 16  ;;  %v756_v12 = vrot.slane %v710_v58, 5  ;;  %v996_v14 = vrot.slane %v994_v50, 5  ;;  %v569_v52 = vrot.slane %v568_v48, 4 }
  0x46   : > { %v752_v5 = vrot.slane %v708_v61, 5  ;;  %v1092_v9 = vpack.c.b16 %v1085_v59, %v1084_v47  ;;  %v953_v13 = vld [vmem:[#allocation2 + $0x24] sm:$0x1]  ;;  %v583_v15 = vrot.slane %v582_v55, 4  ;;  %v1007_v18 = vrot.slane %v1005_v57, 4 }
  0x47   : > { %1932 = vmatmul.msk.bf16.gmra.mxu2 %vm424_vm6, %v785_v34  ;;  %v573_v62 = vrot.slane %v571_v4, 5  ;;  %v587_v20 = vrot.slane %v585_v10, 5  ;;  %v997_v22 = vor.u32 %v996_v14, %v993_v63  ;;  %368 = vst [vmem:[#allocation2 + $0x3c] sm:$0x1] %v367_v6  ;;  %v757_v23 = vsel %vm2213_vm12, %v1927_v49, %v756_v12  ;;  %v500_v28 = vld [vmem:[#allocation2 + $0x38] sm:$0xf] }
  0x48   : > { %1919 = vmatmul.msk.bf16.gmra.mxu1 %vm424_vm6, %v636_v53  ;;  %1957 = vmatmul.msk.bf16.vlgmr.msrb.gmra.mxu0 %vm424_vm6, %v1092_v9  ;;  %v753_v21 = vsel %vm2213_vm12, %v1926_v17, %v752_v5  ;;  %v1002_v24 = vrot.slane %v1000_v56, 5  ;;  %v1010_v25 = vrot.slane %v1008_v0, 5  ;;  %v1014_v27 = vshll.u32 %v953_v13, 16  ;;  %v711_v55 = vld [vmem:[#allocation2 + $0x30] sm:$0xe] }
  0x49   : > { %v998_v26 = vrot.slane %v997_v22, 4  ;;  %v590_v29 = vshrl.u32 %v498_v8, 16  ;;  %v574_v43 = vsel %vm2226_vm13, %v569_v52, %v573_v62  ;;  %v588_v37 = vsel %vm2226_vm13, %v583_v15, %v587_v20  ;;  %v239_v56 = vld [vmem:[%s2110_s26 + $0x1c] sm:$0xf]  ;;  %v954_v61 = vld [vmem:[#allocation2 + $0x28] sm:$0xf] }
  0x4a   : > { %v1011_v30 = vor.u32 %v1010_v25, %v1007_v18  ;;  %v1016_v7 = vrot.slane %v1014_v27, 5  ;;  %v780_v31 = vunpack.c.l.b16 %v753_v21  ;;  %v781_v32 = vunpack.c.l.b16 %v757_v23  ;;  %v956_v13 = vld [vmem:[#allocation2 + $0x30] sm:$0xf]  ;;  %v369_v20 = vld [vmem:[#allocation2 + $0x40] sm:$0xf] }
  0x4b   : > { %v593_v33 = vshll.u32 %v498_v8, 16  ;;  %v604_v34 = vshrl.u32 %v500_v28, 16  ;;  %v1003_v35 = vsel %vm2226_vm13, %v998_v26, %v1002_v24  ;;  %v592_v39 = vrot.slane %v590_v29, 4  ;;  %v499_v17 = vld [vmem:[#allocation2 + $0x34] sm:$0x1] }
  0x4c   : > { %1953 = vmatmul.msk.bf16.gmra.mxu3 %vm424_vm6, %v1943_v16  ;;  %v1012_v36 = vrot.slane %v1011_v30, 4  ;;  %v607_v40 = vshll.u32 %v500_v28, 16  ;;  %v631_v41 = vunpack.c.l.b16 %v574_v43  ;;  %v632_v53 = vunpack.c.l.b16 %v588_v37  ;;  %v712_v60 = vld [vmem:[#allocation2 + $0x34] sm:$0x1]  ;;  %v713_v16 = vld [vmem:[#allocation2 + $0x38] sm:$0xe] }
  0x4d   : > { %v595_v45 = vrot.slane %v593_v33, 5  ;;  %v606_v48 = vrot.slane %v604_v34, 4  ;;  %v1086_v50 = vunpack.c.l.b16 %v1003_v35  ;;  %v599_v54 = vshll.u32 %v499_v17, 16  ;;  %v955_v8 = vld [vmem:[#allocation2 + $0x2c] sm:$0x1] }
  0x4e   : > { %v1017_v2 = vsel %vm2226_vm13, %v1012_v36, %v1016_v7  ;;  %v501_v47 = vld [vmem:[#allocation2 + $0x3c] sm:$0x1]  ;;  %v609_v49 = vrot.slane %v607_v40, 5  ;;  %v786_v57 = vpack.c.b16 %v781_v32, %v780_v31  ;;  %v637_v63 = vpack.c.b16 %v632_v53, %v631_v41  ;;  %v957_v22 = vld [vmem:[#allocation2 + $0x34] sm:$0x1] }
  0x4f   : > { %v1087_v51 = vunpack.c.l.b16 %v1017_v2  ;;  %v596_v59 = vor.u32 %v595_v45, %v592_v39  ;;  %v1947_v0 = vor.u32 %v2023_v46, %v2310_v42  ;;  %v613_v1 = vshll.u32 %v501_v47, 16  ;;  %v714_v3 = vld [vmem:[#allocation2 + $0x3c] sm:$0x1]  ;;  %v372_v7 = vld [vmem:[#allocation2 + $0x44] sm:$0x1] }
  0x50   : > { %v610_v4 = vor.u32 %v609_v49, %v606_v48  ;;  %v1928_v58 = vrot.slane %v711_v55, 9  ;;  %v297_v5 = vshrl.u32 %v239_v56, 16  ;;  %v300_v6 = vshll.u32 %v239_v56, 16  ;;  %v958_v40 = vld [vmem:[#allocation2 + $0x38] sm:$0xf] }
  0x51   : > { %v1093_v9 = vpack.c.b16 %v1087_v51, %v1086_v50  ;;  %v601_v10 = vrot.slane %v599_v54, 5  ;;  %v760_v12 = vrot.slane %v712_v60, 5  ;;  %v1019_v14 = vshrl.u32 %v954_v61, 16  ;;  %v1401_v47 = vld [vmem:[#allocation2 + $0x10] sm:$0xf] }
  0x52   : > { %v597_v52 = vrot.slane %v596_v59, 4  ;;  %v1929_v62 = vrot.slane %v713_v16, 9  ;;  %v764_v15 = vrot.slane %v714_v3, 5  ;;  %v299_v18 = vrot.slane %v297_v5, 7  ;;  %v1403_v54 = vld [vmem:[#allocation2 + $0x18] sm:$0xf] }
  0x53   : > { %v615_v21 = vrot.slane %v613_v1, 5  ;;  %v1021_v23 = vrot.slane %v1019_v14, 4  ;;  %v1022_v24 = vshll.u32 %v954_v61, 16  ;;  %v1028_v25 = vshll.u32 %v955_v8, 16  ;;  %v959_v61 = vld [vmem:[#allocation2 + $0x3c] sm:$0x1] }
  0x54   : > { %v611_v27 = vrot.slane %v610_v4, 4  ;;  %v302_v28 = vor.u32 %v300_v6, %v299_v18  ;;  %v303_v26 = vrot.slane %v299_v18, 4  ;;  %v1033_v29 = vshrl.u32 %v956_v13, 16  ;;  %v1156_v1 = vld [vmem:[#allocation2 + $0x8] sm:$0xe] }
  0x55   : > { %v761_v43 = vsel %vm2213_vm12, %v1928_v58, %v760_v12  ;;  %v1024_v37 = vrot.slane %v1022_v24, 5  ;;  %v1036_v30 = vshll.u32 %v956_v13, 16  ;;  %v765_v31 = vsel %vm2213_vm12, %v1929_v62, %v764_v15  ;;  %v1157_v16 = vld [vmem:[#allocation2 + $0xc] sm:$0x1]  ;;  %v1950_v6 = vld [vmem:[#allocation2 + $0x38] sm:$0xf] }
  0x56   : > { %v370_v32 = vsel %vm2134_vm3, %v302_v28, %v369_v20  ;;  %v1035_v33 = vrot.slane %v1033_v29, 4  ;;  %v1042_v34 = vshll.u32 %v957_v22, 16  ;;  %v1030_v36 = vrot.slane %v1028_v25, 5  ;;  %v1158_v8 = vld [vmem:[#allocation2 + $0x10] sm:$0xe] }
  0x57   : > { %1933 = vmatmul.msk.bf16.gmra.mxu2 %vm424_vm6, %v786_v57  ;;  %371 = vst [vmem:[#allocation2 + $0x40] sm:$0xf] %v370_v32  ;;  %v1025_v35 = vor.u32 %v1024_v37, %v1021_v23  ;;  %v1038_v39 = vrot.slane %v1036_v30, 5  ;;  %v602_v41 = vsel %vm2226_vm13, %v597_v52, %v601_v10  ;;  %v616_v53 = vsel %vm2226_vm13, %v611_v27, %v615_v21  ;;  %v1402_v62 = vld [vmem:[#allocation2 + $0x14] sm:$0x1] }
  0x58   : > { %1920 = vmatmul.msk.bf16.gmra.mxu1 %vm424_vm6, %v637_v63  ;;  %1958 = vmatmul.msk.bf16.gmra.mxu0 %vm424_vm6, %v1093_v9  ;;  %v782_v42 = vunpack.c.l.b16 %v761_v43  ;;  %v373_v19 = vsel %vm2189_vm9, %v303_v26, %v372_v7  ;;  %v783_v17 = vunpack.c.l.b16 %v765_v31  ;;  %v1044_v2 = vrot.slane %v1042_v34, 5  ;;  %v1159_v9 = vld [vmem:[#allocation2 + $0x14] sm:$0x1]  ;;  %v1404_v27 = vld [vmem:[#allocation2 + $0x1c] sm:$0x1] }
  0x59   : > { %v1026_v45 = vrot.slane %v1025_v35, 4  ;;  %v1039_v46 = vor.u32 %v1038_v39, %v1035_v33  ;;  %374 = vst [vmem:[#allocation2 + $0x44] sm:$0x1] %v373_v19  ;;  %v1047_v48 = vshrl.u32 %v958_v40, 16  ;;  %v1050_v49 = vshll.u32 %v958_v40, 16 }
  0x5a   : > { %v633_v55 = vunpack.c.l.b16 %v602_v41  ;;  %v634_v56 = vunpack.c.l.b16 %v616_v53  ;;  %v1418_v57 = vshrl.u32 %v1401_v47, 16  ;;  %v787_v59 = vpack.c.b16 %v783_v17, %v782_v42  ;;  %v1405_v17 = vld [vmem:[#allocation2 + $0x20] sm:$0xf] }
  0x5b   : > { %v1031_v50 = vsel %vm2226_vm13, %v1026_v45, %v1030_v36  ;;  %v1040_v51 = vrot.slane %v1039_v46, 4  ;;  %v1421_v63 = vshll.u32 %v1401_v47, 16  ;;  %v1049_v4 = vrot.slane %v1047_v48, 4  ;;  %v1407_v45 = vld [vmem:[#allocation2 + $0x28] sm:$0xf] }
  0x5c   : > { %1954 = vmatmul.msk.bf16.gmra.mxu3 %vm424_vm6, %v1947_v0  ;;  %v1088_v60 = vunpack.c.l.b16 %v1031_v50  ;;  %v1052_v58 = vrot.slane %v1050_v49, 5  ;;  %v1432_v5 = vshrl.u32 %v1403_v54, 16  ;;  %v638_v13 = vpack.c.b16 %v634_v56, %v633_v55  ;;  %v1977_v49 = vld [vmem:[#allocation2 + $0x10] sm:$0xf] }
  0x5d   : > { %v1045_v11 = vsel %vm2226_vm13, %v1040_v51, %v1044_v2  ;;  %v1056_v52 = vshll.u32 %v959_v61, 16  ;;  %v1420_v15 = vrot.slane %v1418_v57, 4  ;;  %v1423_v23 = vrot.slane %v1421_v63, 5 }
  0x5e   : > { %v1089_v0 = vunpack.c.l.b16 %v1045_v11  ;;  %v960_v3 = vld [vmem:[#allocation2 + $0x40] sm:$0xf]  ;;  %v1053_v24 = vor.u32 %v1052_v58, %v1049_v4  ;;  %v1434_v28 = vrot.slane %v1432_v5, 4  ;;  %v1435_v26 = vshll.u32 %v1403_v54, 16  ;;  %v2025_v54 = vld [vmem:[#allocation2 + $0x14] sm:$0xf0] }
  0x5f   : > { %v1061_v10 = vshrl.u32 %v960_v3, 16  ;;  %v1064_v12 = vshll.u32 %v960_v3, 16  ;;  %v2024_v18 = vld [vmem:[#allocation2 + $0x3c] sm:$0xf0]  ;;  %v1961_v29 = vrot.slane %v1156_v1, 9  ;;  %v1190_v43 = vrot.slane %v1157_v16, 5 }
  0x60   : > { %v961_v14 = vld [vmem:[#allocation2 + $0x44] sm:$0x1]  ;;  %v1094_v20 = vpack.c.b16 %v1089_v0, %v1088_v60  ;;  %v1951_v30 = vor.u32 %v2024_v18, %v1950_v6  ;;  %v1962_v7 = vrot.slane %v1158_v8, 9  ;;  %v1194_v31 = vrot.slane %v1159_v9, 5  ;;  %v1160_v3 = vld [vmem:[#allocation2 + $0x18] sm:$0xe] }
  0x61   : > { %v1063_v21 = vrot.slane %v1061_v10, 4  ;;  %v1066_v22 = vrot.slane %v1064_v12, 5  ;;  %v1070_v25 = vshll.u32 %v961_v14, 16  ;;  %v1437_v32 = vrot.slane %v1435_v26, 5  ;;  %v1406_v12 = vld [vmem:[#allocation2 + $0x24] sm:$0x1] }
  0x62   : > { %v1058_v33 = vrot.slane %v1056_v52, 5  ;;  %v1424_v34 = vor.u32 %v1423_v23, %v1420_v15  ;;  %v1427_v35 = vshll.u32 %v1402_v62, 16  ;;  %v1441_v36 = vshll.u32 %v1404_v27, 16  ;;  %v1161_v52 = vld [vmem:[#allocation2 + $0x1c] sm:$0x1] }
  0x63   : > { %v1067_v37 = vor.u32 %v1066_v22, %v1063_v21  ;;  %v1054_v39 = vrot.slane %v1053_v24, 4  ;;  %v1072_v41 = vrot.slane %v1070_v25, 5  ;;  %v1438_v53 = vor.u32 %v1437_v32, %v1434_v28  ;;  %v1162_v62 = vld [vmem:[#allocation2 + $0x20] sm:$0xe]  ;;  %v1163_v15 = vld [vmem:[#allocation2 + $0x24] sm:$0x1] }
  0x64   : > { %v1191_v42 = vsel %vm2213_vm12, %v1961_v29, %v1190_v43  ;;  %v1195_v19 = vsel %vm2213_vm12, %v1962_v7, %v1194_v31  ;;  %v1425_v46 = vrot.slane %v1424_v34, 4  ;;  %v1429_v2 = vrot.slane %v1427_v35, 5  ;;  %v1612_v21 = vld [vmem:[#allocation2 + $0x14] sm:$0x1]  ;;  %v1613_v27 = vld [vmem:[#allocation2 + $0x18] sm:$0xe] }
  0x65   : > { %v1068_v40 = vrot.slane %v1067_v37, 4  ;;  %v1439_v47 = vrot.slane %v1438_v53, 4  ;;  %v1443_v48 = vrot.slane %v1441_v36, 5  ;;  %v1059_v50 = vsel %vm2226_vm13, %v1054_v39, %v1058_v33  ;;  %v1614_v28 = vld [vmem:[#allocation2 + $0x1c] sm:$0x1] }
  0x66   : > { %v1446_v55 = vshrl.u32 %v1405_v17, 16  ;;  %v1449_v56 = vshll.u32 %v1405_v17, 16  ;;  %v1460_v57 = vshrl.u32 %v1407_v45, 16  ;;  %v1230_v11 = vunpack.c.l.b16 %v1191_v42  ;;  %v1411_v53 = vld [vmem:[#allocation2 + $0x38] sm:$0xf] }
  0x67   : > { %1934 = vmatmul.msk.bf16.gmra.mxu2 %vm424_vm6, %v787_v59  ;;  %v1073_v51 = vsel %vm2226_vm13, %v1068_v40, %v1072_v41  ;;  %v1463_v59 = vshll.u32 %v1407_v45, 16  ;;  %v1231_v60 = vunpack.c.l.b16 %v1195_v19  ;;  %v1090_v61 = vunpack.c.l.b16 %v1059_v50  ;;  %v1409_v41 = vld [vmem:[#allocation2 + $0x30] sm:$0xf] }
  0x68   : > { %1921 = vmatmul.msk.bf16.gmra.mxu1 %vm424_vm6, %v638_v13  ;;  %1959 = vmatmul.msk.bf16.gmra.mxu0 %vm424_vm6, %v1094_v20  ;;  %v1091_v63 = vunpack.c.l.b16 %v1073_v51  ;;  %v1430_v0 = vsel %vm2226_vm13, %v1425_v46, %v1429_v2  ;;  %v1444_v1 = vsel %vm2226_vm13, %v1439_v47, %v1443_v48  ;;  %v1978_v16 = vor.u32 %v2025_v54, %v1977_v49  ;;  %v1408_v13 = vld [vmem:[#allocation2 + $0x2c] sm:$0x1]  ;;  %v1611_v20 = vld [vmem:[#allocation2 + $0x10] sm:$0xe]  ;;  %v1981_v46 = vld [vmem:[#allocation2 + $0x20] sm:$0xf] }
  0x69   : > { %v1448_v4 = vrot.slane %v1446_v55, 4  ;;  %v1451_v58 = vrot.slane %v1449_v56, 5  ;;  %v1462_v5 = vrot.slane %v1460_v57, 4  ;;  %v1465_v6 = vrot.slane %v1463_v59, 5  ;;  %v2026_v2 = vld [vmem:[#allocation2 + $0x24] sm:$0xf0] }
  0x6a   : > { %v1238_v8 = vpack.c.b16 %v1231_v60, %v1230_v11  ;;  %v1539_v9 = vunpack.c.l.b16 %v1430_v0  ;;  %v1540_v10 = vunpack.c.l.b16 %v1444_v1  ;;  %v1095_v14 = vpack.c.b16 %v1091_v63, %v1090_v61  ;;  %v1164_v59 = vld [vmem:[#allocation2 + $0x28] sm:$0xe]  ;;  %v1165_v63 = vld [vmem:[#allocation2 + $0x2c] sm:$0x1]  ;;  %v1166_v0 = vld [vmem:[#allocation2 + $0x30] sm:$0xe] }
  0x6b   : > { %v1963_v18 = vrot.slane %v1160_v3, 9  ;;  %v1452_v22 = vor.u32 %v1451_v58, %v1448_v4  ;;  %v1455_v23 = vshll.u32 %v1406_v12, 16  ;;  %v1466_v24 = vor.u32 %v1465_v6, %v1462_v5  ;;  %v1167_v1 = vld [vmem:[#allocation2 + $0x34] sm:$0x1]  ;;  %v1615_v5 = vld [vmem:[#allocation2 + $0x20] sm:$0xe] }
  0x6c   : > { %1955 = vmatmul.msk.bf16.gmra.mxu3 %vm424_vm6, %v1951_v30  ;;  %v1469_v25 = vshll.u32 %v1408_v13, 16  ;;  %v1547_v26 = vpack.c.b16 %v1540_v10, %v1539_v9  ;;  %v1198_v29 = vrot.slane %v1161_v52, 5  ;;  %v1964_v43 = vrot.slane %v1162_v62, 9  ;;  %v1412_v9 = vld [vmem:[#allocation2 + $0x3c] sm:$0x1] }
  0x6d   : > { %v1202_v37 = vrot.slane %v1163_v15, 5  ;;  %v2000_v30 = vrot.slane %v1611_v20, 9  ;;  %v1645_v7 = vrot.slane %v1612_v21, 5  ;;  %v2001_v31 = vrot.slane %v1613_v27, 9  ;;  %v1616_v10 = vld [vmem:[#allocation2 + $0x24] sm:$0x1] }
  0x6e   : > { %v1649_v32 = vrot.slane %v1614_v28, 5  ;;  %v1453_v33 = vrot.slane %v1452_v22, 4  ;;  %v1457_v34 = vrot.slane %v1455_v23, 5  ;;  %v1467_v35 = vrot.slane %v1466_v24, 4  ;;  %v1617_v13 = vld [vmem:[#allocation2 + $0x28] sm:$0xe] }
  0x6f   : > { %v1471_v36 = vrot.slane %v1469_v25, 5  ;;  %v1199_v39 = vsel %vm2213_vm12, %v1963_v18, %v1198_v29  ;;  %v1203_v40 = vsel %vm2213_vm12, %v1964_v43, %v1202_v37  ;;  %v1646_v42 = vsel %vm2213_vm12, %v2000_v30, %v1645_v7 }
  0x70   : > { %v1650_v19 = vsel %vm2213_vm12, %v2001_v31, %v1649_v32  ;;  %v1232_v17 = vunpack.c.l.b16 %v1199_v39  ;;  %v1233_v45 = vunpack.c.l.b16 %v1203_v40  ;;  %v1458_v47 = vsel %vm2226_vm13, %v1453_v33, %v1457_v34  ;;  %v1413_v33 = vld [vmem:[#allocation2 + $0x40] sm:$0xf]  ;;  %v1415_v34 = vld [vmem:[#allocation2 + $0x48] sm:$0xf]  ;;  %v1985_v39 = vld [vmem:[#allocation2 + $0x30] sm:$0xf] }
  0x71   : > { %v1472_v48 = vsel %vm2226_vm13, %v1467_v35, %v1471_v36  ;;  %v1474_v49 = vshrl.u32 %v1409_v41, 16  ;;  %v1477_v50 = vshll.u32 %v1409_v41, 16  ;;  %v1488_v51 = vshrl.u32 %v1411_v53, 16  ;;  %v2027_v40 = vld [vmem:[#allocation2 + $0x34] sm:$0xf0] }
  0x72   : > { %v1491_v54 = vshll.u32 %v1411_v53, 16  ;;  %v1685_v55 = vunpack.c.l.b16 %v1646_v42  ;;  %v1686_v56 = vunpack.c.l.b16 %v1650_v19  ;;  %v1982_v57 = vor.u32 %v2026_v2, %v1981_v46 }
  0x73   : > { %v1239_v11 = vpack.c.b16 %v1233_v45, %v1232_v17  ;;  %v1541_v60 = vunpack.c.l.b16 %v1458_v47  ;;  %v1542_v61 = vunpack.c.l.b16 %v1472_v48  ;;  %v1479_v3 = vrot.slane %v1477_v50, 5  ;;  %v1168_v17 = vld [vmem:[#allocation2 + $0x38] sm:$0xe] }
  0x74   : > { %v1490_v4 = vrot.slane %v1488_v51, 4  ;;  %v1493_v58 = vrot.slane %v1491_v54, 5  ;;  %v1693_v6 = vpack.c.b16 %v1686_v56, %v1685_v55  ;;  %v1965_v12 = vrot.slane %v1164_v59, 9  ;;  %v1169_v55 = vld [vmem:[#allocation2 + $0x3c] sm:$0x1] }
  0x75   : > { %v1548_v52 = vpack.c.b16 %v1542_v61, %v1541_v60  ;;  %v1206_v62 = vrot.slane %v1165_v63, 5  ;;  %v1966_v15 = vrot.slane %v1166_v0, 9  ;;  %v1210_v18 = vrot.slane %v1167_v1, 5  ;;  %v1170_v56 = vld [vmem:[#allocation2 + $0x40] sm:$0xe] }
  0x76   : > { %v1494_v22 = vor.u32 %v1493_v58, %v1490_v4  ;;  %v1497_v23 = vshll.u32 %v1412_v9, 16  ;;  %v2002_v24 = vrot.slane %v1615_v5, 9  ;;  %v1653_v25 = vrot.slane %v1616_v10, 5  ;;  %v1171_v59 = vld [vmem:[#allocation2 + $0x44] sm:$0x1] }
  0x77   : > { %1991 = vmatmul.msk.bf16.vlgmr.msra.gmra.mxu2 %vm424_vm6, %v1978_v16  ;;  %v1476_v16 = vrot.slane %v1474_v49, 4  ;;  %v2003_v27 = vrot.slane %v1617_v13, 9  ;;  %v1211_v29 = vsel %vm2213_vm12, %v1966_v15, %v1210_v18  ;;  %v1502_v45 = vshrl.u32 %v1413_v33, 16  ;;  %v1414_v0 = vld [vmem:[#allocation2 + $0x44] sm:$0x1] }
  0x78   : > { %1970 = vmatmul.msk.bf16.vlgmr.msra.gmra.mxu1 %vm424_vm6, %v1238_v8  ;;  %1960 = vmatmul.msk.bf16.gmra.mxu0 %vm424_vm6, %v1095_v14  ;;  %v1410_v8 = vld [vmem:[#allocation2 + $0x34] sm:$0x1]  ;;  %v1618_v14 = vld [vmem:[#allocation2 + $0x2c] sm:$0x1]  ;;  %v1495_v30 = vrot.slane %v1494_v22, 4  ;;  %v1499_v7 = vrot.slane %v1497_v23, 5  ;;  %v1654_v31 = vsel %vm2213_vm12, %v2002_v24, %v1653_v25  ;;  %v1235_v36 = vunpack.c.l.b16 %v1211_v29 }
  0x79   : > { %v1480_v20 = vor.u32 %v1479_v3, %v1476_v16  ;;  %v1483_v21 = vshll.u32 %v1410_v8, 16  ;;  %v1657_v28 = vrot.slane %v1618_v14, 5  ;;  %v1687_v42 = vunpack.c.l.b16 %v1654_v31  ;;  %v1416_v1 = vld [vmem:[#allocation2 + $0x4c] sm:$0x1]  ;;  %v1619_v16 = vld [vmem:[#allocation2 + $0x30] sm:$0xe] }
  0x7a   : > { %v1500_v53 = vsel %vm2226_vm13, %v1495_v30, %v1499_v7  ;;  %v1505_v46 = vshll.u32 %v1413_v33, 16  ;;  %v1516_v2 = vshrl.u32 %v1415_v34, 16  ;;  %v1519_v47 = vshll.u32 %v1415_v34, 16  ;;  %v1620_v3 = vld [vmem:[#allocation2 + $0x34] sm:$0x1] }
  0x7b   : > { %v1481_v43 = vrot.slane %v1480_v20, 4  ;;  %v1485_v37 = vrot.slane %v1483_v21, 5  ;;  %v1658_v32 = vsel %vm2213_vm12, %v2003_v27, %v1657_v28  ;;  %v1986_v48 = vor.u32 %v2027_v40, %v1985_v39  ;;  %v1621_v4 = vld [vmem:[#allocation2 + $0x38] sm:$0xe]  ;;  %v1622_v58 = vld [vmem:[#allocation2 + $0x3c] sm:$0x1] }
  0x7c   : > { %1996 = vmatmul.msk.bf16.vlgmr.msra.gmra.mxu3 %vm424_vm6, %v1547_v26  ;;  %v1207_v26 = vsel %vm2213_vm12, %v1965_v12, %v1206_v62  ;;  %v1688_v19 = vunpack.c.l.b16 %v1658_v32  ;;  %v1544_v51 = vunpack.c.l.b16 %v1500_v53  ;;  %v1507_v60 = vrot.slane %v1505_v46, 5  ;;  %v2028_v29 = vld [vmem:[#allocation2 + $0x44] sm:$0xf0]  ;;  %v1624_v53 = vld [vmem:[#allocation2 + $0x44] sm:$0x1] }
  0x7d   : > { %v1234_v35 = vunpack.c.l.b16 %v1207_v26  ;;  %v1486_v41 = vsel %vm2226_vm13, %v1481_v43, %v1485_v37  ;;  %v1518_v61 = vrot.slane %v1516_v2, 4  ;;  %v1521_v63 = vrot.slane %v1519_v47, 5  ;;  %v1989_v26 = vld [vmem:[#allocation2 + $0x40] sm:$0xf] }
  0x7e   : > { %v1543_v50 = vunpack.c.l.b16 %v1486_v41  ;;  %v1694_v54 = vpack.c.b16 %v1688_v19, %v1687_v42  ;;  %v1968_v8 = vrot.slane %v1170_v56, 9  ;;  %v1218_v9 = vrot.slane %v1171_v59, 5  ;;  %v1623_v41 = vld [vmem:[#allocation2 + $0x40] sm:$0xe]  ;;  %v1625_v42 = vld [vmem:[#allocation2 + $0x48] sm:$0xe] }
  0x7f   : > { %v1240_v49 = vpack.c.b16 %v1235_v36, %v1234_v35  ;;  %v1511_v12 = vshll.u32 %v1414_v0, 16  ;;  %v1522_v13 = vor.u32 %v1521_v63, %v1518_v61  ;;  %v1525_v14 = vshll.u32 %v1416_v1, 16  ;;  %v1626_v19 = vld [vmem:[#allocation2 + $0x4c] sm:$0x1] }
  0x80   : > { %v1549_v5 = vpack.c.b16 %v1544_v51, %v1543_v50  ;;  %v1661_v62 = vrot.slane %v1620_v3, 5  ;;  %v2005_v15 = vrot.slane %v1621_v4, 9  ;;  %v1665_v18 = vrot.slane %v1622_v58, 5 }
  0x81   : > { %v1219_v21 = vsel %vm2213_vm12, %v1968_v8, %v1218_v9  ;;  %v1513_v23 = vrot.slane %v1511_v12, 5  ;;  %v1523_v24 = vrot.slane %v1522_v13, 4  ;;  %v1527_v25 = vrot.slane %v1525_v14, 5 }
  0x82   : > { %v1666_v28 = vsel %vm2213_vm12, %v2005_v15, %v1665_v18  ;;  %v1237_v37 = vunpack.c.l.b16 %v1219_v21  ;;  %v1990_v34 = vor.u32 %v2028_v29, %v1989_v26  ;;  %v2006_v44 = vrot.slane %v1623_v41, 9 }
  0x83   : > { %v1528_v31 = vsel %vm2226_vm13, %v1523_v24, %v1527_v25  ;;  %v1690_v33 = vunpack.c.l.b16 %v1666_v28  ;;  %v1669_v46 = vrot.slane %v1624_v53, 5  ;;  %v2007_v2 = vrot.slane %v1625_v42, 9  ;;  %v2444_v24 = vld [vmem:[%s2514_s2] ss:$0 sm:$0xff] }
  0x84   : > { %v1546_v39 = vunpack.c.l.b16 %v1528_v31  ;;  %v1673_v47 = vrot.slane %v1626_v19, 5 }
  0x86   : > { %v1674_v50 = vsel %vm2213_vm12, %v2007_v2, %v1673_v47 }
  0x87   : > { %1992 = vmatmul.msk.bf16.gmra.mxu2 %vm424_vm6, %v1982_v57  ;;  %v1967_v57 = vrot.slane %v1168_v17, 9  ;;  %v1692_v56 = vunpack.c.l.b16 %v1674_v50 }
  0x88   : > { %1971 = vmatmul.msk.bf16.gmra.mxu1 %vm424_vm6, %v1239_v11  ;;  %2009 = vmatmul.msk.bf16.vlgmr.msra.gmra.mxu0 %vm424_vm6, %v1693_v6  ;;  %v1504_v11 = vrot.slane %v1502_v45, 4  ;;  %v1214_v6 = vrot.slane %v1169_v55, 5 }
  0x8a   : > { %v1508_v10 = vor.u32 %v1507_v60, %v1504_v11  ;;  %v1215_v20 = vsel %vm2213_vm12, %v1967_v57, %v1214_v6 }
  0x8b   : > { %v1236_v43 = vunpack.c.l.b16 %v1215_v20 }
  0x8c   : > { %1997 = vmatmul.msk.bf16.gmra.mxu3 %vm424_vm6, %v1548_v52  ;;  %v2004_v52 = vrot.slane %v1619_v16, 9  ;;  %v1509_v22 = vrot.slane %v1508_v10, 4 }
  0x8d   : > { %v1241_v35 = vpack.c.b16 %v1237_v37, %v1236_v43 }
  0x8e   : > { %v1662_v27 = vsel %vm2213_vm12, %v2004_v52, %v1661_v62  ;;  %v1514_v7 = vsel %vm2226_vm13, %v1509_v22, %v1513_v23 }
  0x8f   : > { %v1689_v32 = vunpack.c.l.b16 %v1662_v27  ;;  %v1545_v36 = vunpack.c.l.b16 %v1514_v7 }
  0x91   : > { %v1695_v40 = vpack.c.b16 %v1690_v33, %v1689_v32  ;;  %v1550_v17 = vpack.c.b16 %v1546_v39, %v1545_v36 }
  0x97   : > { %1993 = vmatmul.msk.bf16.gmra.mxu2 %vm424_vm6, %v1986_v48 }
  0x98   : > { %1972 = vmatmul.msk.bf16.gmra.mxu1 %vm424_vm6, %v1240_v49  ;;  %2010 = vmatmul.msk.bf16.gmra.mxu0 %vm424_vm6, %v1694_v54  ;;  %v1670_v49 = vsel %vm2213_vm12, %v2006_v44, %v1669_v46 }
  0x99   : > { %v1691_v55 = vunpack.c.l.b16 %v1670_v49 }
  0x9b   : > { %v1696_v11 = vpack.c.b16 %v1692_v56, %v1691_v55 }
  0x9c   : > { %1998 = vmatmul.msk.bf16.gmra.mxu3 %vm424_vm6, %v1549_v5 }
  0x9f   : > { %v2396_v30 = vpop.f32.mrf.mxu1 }
  0xa0   : > { %v472_v19 = vadd.f32 %v2444_v24, %v2396_v30 }
  0xa4   : > { %v450_v57 = vpop.f32.mrf.mxu0 }
  0xa5   : > { %v470_v28 = vadd.f32 %v2444_v24, %v450_v57 }
  0xa7   : > { %1994 = vmatmul.msk.bf16.gmra.mxu2 %vm424_vm6, %v1990_v34  ;;  %v2407_v48 = vpop.f32.mrf.mxu1 }
  0xa8   : > { %1973 = vmatmul.msk.bf16.gmra.mxu1 %vm424_vm6, %v1241_v35  ;;  %2011 = vmatmul.msk.bf16.gmra.mxu0 %vm424_vm6, %v1695_v40  ;;  %v473_v30 = vadd.f32 %v2444_v24, %v2407_v48 }
  0xa9   : > { %v2404_v45 = vpop.f32.mrf.mxu2 }
  0xac   : > { %1999 = vmatmul.msk.bf16.gmra.mxu3 %vm424_vm6, %v1550_v17  ;;  %v452_v63 = vpop.f32.mrf.mxu0 }
  0xad   : > { %v471_v32 = vadd.f32 %v2444_v24, %v452_v63 }
  0xaf   : > { %v2414_v51 = vpop.f32.mrf.mxu3 }
  0xb1   : > { %v2416_v54 = vpop.f32.mrf.mxu2 }
  0xb5   : > { %v663_v59 = vpop.f32.mrf.mxu1 }
  0xb6   : > { %v683_v29 = vadd.f32 %v663_v59, %v470_v28 }
  0xb7   : > { %v2418_v60 = vpop.f32.mrf.mxu3 }
  0xb8   : > { %2012 = vmatmul.msk.bf16.gmra.mxu0 %vm424_vm6, %v1696_v11 }
  0xba   : > { %v812_v61 = vpop.f32.mrf.mxu2 }
  0xbb   : > { %v832_v37 = vadd.f32 %v812_v61, %v683_v29  ;;  %v474_v29 = vadd.f32 %v2444_v24, %v2404_v45 }
  0xbd   : > { %v665_v0 = vpop.f32.mrf.mxu1 }
  0xbe   : > { %v684_v35 = vadd.f32 %v665_v0, %v471_v32 }
  0xbf   : > { %v910_v1 = vpop.f32.mrf.mxu3 }
  0xc0   : > { %v930_v33 = vadd.f32 %v910_v1, %v832_v37 }
  0xc2   : > { %v814_v16 = vpop.f32.mrf.mxu2 }
  0xc3   : > { %v833_v39 = vadd.f32 %v814_v16, %v684_v35 }
  0xc5   : > { %v668_v38 = vpop.f32.mrf.mxu1  ;;  %v1120_v3 = vpop.f32.mrf.mxu0 }
  0xc6   : > { %v1140_v40 = vadd.f32 %v1120_v3, %v930_v33  ;;  %v685_v2 = vadd.f32 %v668_v38, %v472_v19 }
  0xc7   : > { %v912_v4 = vpop.f32.mrf.mxu3 }
  0xc8   : > { %v931_v17 = vadd.f32 %v912_v4, %v833_v39 }
  0xca   : > { %v817_v58 = vpop.f32.mrf.mxu2 }
  0xcb   : > { %v834_v49 = vadd.f32 %v817_v58, %v685_v2 }
  0xcd   : > { %v670_v5 = vpop.f32.mrf.mxu1  ;;  %v1122_v6 = vpop.f32.mrf.mxu0 }
  0xce   : > { %v1141_v50 = vadd.f32 %v1122_v6, %v931_v17  ;;  %v686_v1 = vadd.f32 %v670_v5, %v473_v30 }
  0xcf   : > { %v915_v8 = vpop.f32.mrf.mxu3 }
  0xd0   : > { %v932_v11 = vadd.f32 %v915_v8, %v834_v49 }
  0xd2   : > { %v819_v9 = vpop.f32.mrf.mxu2 }
  0xd3   : > { %v835_v38 = vadd.f32 %v819_v9, %v686_v1 }
  0xd5   : > { %v2421_v10 = vpop.f32.mrf.mxu1  ;;  %v1125_v12 = vpop.f32.mrf.mxu0 }
  0xd6   : > { %v1142_v3 = vadd.f32 %v1125_v12, %v932_v11  ;;  %v687_v32 = vadd.f32 %v2421_v10, %v474_v29 }
  0xd7   : > { %v917_v13 = vpop.f32.mrf.mxu3 }
  0xd8   : > { %v933_v37 = vadd.f32 %v917_v13, %v835_v38 }
  0xda   : > { %v2423_v14 = vpop.f32.mrf.mxu2 }
  0xdb   : > { %v836_v12 = vadd.f32 %v2423_v14, %v687_v32 }
  0xdd   : > { %v2425_v52 = vpop.f32.mrf.mxu1  ;;  %v2427_v62 = vpop.f32.mrf.mxu0 }
  0xdf   : > { %v2429_v15 = vpop.f32.mrf.mxu3 }
  0xe0   : > { %v934_v10 = vadd.f32 %v2429_v15, %v836_v12  ;;  %v476_v15 = vadd.f32 %v2444_v24, %v2414_v51 }
  0xe2   : > { %v2431_v18 = vpop.f32.mrf.mxu2 }
  0xe5   : > { %v2433_v20 = vpop.f32.mrf.mxu1  ;;  %v2435_v21 = vpop.f32.mrf.mxu0 }
  0xe6   : > { %v1144_v49 = vadd.f32 %v2435_v21, %v934_v10 }
  0xe7   : > { %v2437_v22 = vpop.f32.mrf.mxu3 }
  0xea   : > { %v2439_v23 = vpop.f32.mrf.mxu2 }
  0xed   : > { %v2446_v25 = vpop.f32.mrf.mxu1  ;;  %v2448_v27 = vpop.f32.mrf.mxu0 }
  0xef   : > { %v2451_v26 = vpop.f32.mrf.mxu3 }
  0xf2   : > { %v2453_v43 = vpop.f32.mrf.mxu2 }
  0xf5   : > { %v1266_v7 = vpop.f32.mrf.mxu1  ;;  %v2455_v31 = vpop.f32.mrf.mxu0 }
  0xf6   : > { %v1286_v41 = vadd.f32 %v1266_v7, %v1140_v40 }
  0xf7   : > { %v2458_v34 = vpop.f32.mrf.mxu3 }
  0xfa   : > { %v1365_v36 = vpop.f32.mrf.mxu2 }
  0xfb   : > { %v1385_v44 = vadd.f32 %v1365_v36, %v1286_v41  ;;  %v1143_v36 = vadd.f32 %v2427_v62, %v933_v37 }
  0xfd   : > { %v1268_v53 = vpop.f32.mrf.mxu1  ;;  %v2460_v42 = vpop.f32.mrf.mxu0 }
  0xfe   : > { %v1287_v56 = vadd.f32 %v1268_v53, %v1141_v50  ;;  %v475_v53 = vadd.f32 %v2444_v24, %v2416_v54 }
  0xff   : > { %v1575_v46 = vpop.f32.mrf.mxu3 }
 0x100   : > { %v1595_v55 = vadd.f32 %v1575_v46, %v1385_v44  ;;  %v688_v46 = vadd.f32 %v2425_v52, %v475_v53 }
 0x102   : > { %v1367_v47 = vpop.f32.mrf.mxu2 }
 0x103   : > { %v1386_v61 = vadd.f32 %v1367_v47, %v1287_v56  ;;  %v837_v47 = vadd.f32 %v2431_v18, %v688_v46 }
 0x105   : > { %v1271_v57 = vpop.f32.mrf.mxu1  ;;  %v1721_v59 = vpop.f32.mrf.mxu0 }
 0x106   : > { %v1741_v0 = vadd.f32 %v1721_v59, %v1595_v55  ;;  %v1288_v58 = vadd.f32 %v1271_v57, %v1142_v3  ;;  %v935_v59 = vadd.f32 %v2437_v22, %v837_v47  ;;  %v477_v22 = vadd.f32 %v2444_v24, %v2418_v60 }
 0x107   : > { %v1577_v63 = vpop.f32.mrf.mxu3 }
 0x108   : > { %1749 = vst [vmem:[%s2468_s20] sm:$0xff] %v1741_v0  ;;  %v1596_v4 = vadd.f32 %v1577_v63, %v1386_v61  ;;  %v1779_v33 = vmul.f32 %v1741_v0, %v1741_v0  ;;  %v689_v61 = vadd.f32 %v2433_v20, %v476_v15  ;;  %v1145_v1 = vadd.f32 %v2448_v27, %v935_v59 }
 0x109   : > { %v690_v29 = vadd.f32 %v2446_v25, %v477_v22 }
 0x10a   : > { %v1370_v16 = vpop.f32.mrf.mxu2 }
 0x10b   : > { %v1387_v7 = vadd.f32 %v1370_v16, %v1288_v58 }
 0x10d   : > { %v1273_v6 = vpop.f32.mrf.mxu1  ;;  %v1723_v28 = vpop.f32.mrf.mxu0 }
 0x10e   : > { %v1742_v8 = vadd.f32 %v1723_v28, %v1596_v4  ;;  %v1289_v41 = vadd.f32 %v1273_v6, %v1143_v36 }
 0x10f   : > { %v1580_v48 = vpop.f32.mrf.mxu3 }
 0x110   : > { %1750 = vst [vmem:[%s2468_s20 + $0x8] sm:$0xff] %v1742_v8  ;;  %v1765_v35 = vadd.f32 %v1742_v8, %v1741_v0  ;;  %v1780_v9 = vmul.f32 %v1742_v8, %v1742_v8  ;;  %v1597_v39 = vadd.f32 %v1580_v48, %v1387_v7  ;;  %v838_v0 = vadd.f32 %v2439_v23, %v689_v61 }
 0x111   : > { %v839_v7 = vadd.f32 %v2453_v43, %v690_v29 }
 0x112   : > { %v1372_v5 = vpop.f32.mrf.mxu2  ;;  %v1787_v40 = vadd.f32 %v1780_v9, %v1779_v33  ;;  %v936_v4 = vadd.f32 %v2451_v26, %v838_v0 }
 0x113   : > { %v1388_v19 = vadd.f32 %v1372_v5, %v1289_v41  ;;  %v937_v26 = vadd.f32 %v2458_v34, %v839_v7 }
 0x114   : > { %v1146_v48 = vadd.f32 %v2455_v31, %v936_v4 }
 0x115   : > { %v1276_v45 = vpop.f32.mrf.mxu1  ;;  %v1726_v13 = vpop.f32.mrf.mxu0  ;;  %v1147_v36 = vadd.f32 %v2460_v42, %v937_v26 }
 0x116   : > { %v1743_v44 = vadd.f32 %v1726_v13, %v1597_v39  ;;  %v1290_v56 = vadd.f32 %v1276_v45, %v1144_v49 }
 0x117   : > { %v1582_v17 = vpop.f32.mrf.mxu3 }
 0x118   : > { %1751 = vst [vmem:[%s2468_s20 + $0x10] sm:$0xff] %v1743_v44  ;;  %v1766_v14 = vadd.f32 %v1765_v35, %v1743_v44  ;;  %v1781_v62 = vmul.f32 %v1743_v44, %v1743_v44  ;;  %v1598_v50 = vadd.f32 %v1582_v17, %v1388_v19 }
 0x11a   : > { %v1375_v2 = vpop.f32.mrf.mxu2  ;;  %v1788_v55 = vadd.f32 %v1787_v40, %v1781_v62 }
 0x11b   : > { %v1389_v52 = vadd.f32 %v1375_v2, %v1290_v56 }
 0x11d   : > { %v1278_v54 = vpop.f32.mrf.mxu1  ;;  %v1728_v57 = vpop.f32.mrf.mxu0 }
 0x11e   : > { %v1744_v11 = vadd.f32 %v1728_v57, %v1598_v50  ;;  %v1291_v3 = vadd.f32 %v1278_v54, %v1145_v1 }
 0x11f   : > { %v1585_v30 = vpop.f32.mrf.mxu3 }
 0x120   : > { %1752 = vst [vmem:[%s2468_s20 + $0x18] sm:$0xff] %v1744_v11  ;;  %v1767_v18 = vadd.f32 %v1766_v14, %v1744_v11  ;;  %v1782_v21 = vmul.f32 %v1744_v11, %v1744_v11  ;;  %v1599_v16 = vadd.f32 %v1585_v30, %v1389_v52 }
 0x122   : > { %v1377_v63 = vpop.f32.mrf.mxu2  ;;  %v1789_v38 = vadd.f32 %v1788_v55, %v1782_v21 }
 0x123   : > { %v1390_v58 = vadd.f32 %v1377_v63, %v1291_v3 }
 0x125   : > { %v1731_v51 = vpop.f32.mrf.mxu0  ;;  %v1281_v28 = vpop.f32.mrf.mxu1 }
 0x126   : > { %v1745_v6 = vadd.f32 %v1731_v51, %v1599_v16  ;;  %v1292_v60 = vadd.f32 %v1281_v28, %v1146_v48 }
 0x127   : > { %v1587_v20 = vpop.f32.mrf.mxu3 }
 0x128   : > { %1753 = vst [vmem:[%s2468_s20 + $0x20] sm:$0xff] %v1745_v6  ;;  %v1768_v23 = vadd.f32 %v1767_v18, %v1745_v6  ;;  %v1783_v37 = vmul.f32 %v1745_v6, %v1745_v6  ;;  %v1600_v8 = vadd.f32 %v1587_v20, %v1390_v58 }
 0x12a   : > { %v1380_v27 = vpop.f32.mrf.mxu2  ;;  %v1790_v32 = vadd.f32 %v1789_v38, %v1783_v37 }
 0x12b   : > { %v1391_v33 = vadd.f32 %v1380_v27, %v1292_v60 }
 0x12d   : > { %v1733_v24 = vpop.f32.mrf.mxu0  ;;  %v1283_v12 = vpop.f32.mrf.mxu1 }
 0x12e   : > { %v1746_v5 = vadd.f32 %v1733_v24, %v1600_v8  ;;  %v1293_v40 = vadd.f32 %v1283_v12, %v1147_v36 }
 0x12f   : > { %v1590_v35 = vpop.f32.mrf.mxu3 }
 0x130   : > { %1754 = vst [vmem:[%s2468_s20 + $0x28] sm:$0xff] %v1746_v5  ;;  %v1769_v25 = vadd.f32 %v1768_v23, %v1746_v5  ;;  %v1784_v9 = vmul.f32 %v1746_v5, %v1746_v5  ;;  %v1601_v43 = vadd.f32 %v1590_v35, %v1391_v33 }
 0x132   : > { %v1791_v39 = vadd.f32 %v1790_v32, %v1784_v9  ;;  %v1382_v31 = vpop.f32.mrf.mxu2 }
 0x133   : > { %v1392_v45 = vadd.f32 %v1382_v31, %v1293_v40 }
 0x135   : > { %v1736_v41 = vpop.f32.mrf.mxu0 }
 0x136   : > { %v1747_v13 = vadd.f32 %v1736_v41, %v1601_v43 }
 0x137   : > { %v1592_v10 = vpop.f32.mrf.mxu3 }
 0x138   : > { %1755 = vst [vmem:[%s2468_s20 + $0x30] sm:$0xff] %v1747_v13  ;;  %v1770_v34 = vadd.f32 %v1769_v25, %v1747_v13  ;;  %v1785_v53 = vmul.f32 %v1747_v13, %v1747_v13  ;;  %v1602_v19 = vadd.f32 %v1592_v10, %v1392_v45 }
 0x13a   : > { %v1792_v17 = vadd.f32 %v1791_v39, %v1785_v53 }
 0x13d   : > { %v1738_v44 = vpop.f32.mrf.mxu0 }
 0x13e   : > { %v1748_v46 = vadd.f32 %v1738_v44, %v1602_v19 }
 0x140   : > { %1756 = vst [vmem:[%s2468_s20 + $0x38] sm:$0xff] %v1748_v46  ;;  %v1771_v2 = vadd.f32 %v1770_v34, %v1748_v46  ;;  %v1786_v42 = vmul.f32 %v1748_v46, %v1748_v46 }
 0x142   : > { %v1772_v14 = vrot.slane %v1771_v2, 4  ;;  %v1793_v62 = vadd.f32 %v1792_v17, %v1786_v42 }
 0x144   : > { %v1773_v47 = vadd.f32 %v1772_v14, %v1771_v2  ;;  %v1794_v49 = vrot.slane %v1793_v62, 4 }
 0x146   : > { %v1774_v50 = vrot.slane %v1773_v47, 2  ;;  %v1795_v55 = vadd.f32 %v1794_v49, %v1793_v62 }
 0x148   : > { %v1775_v56 = vadd.f32 %v1774_v50, %v1773_v47  ;;  %v1796_v54 = vrot.slane %v1795_v55, 2 }
 0x14a   : > { %v1776_v57 = vrot.slane %v1775_v56, 1  ;;  %v1797_v15 = vadd.f32 %v1796_v54, %v1795_v55 }
 0x14c   : > { %v1777_v59 = vadd.f32 %v1776_v57, %v1775_v56  ;;  %v1798_v52 = vrot.slane %v1797_v15, 1 }
 0x14e   : > { %1778 = vst [vmem:[%s208_s24] sm:$0x1] %v1777_v59  ;;  %v1799_v30 = vadd.f32 %v1798_v52, %v1797_v15 }
 0x150   : > { %1800 = vst [vmem:[%s208_s24 + $0x1] sm:$0x1] %v1799_v30 }
 0x151 PF: > { %s15_s15 = sadd.s32 1, %s2048_s15  }
 0x152   : > { %p12_p4 = scmp.ge.s32.totalorder %s15_s15, 4  }
 0x154   :  { %14 = sbr.rel (!%p12_p4) target bundleno = 1 (0x1), region = 84 }

// kernel: down_forward.4
= control target key start
LH: loop header
LB: loop body
LE: loop exit
PB: predicated region body
PF: predicated region fallthrough
CT: control target
= control target key end

     0   :  { %s3103_s21 = smov 0   ;;  %s3686_s0 = inlined_call_operand.vmem [shape: f32[2,64,128], index: 0, kind: input, shape index: {}]   ;;  %s3687_s1 = inlined_call_operand.vmem [shape: f32[1,128], index: 1, kind: input, shape index: {}]   ;;  %s3688_s2 = inlined_call_operand.vmem [shape: f32[1,128], index: 2, kind: input, shape index: {}]   ;;  %s3689_s3 = inlined_call_operand.vmem [shape: bf16[9,128,128], index: 3, kind: input, shape index: {}]   ;;  %s3690_s4 = inlined_call_operand.vmem [shape: f32[1,128], index: 4, kind: input, shape index: {}]   ;;  %s3691_s5 = inlined_call_operand.vmem [shape: f32[2,64,128], index: 5, kind: output, shape index: {0}]   ;;  %s3692_s6 = inlined_call_operand.vmem [shape: f32[2,2,128], index: 6, kind: output, shape index: {1}]  }
   0x1 LB: > { %s2445_s22 = sadd.s32 4294967295, %s3065_s21   ;;  %p2449_p0 = scmp.ge.s32.totalorder %s3065_s21, 1  ;;  %s3065_s21 = sphi %s3103_s21, %s17_s21  }
   0x2   : > { %p215_p1 = scmp.lt.s32.totalorder %s3065_s21, 3 }
   0x4   : > { %p216_p2 = pnand %p2449_p0, %p215_p1 }
   0x5   : > { %p249_p3 = scmp.lt.s32.totalorder (!%p216_p2), %s2445_s22, 1 }
   0x6   : > { %219 = sbr.rel (%p216_p2) target bundleno = 346 (0x15a), region = 40 }
   0xb   : > { %v2958_v0 = vld [vmem:[%s3689_s3 + $0x38] sm:$0xff]  ;;  %v3067_v1 = vmov 0   ;;  %v2957_v2 = vld [vmem:[%s3689_s3 + $0x30] sm:$0xff]  ;;  %s3702_s22 = smov (!%p249_p3, %s2445_s22), 1  ;;  %v3127_v4 = vld [vmem:[%s3687_s1] ss:$0 sm:$0xff] }
   0xc   : > { %312 = vst [vmem:[#allocation2 + $0x20] sm:$0xf] %v3067_v1  ;;  %3031 = vmatpush.bf16.msra.mxu1 %v2958_v0  ;;  %583 = vmatpush.bf16.msra.mxu0 %v2958_v0  ;;  %v2974_v3 = vld [vmem:[%s3689_s3 + $0xb8] sm:$0xff]  ;;  %s2945_s7 = sshll.u32 %s3702_s22, 6  ;;  %v3140_v5 = vld [vmem:[%s3688_s2] ss:$0 sm:$0xff] }
   0xd   : > { %314 = vst [vmem:[#allocation2 + $0x28] sm:$0xf] %v3067_v1  ;;  %1049 = vmatpush.bf16.msra.mxu2 %v2974_v3  ;;  %s3135_s10 = scalar_lea.vmem %s3686_s0, %s2945_s7  ;;  %v2973_v6 = vld [vmem:[%s3689_s3 + $0xb0] sm:$0xff]  ;;  %v2956_v7 = vld [vmem:[%s3689_s3 + $0x28] sm:$0xff]  ;;  %v2986_v12 = vld [vmem:[%s3689_s3 + $0xf8] sm:$0xff]  ;;  %vm413_vm0 = vcmask 1043456   ;;  %s3654_s13 = scalar_lea.vmem %s3691_s5, %s2945_s7 }
   0xe   : > { %304 = vst [vmem:[#allocation2] sm:$0xf] %v3067_v1  ;;  %v267_v8 = vld [vmem:[%s3135_s10 + $0x18] sm:$0xff]  ;;  %v268_v9 = vld [vmem:[%s3135_s10 + $0x20] sm:$0xff]  ;;  %v2972_v13 = vld [vmem:[%s3689_s3 + $0xa8] sm:$0xff]  ;;  %1199 = vmatpush.bf16.msra.mxu3 %v2986_v12  ;;  %vm419_vm3 = vcmask 1040384  }
   0xf   : > { %305 = vst [vmem:[#allocation2 + $0x4] sm:$0x1] %v3067_v1  ;;  %v279_v10 = vmul.f32 %v3127_v4, %v267_v8  ;;  %v280_v11 = vmul.f32 %v3127_v4, %v268_v9  ;;  %v2985_v16 = vld [vmem:[%s3689_s3 + $0xf0] sm:$0xff]  ;;  %v2955_v17 = vld [vmem:[%s3689_s3 + $0x20] sm:$0xff]  ;;  %v269_v18 = vld [vmem:[%s3135_s10 + $0x28] sm:$0xff]  ;;  %vm925_vm6 = vcmask 1042432  }
  0x10   : > { %3032 = vmatpush.bf16.msra.mxu1 %v2957_v2  ;;  %584 = vmatpush.bf16.msra.mxu0 %v2957_v2  ;;  %306 = vst [vmem:[#allocation2 + $0x8] sm:$0xf] %v3067_v1  ;;  %v270_v19 = vld [vmem:[%s3135_s10 + $0x30] sm:$0xff]  ;;  %v281_v22 = vmul.f32 %v3127_v4, %v269_v18  ;;  %v2971_v24 = vld [vmem:[%s3689_s3 + $0xa0] sm:$0xff]  ;;  %v2984_v28 = vld [vmem:[%s3689_s3 + $0xe8] sm:$0xff]  ;;  %vm926_vm7 = vcmask 1046532  }
  0x11   : > { %307 = vst [vmem:[#allocation2 + $0xc] sm:$0x1] %v3067_v1  ;;  %1050 = vmatpush.bf16.msra.mxu2 %v2973_v6  ;;  %v291_v14 = vadd.f32 %v3140_v5, %v279_v10  ;;  %v292_v15 = vadd.f32 %v3140_v5, %v280_v11  ;;  %v282_v23 = vmul.f32 %v3127_v4, %v270_v19  ;;  %v264_v25 = vld [vmem:[%s3135_s10] sm:$0xff]  ;;  %v2954_v30 = vld [vmem:[%s3689_s3 + $0x18] sm:$0xff]  ;;  %vm414_vm1 = vsmask.f32 7938  ;;  %vm3296_vm8 = vmor %vm925_vm6, %vm926_vm7 }
  0x12   : > { %308 = vst [vmem:[#allocation2 + $0x10] sm:$0xf] %v3067_v1  ;;  %1200 = vmatpush.bf16.msra.mxu3 %v2985_v16  ;;  %v293_v29 = vadd.f32 %v3140_v5, %v281_v22  ;;  %v276_v32 = vmul.f32 %v3127_v4, %v264_v25  ;;  %v2970_v38 = vld [vmem:[%s3689_s3 + $0x98] sm:$0xff]  ;;  %v2983_v44 = vld [vmem:[%s3689_s3 + $0xe0] sm:$0xff]  ;;  %v2953_v45 = vld [vmem:[%s3689_s3 + $0x10] sm:$0xff]  ;;  %s2454_s7 = sshll.u32 %s3702_s22, 1 }
  0x13   : > { %309 = vst [vmem:[#allocation2 + $0x14] sm:$0x1] %v3067_v1  ;;  %v299_v20 = vmax.f32 %v291_v14, 0.0  ;;  %v300_v21 = vmax.f32 %v292_v15, 0.0  ;;  %v294_v31 = vadd.f32 %v3140_v5, %v282_v23  ;;  %v437_v37 = vld [vmem:[#allocation2 + $0x20] sm:$0xf]  ;;  %vm3212_vm2 = vmand %vm413_vm0, %vm414_vm1  ;;  %s262_s16 = scalar_lea.vmem %s3692_s6, %s2454_s7 }
  0x14   : > { %3033 = vmatpush.bf16.msra.mxu1 %v2956_v7  ;;  %585 = vmatpush.bf16.msra.mxu0 %v2956_v7  ;;  %310 = vst [vmem:[#allocation2 + $0x18] sm:$0xf] %v3067_v1  ;;  %v301_v39 = vmax.f32 %v293_v29, 0.0  ;;  %v288_v41 = vadd.f32 %v3140_v5, %v276_v32  ;;  %v443_v47 = vld [vmem:[#allocation2 + $0x28] sm:$0xf]  ;;  %v2969_v53 = vld [vmem:[%s3689_s3 + $0x90] sm:$0xff] }
  0x15   : > { %311 = vst [vmem:[#allocation2 + $0x1c] sm:$0x1] %v3067_v1  ;;  %1051 = vmatpush.bf16.msra.mxu2 %v2972_v13  ;;  %v327_v26 = vpack.c.bf16 %v299_v20, %v299_v20  ;;  %v328_v27 = vpack.c.bf16 %v300_v21, %v300_v21  ;;  %v302_v40 = vmax.f32 %v294_v31, 0.0  ;;  %v265_v54 = vld [vmem:[%s3135_s10 + $0x8] sm:$0xff]  ;;  %v2982_v63 = vld [vmem:[%s3689_s3 + $0xd8] sm:$0xff]  ;;  %v266_v0 = vld [vmem:[%s3135_s10 + $0x10] sm:$0xff] }
  0x16   : > { %313 = vst [vmem:[#allocation2 + $0x24] sm:$0x1] %v3067_v1  ;;  %1201 = vmatpush.bf16.msra.mxu3 %v2984_v28  ;;  %v329_v48 = vpack.c.bf16 %v301_v39, %v301_v39  ;;  %v296_v50 = vmax.f32 %v288_v41, 0.0  ;;  %v2952_v59 = vld [vmem:[%s3689_s3 + $0x8] sm:$0xff]  ;;  %vm420_vm4 = vsmask.f32 256  ;;  %v277_v6 = vmul.f32 %v3127_v4, %v265_v54 }
  0x17   : > { %315 = vst [vmem:[#allocation2 + $0x2c] sm:$0x1] %v3067_v1  ;;  %v357_v33 = vshrl.u32 %v327_v26, 16  ;;  %v360_v34 = vshll.u32 %v327_v26, 16  ;;  %v365_v35 = vshrl.u32 %v328_v27, 16  ;;  %v368_v36 = vshll.u32 %v328_v27, 16  ;;  %vm3264_vm5 = vmand %vm419_vm3, %vm420_vm4 }
  0x18   : > { %3034 = vmatpush.bf16.msra.mxu1 %v2955_v17  ;;  %586 = vmatpush.bf16.msra.mxu0 %v2955_v17  ;;  %316 = vst [vmem:[#allocation2 + $0x30] sm:$0xf] %v3067_v1  ;;  %v330_v49 = vpack.c.bf16 %v302_v40, %v302_v40  ;;  %v373_v55 = vshrl.u32 %v329_v48, 16  ;;  %v376_v56 = vshll.u32 %v329_v48, 16  ;;  %v324_v62 = vpack.c.bf16 %v296_v50, %v296_v50  ;;  %v2968_v14 = vld [vmem:[%s3689_s3 + $0x88] sm:$0xff]  ;;  %v2951_v15 = vld [vmem:[%s3689_s3] sm:$0xff] }
  0x19   : > { %317 = vst [vmem:[#allocation2 + $0x34] sm:$0x1] %v3067_v1  ;;  %1052 = vmatpush.bf16.msra.mxu2 %v2971_v24  ;;  %v3199_v42 = vrot.slane %v357_v33, 7  ;;  %v3201_v43 = vrot.slane %v365_v35, 7  ;;  %v278_v10 = vmul.f32 %v3127_v4, %v266_v0  ;;  %v2966_v16 = vld [vmem:[%s3689_s3 + $0x78] sm:$0xff]  ;;  %v289_v23 = vadd.f32 %v3140_v5, %v277_v6  ;;  %v2967_v26 = vld [vmem:[%s3689_s3 + $0x80] sm:$0xff] }
  0x1a   : > { %318 = vst [vmem:[#allocation2 + $0x38] sm:$0xf] %v3067_v1  ;;  %v381_v57 = vshrl.u32 %v330_v49, 16  ;;  %v384_v58 = vshll.u32 %v330_v49, 16  ;;  %1202 = vmatpush.bf16.msra.mxu3 %v2983_v44  ;;  %v3237_v2 = vrot.slane %v373_v55, 7  ;;  %v333_v8 = vshrl.u32 %v324_v62, 16 }
  0x1b   : > { %319 = vst [vmem:[#allocation2 + $0x3c] sm:$0x1] %v3067_v1  ;;  %v362_v51 = vor.u32 %v360_v34, %v3199_v42  ;;  %v370_v52 = vor.u32 %v368_v36, %v3201_v43  ;;  %v336_v9 = vshll.u32 %v324_v62, 16  ;;  %v416_v20 = vld [vmem:[#allocation2 + $0x8] sm:$0xf]  ;;  %v2994_v27 = vld [vmem:[%s3689_s3 + $0x138] sm:$0xff]  ;;  %v290_v28 = vadd.f32 %v3140_v5, %v278_v10 }
  0x1c   : > { %3035 = vmatpush.bf16.msra.mxu1 %v2954_v30  ;;  %587 = vmatpush.bf16.msra.mxu0 %v2954_v30  ;;  %320 = vst [vmem:[#allocation2 + $0x40] sm:$0xf] %v3067_v1  ;;  %v3239_v3 = vrot.slane %v381_v57, 7  ;;  %v378_v11 = vor.u32 %v376_v56, %v3237_v2  ;;  %v335_v17 = vrot.slane %v333_v8, 7  ;;  %v422_v22 = vld [vmem:[#allocation2 + $0xc] sm:$0x1] }
  0x1d   : > { %321 = vst [vmem:[#allocation2 + $0x44] sm:$0x1] %v3067_v1  ;;  %1053 = vmatpush.bf16.msra.mxu2 %v2970_v38  ;;  %v438_v60 = vsel %vm3212_vm2, %v362_v51, %v437_v37  ;;  %v444_v61 = vsel %vm3212_vm2, %v370_v52, %v443_v47  ;;  %v893_v29 = vld [vmem:[#allocation2] sm:$0xe]  ;;  %v363_v31 = vrot.slane %v3199_v42, 4  ;;  %v2965_v33 = vld [vmem:[%s3689_s3 + $0x70] sm:$0xff] }
  0x1e   : > { %322 = vst [vmem:[#allocation2 + $0x48] sm:$0xf] %v3067_v1  ;;  %v386_v12 = vor.u32 %v384_v58, %v3239_v3  ;;  %1203 = vmatpush.bf16.msra.mxu3 %v2982_v63  ;;  %v338_v24 = vor.u32 %v336_v9, %v335_v17  ;;  %v339_v25 = vrot.slane %v335_v17, 4  ;;  %v628_v30 = vld [vmem:[#allocation2] sm:$0xf]  ;;  %v2980_v37 = vld [vmem:[%s3689_s3 + $0xc8] sm:$0xff] }
  0x1f   : > { %439 = vst [vmem:[#allocation2 + $0x20] sm:$0xf] %v438_v60  ;;  %v449_v7 = vld [vmem:[#allocation2 + $0x30] sm:$0xf]  ;;  %v894_v36 = vld [vmem:[#allocation2 + $0x4] sm:$0x1] }
  0x20   : > { %3036 = vmatpush.bf16.msra.mxu1 %v2953_v45  ;;  %588 = vmatpush.bf16.msra.mxu0 %v2953_v45  ;;  %445 = vst [vmem:[#allocation2 + $0x28] sm:$0xf] %v444_v61  ;;  %v450_v18 = vsel %vm3212_vm2, %v378_v11, %v449_v7  ;;  %v417_v34 = vsel %vm3212_vm2, %v338_v24, %v416_v20  ;;  %v297_v39 = vmax.f32 %v289_v23, 0.0  ;;  %v648_v41 = vshrl.u32 %v628_v30, 16  ;;  %v2993_v44 = vld [vmem:[%s3689_s3 + $0x130] sm:$0xff]  ;;  %v2964_v51 = vld [vmem:[%s3689_s3 + $0x68] sm:$0xff] }
  0x21   : > { %323 = vst [vmem:[#allocation2 + $0x4c] sm:$0x1] %v3067_v1  ;;  %v455_v13 = vld [vmem:[#allocation2 + $0x38] sm:$0xf]  ;;  %1054 = vmatpush.bf16.msra.mxu2 %v2969_v53  ;;  %v2981_v1 = vld [vmem:[%s3689_s3 + $0xd0] sm:$0xff]  ;;  %v423_v35 = vsel %vm3264_vm5, %v339_v25, %v422_v22  ;;  %v651_v42 = vshll.u32 %v628_v30, 16 }
  0x22   : > { %v456_v19 = vsel %vm3212_vm2, %v386_v12, %v455_v13  ;;  %451 = vst [vmem:[#allocation2 + $0x30] sm:$0xf] %v450_v18  ;;  %1204 = vmatpush.bf16.msra.mxu3 %v2981_v1  ;;  %v298_v45 = vmax.f32 %v290_v28, 0.0  ;;  %v2551_v47 = vrot.slane %v893_v29, 9  ;;  %v325_v48 = vpack.c.bf16 %v297_v39, %v297_v39  ;;  %v440_v49 = vld [vmem:[#allocation2 + $0x24] sm:$0x1] }
  0x23   : > { %457 = vst [vmem:[#allocation2 + $0x38] sm:$0xf] %v456_v19  ;;  %v371_v50 = vrot.slane %v3201_v43, 4  ;;  %v2457_v52 = vld [vmem:[#allocation2] sm:$0xf]  ;;  %v930_v54 = vrot.slane %v894_v36, 5  ;;  %v441_v57 = vsel %vm3264_vm5, %v363_v31, %v440_v49 }
  0x24   : > { %3037 = vmatpush.bf16.msra.mxu1 %v2952_v59  ;;  %589 = vmatpush.bf16.msra.mxu0 %v2952_v59  ;;  %418 = vst [vmem:[#allocation2 + $0x8] sm:$0xf] %v417_v34  ;;  %v2979_v55 = vld [vmem:[%s3689_s3 + $0xc0] sm:$0xff]  ;;  %v3014_v43 = vld [vmem:[%s3689_s3 + $0x1b8] sm:$0xff]  ;;  %v326_v56 = vpack.c.bf16 %v298_v45, %v298_v45  ;;  %v341_v59 = vshrl.u32 %v325_v48, 16  ;;  %v344_v60 = vshll.u32 %v325_v48, 16 }
  0x25   : > { %1055 = vmatpush.bf16.msra.mxu2 %v2968_v14  ;;  %424 = vst [vmem:[#allocation2 + $0xc] sm:$0x1] %v423_v35  ;;  %v3308_v58 = vld [vmem:[#allocation2 + $0x4] sm:$0x1]  ;;  %v2992_v61 = vld [vmem:[%s3689_s3 + $0x128] sm:$0xff]  ;;  %v3022_v62 = vld [vmem:[%s3689_s3 + $0x1f8] sm:$0xff] }
  0x26   : > { %v2465_v32 = vld [vmem:[#allocation2 + $0x20] sm:$0xf]  ;;  %1205 = vmatpush.bf16.msra.mxu3 %v2980_v37  ;;  %v446_v63 = vld [vmem:[#allocation2 + $0x2c] sm:$0x1]  ;;  %vm644_vm9 = vsmask.f32 3328 }
  0x27   : > { %v2949_v38 = vld [vmem:[#allocation2 + $0x24] sm:$0xf0]  ;;  %v3316_v0 = vrot.slane %v648_v41, 4  ;;  %v3318_v6 = vrot.slane %v651_v42, 5  ;;  %v349_v7 = vshrl.u32 %v326_v56, 16  ;;  %v3013_v9 = vld [vmem:[%s3689_s3 + $0x1b0] sm:$0xff]  ;;  %v447_v1 = vsel %vm3264_vm5, %v371_v50, %v446_v63 }
  0x28   : > { %3038 = vmatpush.bf16.msra.mxu1 %v2951_v15  ;;  %590 = vmatpush.bf16.msra.mxu0 %v2951_v15  ;;  %v2466_v40 = vor.u32 %v2949_v38, %v2465_v32  ;;  %v425_v8 = vld [vmem:[#allocation2 + $0x10] sm:$0xf]  ;;  %v343_v10 = vrot.slane %v341_v59, 7  ;;  %v352_v11 = vshll.u32 %v326_v56, 16  ;;  %442 = vst [vmem:[#allocation2 + $0x24] sm:$0x1] %v441_v57  ;;  %v931_v15 = vsel %vm3296_vm8, %v2551_v47, %v930_v54 }
  0x29   : > { %1056 = vmatpush.bf16.msra.mxu2 %v2967_v26  ;;  %v2963_v12 = vld [vmem:[%s3689_s3 + $0x60] sm:$0xff]  ;;  %v428_v24 = vld [vmem:[#allocation2 + $0x14] sm:$0x1]  ;;  %v657_v26 = vshll.u32 %v3308_v58, 16  ;;  %v431_v29 = vld [vmem:[#allocation2 + $0x18] sm:$0xf]  ;;  %v985_v31 = vunpack.c.l.b16 %v931_v15  ;;  %v654_v38 = vor.u32 %v3318_v6, %v3316_v0 }
  0x2a   : > { %1206 = vmatpush.bf16.msra.mxu3 %v2979_v55  ;;  %v2991_v17 = vld [vmem:[%s3689_s3 + $0x120] sm:$0xff]  ;;  %v346_v23 = vor.u32 %v344_v60, %v343_v10  ;;  %v347_v28 = vrot.slane %v343_v10, 4  ;;  %v434_v30 = vld [vmem:[#allocation2 + $0x1c] sm:$0x1]  ;;  %v351_v34 = vrot.slane %v349_v7, 7  ;;  %v2961_v57 = vld [vmem:[%s3689_s3 + $0x50] sm:$0xff] }
  0x2b   : > { %601 = vmatmul.bf16.vlgmr.msra.gmra.mxu1 %v2466_v40  ;;  %v2947_v13 = vld [vmem:[#allocation2 + $0x4] sm:$0xf0]  ;;  %448 = vst [vmem:[#allocation2 + $0x2c] sm:$0x1] %v447_v1  ;;  %v2469_v36 = vld [vmem:[#allocation2 + $0x30] sm:$0xf] }
  0x2c   : > { %848 = vmatpush.bf16.msrb.mxu1 %v2966_v16  ;;  %1461 = vmatpush.bf16.msrb.mxu0 %v2994_v27  ;;  %v895_v14 = vld [vmem:[#allocation2 + $0x8] sm:$0xe]  ;;  %v2458_v18 = vor.u32 %v2947_v13, %v2457_v52  ;;  %v896_v19 = vld [vmem:[#allocation2 + $0xc] sm:$0x1]  ;;  %v426_v35 = vsel %vm3212_vm2, %v346_v23, %v425_v8  ;;  %v429_v40 = vsel %vm3264_vm5, %v347_v28, %v428_v24  ;;  %v2950_v41 = vld [vmem:[#allocation2 + $0x34] sm:$0xf0] }
  0x2d   : > { %1810 = vmatpush.bf16.msrb.mxu2 %v3014_v43  ;;  %v630_v16 = vld [vmem:[#allocation2 + $0x8] sm:$0xf]  ;;  %v2552_v20 = vrot.slane %v895_v14, 9  ;;  %v934_v25 = vrot.slane %v896_v19, 5  ;;  %v631_v32 = vld [vmem:[#allocation2 + $0xc] sm:$0x1]  ;;  %v2470_v56 = vor.u32 %v2950_v41, %v2469_v36 }
  0x2e   : > { %v662_v22 = vshrl.u32 %v630_v16, 16  ;;  %2072 = vmatpush.bf16.msrb.mxu3 %v3022_v62  ;;  %v665_v27 = vshll.u32 %v630_v16, 16  ;;  %591 = vmatmul.bf16.vlgmr.msra.gmra.mxu0 %v2458_v18  ;;  %427 = vst [vmem:[#allocation2 + $0x10] sm:$0xf] %v426_v35  ;;  %v355_v45 = vrot.slane %v351_v34, 4  ;;  %v2962_v47 = vld [vmem:[%s3689_s3 + $0x58] sm:$0xff] }
  0x2f   : > { %v935_v37 = vsel %vm3296_vm8, %v2552_v20, %v934_v25  ;;  %430 = vst [vmem:[#allocation2 + $0x14] sm:$0x1] %v429_v40  ;;  %vm645_vm10 = vsmask.f32 7440  ;;  %v659_v48 = vrot.slane %v657_v26, 5  ;;  %v671_v49 = vshll.u32 %v631_v32, 16 }
  0x30   : > { %849 = vmatpush.bf16.msrb.mxu1 %v2965_v33  ;;  %1462 = vmatpush.bf16.msrb.mxu0 %v2993_v44  ;;  %v664_v33 = vrot.slane %v662_v22, 4  ;;  %v667_v39 = vrot.slane %v665_v27, 5  ;;  %v986_v42 = vunpack.c.l.b16 %v935_v37  ;;  %v354_v44 = vor.u32 %v352_v11, %v351_v34  ;;  %v2990_v50 = vld [vmem:[%s3689_s3 + $0x118] sm:$0xff]  ;;  %v1244_v43 = vld [vmem:[#allocation2 + $0x8] sm:$0xf]  ;;  %vm3359_vm11 = vmor %vm644_vm9, %vm645_vm10 }
  0x31   : > { %1811 = vmatpush.bf16.msrb.mxu2 %v3013_v9  ;;  %v435_v55 = vsel %vm3264_vm5, %v355_v45, %v434_v30  ;;  %v655_v58 = vrot.slane %v654_v38, 4  ;;  %v1261_v59 = vshrl.u32 %v1244_v43, 16  ;;  %v1264_v60 = vshll.u32 %v1244_v43, 16  ;;  %v2625_v0 = vld [vmem:[#allocation2 + $0x8] sm:$0xf]  ;;  %v2989_v7 = vld [vmem:[%s3689_s3 + $0x110] sm:$0xff] }
  0x32   : > { %v668_v52 = vor.u32 %v667_v39, %v664_v33  ;;  %v432_v54 = vsel %vm3212_vm2, %v354_v44, %v431_v29  ;;  %v387_v62 = vrot.slane %v3239_v3, 4  ;;  %436 = vst [vmem:[#allocation2 + $0x1c] sm:$0x1] %v435_v55  ;;  %v673_v6 = vrot.slane %v671_v49, 5  ;;  %v3366_v8 = vld [vmem:[#allocation2 + $0x20] sm:$0xe] }
  0x33   : > { %433 = vst [vmem:[#allocation2 + $0x18] sm:$0xf] %v432_v54  ;;  %v3368_v9 = vld [vmem:[#allocation2 + $0x24] sm:$0x1]  ;;  %v3370_v13 = vld [vmem:[#allocation2 + $0xc] sm:$0x1]  ;;  %v660_v16 = vsel %vm3359_vm11, %v655_v58, %v659_v48 }
  0x34   : > { %850 = vmatpush.bf16.msrb.mxu1 %v2964_v51  ;;  %1463 = vmatpush.bf16.msrb.mxu0 %v2992_v61  ;;  %v993_v51 = vpack.c.b16 %v986_v42, %v985_v31  ;;  %v379_v61 = vrot.slane %v3237_v2, 4  ;;  %v669_v10 = vrot.slane %v668_v52, 4  ;;  %v3372_v14 = vrot.slane %v1261_v59, 4  ;;  %v2960_v15 = vld [vmem:[%s3689_s3 + $0x48] sm:$0xff]  ;;  %v3021_v28 = vld [vmem:[%s3689_s3 + $0x1f0] sm:$0xff]  ;;  %v3011_v32 = vld [vmem:[%s3689_s3 + $0x1a0] sm:$0xff] }
  0x35   : > { %v2975_v11 = vld [vmem:[#allocation2 + $0xc] sm:$0xf0]  ;;  %v1266_v20 = vrot.slane %v1264_v60, 5  ;;  %v3012_v26 = vld [vmem:[%s3689_s3 + $0x1a8] sm:$0xff]  ;;  %v2555_v30 = vrot.slane %v3366_v8, 9  ;;  %v946_v31 = vrot.slane %v3368_v9, 5  ;;  %v3397_v35 = vunpack.c.l.b16 %v660_v16  ;;  %2073 = vmatpush.bf16.msrb.mxu3 %v3021_v28 }
  0x36   : > { %1057 = vmatmul.bf16.vlgmr.msra.gmra.mxu2 %v993_v51  ;;  %v898_v1 = vld [vmem:[#allocation2 + $0x14] sm:$0x1]  ;;  %v632_v19 = vld [vmem:[#allocation2 + $0x10] sm:$0xf]  ;;  %v3382_v27 = vld [vmem:[#allocation2 + $0x28] sm:$0xe]  ;;  %v674_v34 = vsel %vm3359_vm11, %v669_v10, %v673_v6 }
  0x37   : > { %v2461_v22 = vld [vmem:[#allocation2 + $0x10] sm:$0xf]  ;;  %v938_v23 = vrot.slane %v898_v1, 5  ;;  %v676_v24 = vshrl.u32 %v632_v19, 16  ;;  %v679_v25 = vshll.u32 %v632_v19, 16  ;;  %v2988_v29 = vld [vmem:[%s3689_s3 + $0x108] sm:$0xff]  ;;  %1812 = vmatpush.bf16.msrb.mxu2 %v3012_v26  ;;  %v1267_v45 = vor.u32 %v1266_v20, %v3372_v14 }
  0x38   : > { %851 = vmatpush.bf16.msrb.mxu1 %v2963_v12  ;;  %1464 = vmatpush.bf16.msrb.mxu0 %v2991_v17  ;;  %v897_v12 = vld [vmem:[#allocation2 + $0x10] sm:$0xe]  ;;  %v2626_v17 = vor.u32 %v2975_v11, %v2625_v0  ;;  %v452_v33 = vld [vmem:[#allocation2 + $0x34] sm:$0x1]  ;;  %v2959_v40 = vld [vmem:[%s3689_s3 + $0x40] sm:$0xff]  ;;  %v3409_v43 = vunpack.c.l.b16 %v674_v34  ;;  %v2556_v59 = vrot.slane %v3382_v27, 9  ;;  %v947_v34 = vsel %vm3296_vm8, %v2555_v30, %v946_v31 }
  0x39   : > { %v2553_v18 = vrot.slane %v897_v12, 9  ;;  %v900_v42 = vld [vmem:[#allocation2 + $0x1c] sm:$0x1]  ;;  %v633_v51 = vld [vmem:[#allocation2 + $0x14] sm:$0x1]  ;;  %v678_v52 = vrot.slane %v676_v24, 4  ;;  %v453_v12 = vsel %vm3264_vm5, %v379_v61, %v452_v33 }
  0x3a   : > { %1207 = vmatmul.bf16.vlgmr.msra.gmra.mxu3 %v2626_v17  ;;  %v2948_v36 = vld [vmem:[#allocation2 + $0x14] sm:$0xf0]  ;;  %v458_v48 = vld [vmem:[#allocation2 + $0x3c] sm:$0x1]  ;;  %v681_v54 = vrot.slane %v679_v25, 5  ;;  %v3020_v11 = vld [vmem:[%s3689_s3 + $0x1e8] sm:$0xff] }
  0x3b   : > { %606 = vmatmul.bf16.gmra.mxu1 %v2470_v56  ;;  %v899_v37 = vld [vmem:[#allocation2 + $0x18] sm:$0xe]  ;;  %v939_v38 = vsel %vm3296_vm8, %v2553_v18, %v938_v23  ;;  %v2462_v41 = vor.u32 %v2948_v36, %v2461_v22  ;;  %v904_v58 = vld [vmem:[#allocation2 + $0x2c] sm:$0x1]  ;;  %v1246_v60 = vld [vmem:[#allocation2 + $0x10] sm:$0xf]  ;;  %1813 = vmatpush.bf16.msrb.mxu2 %v3011_v32  ;;  %v792_v32 = vpack.c.b16 %v3409_v43, %v3397_v35 }
  0x3c   : > { %852 = vmatpush.bf16.msrb.mxu1 %v2962_v47  ;;  %1465 = vmatpush.bf16.msrb.mxu0 %v2990_v50  ;;  %v634_v39 = vld [vmem:[#allocation2 + $0x18] sm:$0xf]  ;;  %v2554_v44 = vrot.slane %v899_v37, 9  ;;  %v1270_v47 = vshll.u32 %v3370_v13, 16  ;;  %v942_v50 = vrot.slane %v900_v42, 5  ;;  %v987_v56 = vunpack.c.l.b16 %v939_v38  ;;  %v2987_v17 = vld [vmem:[%s3689_s3 + $0x100] sm:$0xff] }
  0x3d   : > { %v3002_v49 = vld [vmem:[%s3689_s3 + $0x178] sm:$0xff]  ;;  %v690_v55 = vshrl.u32 %v634_v39, 16  ;;  %v1247_v10 = vld [vmem:[#allocation2 + $0x14] sm:$0x1]  ;;  %v459_v13 = vsel %vm3264_vm5, %v387_v62, %v458_v48  ;;  %v1268_v1 = vrot.slane %v1267_v45, 4  ;;  %v682_v18 = vor.u32 %v681_v54, %v678_v52  ;;  %2074 = vmatpush.bf16.msrb.mxu3 %v3020_v11  ;;  %v3000_v8 = vld [vmem:[%s3689_s3 + $0x168] sm:$0xff] }
  0x3e   : > { %596 = vmatmul.bf16.gmra.mxu0 %v2462_v41  ;;  %v943_v0 = vsel %vm3296_vm8, %v2554_v44, %v942_v50  ;;  %v635_v6 = vld [vmem:[#allocation2 + $0x1c] sm:$0x1]  ;;  %v2976_v19 = vld [vmem:[#allocation2 + $0x1c] sm:$0xf0]  ;;  %v1272_v2 = vrot.slane %v1270_v47, 5  ;;  %v1275_v20 = vshrl.u32 %v1246_v60, 16 }
  0x3f   : > { %v988_v14 = vunpack.c.l.b16 %v943_v0  ;;  %v1278_v22 = vshll.u32 %v1246_v60, 16  ;;  %v3001_v3 = vld [vmem:[%s3689_s3 + $0x170] sm:$0xff]  ;;  %v699_v62 = vshll.u32 %v635_v6, 16  ;;  %v2629_v23 = vld [vmem:[#allocation2 + $0x18] sm:$0xf]  ;;  %v950_v24 = vrot.slane %v904_v58, 5 }
  0x40   : > { %853 = vmatpush.bf16.msrb.mxu1 %v2961_v57  ;;  %1466 = vmatpush.bf16.msrb.mxu0 %v2989_v7  ;;  %v693_v57 = vshll.u32 %v634_v39, 16  ;;  %v692_v7 = vrot.slane %v690_v55, 4  ;;  %v1284_v25 = vshll.u32 %v1247_v10, 16  ;;  %v1277_v27 = vrot.slane %v1275_v20, 4  ;;  %454 = vst [vmem:[#allocation2 + $0x34] sm:$0x1] %v453_v12 }
  0x41   : > { %v994_v61 = vpack.c.b16 %v988_v14, %v987_v56  ;;  %v1280_v28 = vrot.slane %v1278_v22, 5  ;;  %v638_v36 = vld [vmem:[#allocation2 + $0x28] sm:$0xf]  ;;  %v3010_v37 = vld [vmem:[%s3689_s3 + $0x198] sm:$0xff]  ;;  %460 = vst [vmem:[#allocation2 + $0x3c] sm:$0x1] %v459_v13  ;;  %v1273_v35 = vsel %vm3359_vm11, %v1268_v1, %v1272_v2  ;;  %v2630_v9 = vor.u32 %v2976_v19, %v2629_v23 }
  0x42   : > { %v695_v16 = vrot.slane %v693_v57, 5  ;;  %v683_v38 = vrot.slane %v682_v18, 4  ;;  %v951_v30 = vsel %vm3296_vm8, %v2556_v59, %v950_v24  ;;  %1814 = vmatpush.bf16.msrb.mxu2 %v3010_v37  ;;  %v701_v44 = vrot.slane %v699_v62, 5  ;;  %v1248_v48 = vld [vmem:[#allocation2 + $0x18] sm:$0xf]  ;;  %v3019_v52 = vld [vmem:[%s3689_s3 + $0x1e0] sm:$0xff] }
  0x43   : > { %v1281_v39 = vor.u32 %v1280_v28, %v1277_v27  ;;  %v718_v47 = vshrl.u32 %v638_v36, 16  ;;  %v637_v50 = vld [vmem:[#allocation2 + $0x24] sm:$0x1]  ;;  %v989_v55 = vunpack.c.l.b16 %v947_v34  ;;  %v990_v43 = vunpack.c.l.b16 %v951_v30  ;;  %v3459_v57 = vld [vmem:[%s3689_s3 + $0x238] sm:$0xff]  ;;  %v3009_v58 = vld [vmem:[%s3689_s3 + $0x190] sm:$0xff]  ;;  %2075 = vmatpush.bf16.msrb.mxu3 %v3019_v52 }
  0x44   : > { %854 = vmatpush.bf16.msrb.mxu1 %v2960_v15  ;;  %v685_v15 = vshll.u32 %v633_v51, 16  ;;  %1467 = vmatpush.bf16.msrb.mxu0 %v2988_v29  ;;  %v696_v26 = vor.u32 %v695_v16, %v692_v7  ;;  %v636_v29 = vld [vmem:[#allocation2 + $0x20] sm:$0xf]  ;;  %v721_v51 = vshll.u32 %v638_v36, 16  ;;  %v1249_v59 = vld [vmem:[#allocation2 + $0x1c] sm:$0x1] }
  0x45   : > { %v704_v31 = vshrl.u32 %v636_v29, 16  ;;  %v707_v41 = vshll.u32 %v636_v29, 16  ;;  %v1282_v45 = vrot.slane %v1281_v39, 4  ;;  %v1289_v7 = vshrl.u32 %v1248_v48, 16  ;;  %v2999_v11 = vld [vmem:[%s3689_s3 + $0x160] sm:$0xff]  ;;  %v3018_v2 = vld [vmem:[%s3689_s3 + $0x1d8] sm:$0xff] }
  0x46   : > { %v687_v33 = vrot.slane %v685_v15, 5  ;;  %1062 = vmatmul.bf16.gmra.mxu2 %v994_v61  ;;  %v697_v42 = vrot.slane %v696_v26, 4  ;;  %v639_v12 = vld [vmem:[#allocation2 + $0x2c] sm:$0x1]  ;;  %v713_v13 = vshll.u32 %v637_v50, 16  ;;  %v720_v14 = vrot.slane %v718_v47, 4 }
  0x47   : > { %v706_v0 = vrot.slane %v704_v31, 4  ;;  %v709_v6 = vrot.slane %v707_v41, 5  ;;  %v1292_v15 = vshll.u32 %v1248_v48, 16  ;;  %1815 = vmatpush.bf16.msrb.mxu2 %v3009_v58  ;;  %v1250_v1 = vld [vmem:[#allocation2 + $0x20] sm:$0xf]  ;;  %v1291_v18 = vrot.slane %v1289_v7, 4  ;;  %2076 = vmatpush.bf16.msrb.mxu3 %v3018_v2 }
  0x48   : > { %855 = vmatpush.bf16.msrb.mxu1 %v2959_v40  ;;  %1468 = vmatpush.bf16.msrb.mxu0 %v2987_v17  ;;  %v1286_v40 = vrot.slane %v1284_v25, 5  ;;  %v688_v54 = vsel %vm3359_vm11, %v683_v38, %v687_v33  ;;  %v702_v10 = vsel %vm3359_vm11, %v697_v42, %v701_v44  ;;  %v723_v17 = vrot.slane %v721_v51, 5  ;;  %v905_v20 = vld [vmem:[#allocation2 + $0x30] sm:$0xe]  ;;  %v1251_v22 = vld [vmem:[#allocation2 + $0x24] sm:$0x1] }
  0x49   : > { %v1298_v19 = vshll.u32 %v1249_v59, 16  ;;  %v786_v61 = vunpack.c.l.b16 %v688_v54  ;;  %v995_v62 = vpack.c.b16 %v990_v43, %v989_v55  ;;  %v710_v23 = vor.u32 %v709_v6, %v706_v0  ;;  %v906_v25 = vld [vmem:[#allocation2 + $0x34] sm:$0x1]  ;;  %v907_v26 = vld [vmem:[#allocation2 + $0x38] sm:$0xe]  ;;  %v3008_v27 = vld [vmem:[%s3689_s3 + $0x188] sm:$0xff] }
  0x4a   : > { %v1287_v56 = vsel %vm3359_vm11, %v1282_v45, %v1286_v40  ;;  %1212 = vmatmul.bf16.gmra.mxu3 %v2630_v9  ;;  %v727_v24 = vshll.u32 %v639_v12, 16  ;;  %v787_v28 = vunpack.c.l.b16 %v702_v10  ;;  %v3476_v29 = vrot.slane %v713_v13, 5  ;;  %v908_v33 = vld [vmem:[#allocation2 + $0x3c] sm:$0x1]  ;;  %v3007_v31 = vld [vmem:[%s3689_s3 + $0x180] sm:$0xff]  ;;  %v2997_v52 = vld [vmem:[%s3689_s3 + $0x150] sm:$0xff] }
  0x4b   : > { %856 = vmatmul.bf16.vlgmr.msrb.gmra.mxu1 %v792_v32  ;;  %v1398_v60 = vunpack.c.l.b16 %v1287_v56  ;;  %v2998_v32 = vld [vmem:[%s3689_s3 + $0x158] sm:$0xff]  ;;  %v1303_v36 = vshrl.u32 %v1250_v1, 16  ;;  %v724_v37 = vor.u32 %v723_v17, %v720_v14  ;;  %v1300_v38 = vrot.slane %v1298_v19, 5  ;;  %1816 = vmatpush.bf16.msrb.mxu2 %v3008_v27  ;;  %v2633_v50 = vld [vmem:[#allocation2 + $0x28] sm:$0xf]  ;;  %v3029_v13 = vld [vmem:[%s3689_s3 + $0x230] sm:$0xff] }
  0x4c   : > { %1659 = vmatpush.bf16.msra.mxu1 %v3002_v49  ;;  %v1397_v49 = vunpack.c.l.b16 %v1273_v35  ;;  %2270 = vmatpush.bf16.msra.mxu0 %v3459_v57  ;;  %v1306_v35 = vshll.u32 %v1250_v1, 16  ;;  %v1312_v39 = vshll.u32 %v1251_v22, 16  ;;  %v2557_v40 = vrot.slane %v905_v20, 9  ;;  %v271_v47 = vld [vmem:[%s3135_s10 + $0x38] sm:$0xff]  ;;  %v2977_v51 = vld [vmem:[#allocation2 + $0x2c] sm:$0xf0] }
  0x4d   : > { %v1305_v30 = vrot.slane %v1303_v36, 4  ;;  %v3484_v41 = vrot.slane %v710_v23, 4  ;;  %v2558_v42 = vrot.slane %v907_v26, 9  ;;  %v958_v44 = vrot.slane %v908_v33, 5  ;;  %v1252_v58 = vld [vmem:[#allocation2 + $0x28] sm:$0xf] }
  0x4e   : > { %v1405_v16 = vpack.c.b16 %v1398_v60, %v1397_v49  ;;  %v1308_v45 = vrot.slane %v1306_v35, 5  ;;  %v793_v48 = vpack.c.b16 %v787_v28, %v786_v61  ;;  %v3487_v49 = vrot.slane %v727_v24, 5  ;;  %v1254_v0 = vld [vmem:[#allocation2 + $0x30] sm:$0xf]  ;;  %v1253_v20 = vld [vmem:[#allocation2 + $0x2c] sm:$0x1] }
  0x4f   : > { %v3492_v54 = vrot.slane %v724_v37, 4  ;;  %v1314_v56 = vrot.slane %v1312_v39, 5  ;;  %1817 = vmatpush.bf16.msrb.mxu2 %v3007_v31  ;;  %v283_v60 = vmul.f32 %v3127_v4, %v271_v47  ;;  %v716_v6 = vsel %vm3359_vm11, %v3484_v41, %v3476_v29  ;;  %v640_v12 = vld [vmem:[#allocation2 + $0x30] sm:$0xf]  ;;  %v1255_v24 = vld [vmem:[#allocation2 + $0x34] sm:$0x1] }
  0x50   : > { %1660 = vmatpush.bf16.msra.mxu1 %v3001_v3  ;;  %v1294_v3 = vrot.slane %v1292_v15, 5  ;;  %1469 = vmatmul.bf16.vlgmr.msrb.gmra.mxu0 %v1405_v16  ;;  %v1309_v43 = vor.u32 %v1308_v45, %v1305_v30  ;;  %v2634_v7 = vor.u32 %v2977_v51, %v2633_v50  ;;  %v959_v10 = vsel %vm3296_vm8, %v2558_v42, %v958_v44  ;;  %v3017_v4 = vld [vmem:[%s3689_s3 + $0x1d0] sm:$0xff]  ;;  %v642_v15 = vld [vmem:[#allocation2 + $0x38] sm:$0xf]  ;;  %v643_v45 = vld [vmem:[#allocation2 + $0x3c] sm:$0x1] }
  0x51   : > { %v295_v16 = vadd.f32 %v3140_v5, %v283_v60  ;;  %v1317_v17 = vshrl.u32 %v1252_v58, 16  ;;  %v1320_v1 = vshll.u32 %v1252_v58, 16  ;;  %2271 = vmatpush.bf16.msra.mxu0 %v3029_v13  ;;  %v3028_v5 = vld [vmem:[%s3689_s3 + $0x228] sm:$0xff]  ;;  %v1331_v22 = vshrl.u32 %v1254_v0, 16  ;;  %2077 = vmatpush.bf16.msrb.mxu3 %v3017_v4  ;;  %v1855_v50 = vld [vmem:[#allocation2 + $0x10] sm:$0xf] }
  0x52   : > { %v1295_v34 = vor.u32 %v1294_v3, %v1291_v18  ;;  %v730_v18 = vsel %vm3359_vm11, %v3492_v54, %v3487_v49  ;;  %v992_v3 = vunpack.c.l.b16 %v959_v10  ;;  %v735_v26 = vshll.u32 %v640_v12, 16  ;;  %v3015_v49 = vld [vmem:[%s3689_s3 + $0x1c0] sm:$0xff]  ;;  %v1858_v46 = vld [vmem:[#allocation2 + $0x1c] sm:$0x1] }
  0x53   : > { %3039 = vmatpush.bf16.msra.mxu2 %v3459_v57  ;;  %v2996_v57 = vld [vmem:[%s3689_s3 + $0x148] sm:$0xff]  ;;  %v303_v23 = vmax.f32 %v295_v16, 0.0  ;;  %v746_v27 = vshrl.u32 %v642_v15, 16  ;;  %v1319_v28 = vrot.slane %v1317_v17, 4  ;;  %v1322_v29 = vrot.slane %v1320_v1, 5 }
  0x54   : > { %1661 = vmatpush.bf16.msra.mxu1 %v3000_v8  ;;  %v954_v8 = vrot.slane %v906_v25, 5  ;;  %v1296_v9 = vrot.slane %v1295_v34, 4  ;;  %v3016_v25 = vld [vmem:[%s3689_s3 + $0x1c8] sm:$0xff]  ;;  %v2995_v34 = vld [vmem:[%s3689_s3 + $0x140] sm:$0xff]  ;;  %v1333_v36 = vrot.slane %v1331_v22, 4  ;;  %v1334_v37 = vshll.u32 %v1254_v0, 16 }
  0x55   : > { %v331_v33 = vpack.c.bf16 %v303_v23, %v303_v23  ;;  %2272 = vmatpush.bf16.msra.mxu0 %v3028_v5  ;;  %v1323_v35 = vor.u32 %v1322_v29, %v1319_v28  ;;  %v1326_v39 = vshll.u32 %v1253_v20, 16  ;;  %2078 = vmatpush.bf16.msrb.mxu3 %v3016_v25  ;;  %v788_v41 = vunpack.c.l.b16 %v716_v6  ;;  %v1857_v0 = vld [vmem:[#allocation2 + $0x18] sm:$0xf]  ;;  %v1856_v22 = vld [vmem:[#allocation2 + $0x14] sm:$0x1] }
  0x56   : > { %v1301_v55 = vsel %vm3359_vm11, %v1296_v9, %v1300_v38  ;;  %1067 = vmatmul.bf16.gmra.mxu2 %v995_v62  ;;  %v955_v59 = vsel %vm3296_vm8, %v2557_v40, %v954_v8  ;;  %v732_v62 = vshrl.u32 %v640_v12, 16  ;;  %v749_v38 = vshll.u32 %v642_v15, 16  ;;  %v641_v8 = vld [vmem:[#allocation2 + $0x34] sm:$0x1]  ;;  %v1256_v20 = vld [vmem:[#allocation2 + $0x38] sm:$0xf] }
  0x57   : > { %v1399_v14 = vunpack.c.l.b16 %v1301_v55  ;;  %v991_v19 = vunpack.c.l.b16 %v955_v59  ;;  %3040 = vmatpush.bf16.msra.mxu2 %v3029_v13  ;;  %v1340_v40 = vshll.u32 %v1255_v24, 16  ;;  %v389_v9 = vshrl.u32 %v331_v33, 16  ;;  %v461_v55 = vld [vmem:[#allocation2 + $0x40] sm:$0xf] }
  0x58   : > { %1662 = vmatpush.bf16.msra.mxu1 %v2999_v11  ;;  %v1310_v11 = vrot.slane %v1309_v43, 4  ;;  %v392_v30 = vshll.u32 %v331_v33, 16  ;;  %v1336_v31 = vrot.slane %v1334_v37, 5  ;;  %v789_v42 = vunpack.c.l.b16 %v730_v18  ;;  %v464_v18 = vld [vmem:[#allocation2 + $0x44] sm:$0x1] }
  0x59   : > { %v996_v44 = vpack.c.b16 %v992_v3, %v991_v19  ;;  %v734_v47 = vrot.slane %v732_v62, 4  ;;  %v737_v51 = vrot.slane %v735_v26, 5  ;;  %v391_v54 = vrot.slane %v389_v9, 7  ;;  %2079 = vmatpush.bf16.msrb.mxu3 %v3015_v49  ;;  %v3025_v26 = vld [vmem:[%s3689_s3 + $0x210] sm:$0xff]  ;;  %v3058_v53 = vld [vmem:[%s3690_s4] ss:$0 sm:$0xff] }
  0x5a   : > { %v1315_v2 = vsel %vm3359_vm11, %v1310_v11, %v1314_v56  ;;  %1217 = vmatmul.bf16.gmra.mxu3 %v2634_v7  ;;  %v1337_v43 = vor.u32 %v1336_v31, %v1333_v36  ;;  %v751_v56 = vrot.slane %v749_v38, 5  ;;  %v1324_v58 = vrot.slane %v1323_v35, 4  ;;  %v1257_v38 = vld [vmem:[#allocation2 + $0x3c] sm:$0x1]  ;;  %v2637_v35 = vld [vmem:[#allocation2 + $0x38] sm:$0xf] }
  0x5b   : > { %861 = vmatmul.bf16.gmra.mxu1 %v793_v48  ;;  %v1400_v61 = vunpack.c.l.b16 %v1315_v2  ;;  %v3027_v48 = vld [vmem:[%s3689_s3 + $0x220] sm:$0xff]  ;;  %3041 = vmatpush.bf16.msra.mxu2 %v3028_v5  ;;  %v1328_v59 = vrot.slane %v1326_v39, 5  ;;  %v1342_v60 = vrot.slane %v1340_v40, 5  ;;  %v394_v6 = vor.u32 %v392_v30, %v391_v54 }
  0x5c   : > { %1663 = vmatpush.bf16.msra.mxu1 %v2998_v32  ;;  %2273 = vmatpush.bf16.msra.mxu0 %v3027_v48  ;;  %v1338_v7 = vrot.slane %v1337_v43, 4  ;;  %v1872_v10 = vshrl.u32 %v1855_v50, 16  ;;  %v1875_v11 = vshll.u32 %v1855_v50, 16  ;;  %v794_v12 = vpack.c.b16 %v789_v42, %v788_v41 }
  0x5d   : > { %v1406_v32 = vpack.c.b16 %v1400_v61, %v1399_v14  ;;  %v741_v13 = vshll.u32 %v641_v8, 16  ;;  %v395_v4 = vrot.slane %v391_v54, 4  ;;  %v3026_v14 = vld [vmem:[%s3689_s3 + $0x218] sm:$0xff]  ;;  %v738_v15 = vor.u32 %v737_v51, %v734_v47  ;;  %v3024_v51 = vld [vmem:[%s3689_s3 + $0x208] sm:$0xff] }
  0x5e   : > { %v755_v16 = vshll.u32 %v643_v45, 16  ;;  %v462_v17 = vsel %vm3212_vm2, %v394_v6, %v461_v55  ;;  %v1886_v1 = vshrl.u32 %v1857_v0, 16  ;;  %v1329_v2 = vsel %vm3359_vm11, %v1324_v58, %v1328_v59  ;;  %v3003_v54 = vld [vmem:[#allocation2 + $0x14] sm:$0xf0]  ;;  %v3023_v6 = vld [vmem:[%s3689_s3 + $0x200] sm:$0xff] }
  0x5f   : > { %3042 = vmatpush.bf16.msra.mxu2 %v3027_v48  ;;  %463 = vst [vmem:[#allocation2 + $0x40] sm:$0xf] %v462_v17  ;;  %v1889_v5 = vshll.u32 %v1857_v0, 16  ;;  %v1874_v3 = vrot.slane %v1872_v10, 4  ;;  %v1877_v61 = vrot.slane %v1875_v11, 5  ;;  %v743_v62 = vrot.slane %v741_v13, 5 }
  0x60   : > { %1664 = vmatpush.bf16.msra.mxu1 %v2997_v52  ;;  %1474 = vmatmul.bf16.gmra.mxu0 %v1406_v32  ;;  %v748_v52 = vrot.slane %v746_v27, 4  ;;  %v1888_v23 = vrot.slane %v1886_v1, 4  ;;  %v465_v25 = vsel %vm3264_vm5, %v395_v4, %v464_v18  ;;  %v1401_v27 = vunpack.c.l.b16 %v1329_v2  ;;  %v2793_v48 = vld [vmem:[#allocation2 + $0x10] sm:$0xf]  ;;  %v1506_v17 = vld [vmem:[#allocation2 + $0x8] sm:$0xe] }
  0x61   : > { %2274 = vmatpush.bf16.msra.mxu0 %v3026_v14  ;;  %v1891_v24 = vrot.slane %v1889_v5, 5  ;;  %466 = vst [vmem:[#allocation2 + $0x44] sm:$0x1] %v465_v25  ;;  %v1345_v29 = vshrl.u32 %v1256_v20, 16  ;;  %v1348_v32 = vshll.u32 %v1256_v20, 16  ;;  %v739_v33 = vrot.slane %v738_v15, 4 }
  0x62   : > { %v752_v19 = vor.u32 %v751_v56, %v748_v52  ;;  %v757_v36 = vrot.slane %v755_v16, 5  ;;  %v1881_v37 = vshll.u32 %v1856_v22, 16  ;;  %v1878_v21 = vor.u32 %v1877_v61, %v1874_v3  ;;  %v1861_v15 = vld [vmem:[#allocation2 + $0x28] sm:$0xf]  ;;  %v1507_v1 = vld [vmem:[#allocation2 + $0xc] sm:$0x1] }
  0x63   : > { %3043 = vmatpush.bf16.msra.mxu2 %v3026_v14  ;;  %v1895_v39 = vshll.u32 %v1858_v46, 16  ;;  %v1347_v40 = vrot.slane %v1345_v29, 4  ;;  %v1350_v8 = vrot.slane %v1348_v32, 5  ;;  %v1892_v9 = vor.u32 %v1891_v24, %v1888_v23  ;;  %v1509_v2 = vld [vmem:[#allocation2 + $0x14] sm:$0x1] }
  0x64   : > { %1665 = vmatpush.bf16.msra.mxu1 %v2996_v57  ;;  %v1343_v57 = vsel %vm3359_vm11, %v1338_v7, %v1342_v60  ;;  %v744_v45 = vsel %vm3359_vm11, %v739_v33, %v743_v62  ;;  %v1879_v55 = vrot.slane %v1878_v21, 4  ;;  %v1883_v43 = vrot.slane %v1881_v37, 5  ;;  %v1860_v37 = vld [vmem:[#allocation2 + $0x24] sm:$0x1] }
  0x65   : > { %v1402_v28 = vunpack.c.l.b16 %v1343_v57  ;;  %2275 = vmatpush.bf16.msra.mxu0 %v3025_v26  ;;  %v1351_v42 = vor.u32 %v1350_v8, %v1347_v40  ;;  %v1897_v56 = vrot.slane %v1895_v39, 5  ;;  %v1893_v58 = vrot.slane %v1892_v9, 4  ;;  %v1862_v39 = vld [vmem:[#allocation2 + $0x2c] sm:$0x1] }
  0x66   : > { %1072 = vmatmul.bf16.gmra.mxu2 %v996_v44  ;;  %v2978_v30 = vld [vmem:[#allocation2 + $0x3c] sm:$0xf0]  ;;  %v1354_v44 = vshll.u32 %v1257_v38, 16  ;;  %v790_v13 = vunpack.c.l.b16 %v744_v45  ;;  %v2794_v16 = vor.u32 %v3003_v54, %v2793_v48  ;;  %v1884_v57 = vsel %vm3359_vm11, %v1879_v55, %v1883_v43  ;;  %v2117_v45 = vld [vmem:[#allocation2 + $0x10] sm:$0xe] }
  0x67   : > { %3044 = vmatpush.bf16.msra.mxu2 %v3025_v26  ;;  %v1407_v31 = vpack.c.b16 %v1402_v28, %v1401_v27  ;;  %v1258_v41 = vld [vmem:[#allocation2 + $0x40] sm:$0xf]  ;;  %v2638_v47 = vor.u32 %v2978_v30, %v2637_v35  ;;  %v1352_v7 = vrot.slane %v1351_v42, 4  ;;  %v1898_v5 = vsel %vm3359_vm11, %v1893_v58, %v1897_v56  ;;  %v2119_v48 = vld [vmem:[#allocation2 + $0x18] sm:$0xe] }
  0x68   : > { %1666 = vmatpush.bf16.msra.mxu1 %v2995_v34  ;;  %v753_v34 = vrot.slane %v752_v19, 4  ;;  %v1359_v49 = vshrl.u32 %v1258_v41, 16  ;;  %v1362_v50 = vshll.u32 %v1258_v41, 16  ;;  %v1259_v59 = vld [vmem:[#allocation2 + $0x44] sm:$0x1]  ;;  %v1356_v10 = vrot.slane %v1354_v44, 5 }
  0x69   : > { %2276 = vmatpush.bf16.msra.mxu0 %v3024_v51  ;;  %v1368_v11 = vshll.u32 %v1259_v59, 16  ;;  %v1508_v19 = vld [vmem:[#allocation2 + $0x10] sm:$0xe]  ;;  %v1914_v62 = vshrl.u32 %v1861_v15, 16  ;;  %v1917_v46 = vshll.u32 %v1861_v15, 16  ;;  %v2719_v25 = vrot.slane %v1506_v17, 9 }
  0x6a   : > { %v758_v52 = vsel %vm3359_vm11, %v753_v34, %v757_v36  ;;  %1222 = vmatmul.bf16.gmra.mxu3 %v2638_v47  ;;  %v1361_v60 = vrot.slane %v1359_v49, 4  ;;  %v1364_v0 = vrot.slane %v1362_v50, 5  ;;  %v1357_v3 = vsel %vm3359_vm11, %v1352_v7, %v1356_v10  ;;  %v2118_v47 = vld [vmem:[#allocation2 + $0x14] sm:$0x1]  ;;  %v2120_v49 = vld [vmem:[#allocation2 + $0x1c] sm:$0x1] }
  0x6b   : > { %866 = vmatmul.bf16.gmra.mxu1 %v794_v12  ;;  %v1859_v12 = vld [vmem:[#allocation2 + $0x20] sm:$0xf]  ;;  %3045 = vmatpush.bf16.msra.mxu2 %v3024_v51  ;;  %v791_v4 = vunpack.c.l.b16 %v758_v52  ;;  %v1370_v18 = vrot.slane %v1368_v11, 5  ;;  %v1540_v26 = vrot.slane %v1507_v1, 5  ;;  %v2720_v27 = vrot.slane %v1508_v19, 9 }
  0x6c   : > { %v1365_v14 = vor.u32 %v1364_v0, %v1361_v60  ;;  %v1900_v22 = vshrl.u32 %v1859_v12, 16  ;;  %v1903_v61 = vshll.u32 %v1859_v12, 16  ;;  %v1544_v28 = vrot.slane %v1509_v2, 5  ;;  %v2797_v52 = vld [vmem:[#allocation2 + $0x20] sm:$0xf] }
  0x6d   : > { %2277 = vmatpush.bf16.msra.mxu0 %v3023_v6  ;;  %v795_v23 = vpack.c.b16 %v791_v4, %v790_v13  ;;  %v2008_v29 = vunpack.c.l.b16 %v1884_v57  ;;  %v2009_v32 = vunpack.c.l.b16 %v1898_v5  ;;  %v1403_v33 = vunpack.c.l.b16 %v1357_v3  ;;  %v3004_v54 = vld [vmem:[#allocation2 + $0x24] sm:$0xf0]  ;;  %v1863_v55 = vld [vmem:[#allocation2 + $0x30] sm:$0xf]  ;;  %v1865_v60 = vld [vmem:[#allocation2 + $0x38] sm:$0xf] }
  0x6e   : > { %v1366_v20 = vrot.slane %v1365_v14, 4  ;;  %v1902_v34 = vrot.slane %v1900_v22, 4  ;;  %v1905_v38 = vrot.slane %v1903_v61, 5  ;;  %v1916_v35 = vrot.slane %v1914_v62, 4  ;;  %v1510_v1 = vld [vmem:[#allocation2 + $0x18] sm:$0xe] }
  0x6f   : > { %3046 = vmatpush.bf16.msra.mxu2 %v3023_v6  ;;  %v1919_v21 = vrot.slane %v1917_v46, 5  ;;  %v1541_v40 = vsel %vm3296_vm8, %v2719_v25, %v1540_v26  ;;  %v1545_v8 = vsel %vm3296_vm8, %v2720_v27, %v1544_v28  ;;  %v2016_v9 = vpack.c.b16 %v2009_v32, %v2008_v29  ;;  %v1512_v57 = vld [vmem:[#allocation2 + $0x20] sm:$0xe]  ;;  %v1513_v5 = vld [vmem:[#allocation2 + $0x24] sm:$0x1] }
  0x70   : > { %1479 = vmatmul.bf16.gmra.mxu0 %v1407_v31  ;;  %v1371_v24 = vsel %vm3359_vm11, %v1366_v20, %v1370_v18  ;;  %v1909_v30 = vshll.u32 %v1860_v37, 16  ;;  %v1906_v41 = vor.u32 %v1905_v38, %v1902_v34  ;;  %v1923_v44 = vshll.u32 %v1862_v39, 16  ;;  %v1511_v18 = vld [vmem:[#allocation2 + $0x1c] sm:$0x1]  ;;  %v1864_v62 = vld [vmem:[#allocation2 + $0x34] sm:$0x1] }
  0x71   : > { %v1404_v36 = vunpack.c.l.b16 %v1371_v24  ;;  %v1920_v42 = vor.u32 %v1919_v21, %v1916_v35  ;;  %v1595_v50 = vunpack.c.l.b16 %v1541_v40  ;;  %v1596_v51 = vunpack.c.l.b16 %v1545_v8  ;;  %v1866_v46 = vld [vmem:[#allocation2 + $0x3c] sm:$0x1]  ;;  %v2121_v35 = vld [vmem:[#allocation2 + $0x20] sm:$0xe]  ;;  %v2122_v39 = vld [vmem:[#allocation2 + $0x24] sm:$0x1] }
  0x72   : > { %v1907_v43 = vrot.slane %v1906_v41, 4  ;;  %v1911_v56 = vrot.slane %v1909_v30, 5  ;;  %v1925_v59 = vrot.slane %v1923_v44, 5  ;;  %v2887_v0 = vrot.slane %v2117_v45, 9  ;;  %v2123_v40 = vld [vmem:[#allocation2 + $0x28] sm:$0xe] }
  0x73   : > { %v1408_v31 = vpack.c.b16 %v1404_v36, %v1403_v33  ;;  %v1921_v58 = vrot.slane %v1920_v42, 4  ;;  %v2151_v6 = vrot.slane %v2118_v47, 5  ;;  %v2888_v7 = vrot.slane %v2119_v48, 9  ;;  %v2124_v8 = vld [vmem:[#allocation2 + $0x2c] sm:$0x1] }
  0x74   : > { %v2155_v10 = vrot.slane %v2120_v49, 5  ;;  %v2798_v11 = vor.u32 %v3004_v54, %v2797_v52  ;;  %v1928_v12 = vshrl.u32 %v1863_v55, 16  ;;  %v1931_v13 = vshll.u32 %v1863_v55, 16  ;;  %v3005_v47 = vld [vmem:[#allocation2 + $0x34] sm:$0xf0] }
  0x75   : > { %v1942_v4 = vshrl.u32 %v1865_v60, 16  ;;  %v1945_v14 = vshll.u32 %v1865_v60, 16  ;;  %v1912_v15 = vsel %vm3359_vm11, %v1907_v43, %v1911_v56  ;;  %v1603_v17 = vpack.c.b16 %v1596_v51, %v1595_v50  ;;  %v1867_v55 = vld [vmem:[#allocation2 + $0x40] sm:$0xf]  ;;  %v1869_v43 = vld [vmem:[#allocation2 + $0x48] sm:$0xf] }
  0x76   : > { %1818 = vmatmul.bf16.vlgmr.msrb.gmra.mxu2 %v2794_v16  ;;  %v1926_v16 = vsel %vm3359_vm11, %v1921_v58, %v1925_v59  ;;  %v2152_v19 = vsel %vm3296_vm8, %v2887_v0, %v2151_v6  ;;  %v2156_v2 = vsel %vm3296_vm8, %v2888_v7, %v2155_v10  ;;  %v1930_v20 = vrot.slane %v1928_v12, 4  ;;  %v1514_v58 = vld [vmem:[#allocation2 + $0x28] sm:$0xe]  ;;  %v1515_v59 = vld [vmem:[#allocation2 + $0x2c] sm:$0x1] }
  0x77   : > { %v1933_v22 = vrot.slane %v1931_v13, 5  ;;  %v2010_v3 = vunpack.c.l.b16 %v1912_v15  ;;  %v2011_v61 = vunpack.c.l.b16 %v1926_v16  ;;  %v1947_v24 = vrot.slane %v1945_v14, 5  ;;  %v1516_v60 = vld [vmem:[#allocation2 + $0x30] sm:$0xe] }
  0x78   : > { %v2206_v25 = vunpack.c.l.b16 %v2152_v19  ;;  %v2207_v26 = vunpack.c.l.b16 %v2156_v2  ;;  %v2721_v27 = vrot.slane %v1510_v1, 9  ;;  %v1548_v28 = vrot.slane %v1511_v18, 5 }
  0x79   : > { %v2722_v29 = vrot.slane %v1512_v57, 9  ;;  %v1552_v32 = vrot.slane %v1513_v5, 5  ;;  %v1934_v33 = vor.u32 %v1933_v22, %v1930_v20  ;;  %v1937_v34 = vshll.u32 %v1864_v62, 16  ;;  %v1868_v62 = vld [vmem:[#allocation2 + $0x44] sm:$0x1] }
  0x7a   : > { %2080 = vmatmul.bf16.vlgmr.msrb.gmra.mxu3 %v2016_v9  ;;  %v1951_v36 = vshll.u32 %v1866_v46, 16  ;;  %v2017_v37 = vpack.c.b16 %v2011_v61, %v2010_v3  ;;  %v2214_v21 = vpack.c.b16 %v2207_v26, %v2206_v25  ;;  %v1549_v9 = vsel %vm3296_vm8, %v2721_v27, %v1548_v28  ;;  %v1870_v46 = vld [vmem:[#allocation2 + $0x4c] sm:$0x1] }
  0x7b   : > { %871 = vmatmul.bf16.gmra.mxu1 %v795_v23  ;;  %v1944_v23 = vrot.slane %v1942_v4, 4  ;;  %v1553_v30 = vsel %vm3296_vm8, %v2722_v29, %v1552_v32  ;;  %v1935_v41 = vrot.slane %v1934_v33, 4  ;;  %v1939_v42 = vrot.slane %v1937_v34, 5  ;;  %v2125_v33 = vld [vmem:[#allocation2 + $0x30] sm:$0xe] }
  0x7c   : > { %v1953_v44 = vrot.slane %v1951_v36, 5  ;;  %v2889_v45 = vrot.slane %v2121_v35, 9  ;;  %v2159_v49 = vrot.slane %v2122_v39, 5  ;;  %v2890_v50 = vrot.slane %v2123_v40, 9  ;;  %v2126_v34 = vld [vmem:[#allocation2 + $0x34] sm:$0x1] }
  0x7d   : > { %v1948_v38 = vor.u32 %v1947_v24, %v1944_v23  ;;  %v2163_v51 = vrot.slane %v2124_v8, 5  ;;  %v1597_v52 = vunpack.c.l.b16 %v1549_v9  ;;  %v1598_v54 = vunpack.c.l.b16 %v1553_v30  ;;  %v2127_v36 = vld [vmem:[#allocation2 + $0x38] sm:$0xe]  ;;  %v3006_v39 = vld [vmem:[#allocation2 + $0x44] sm:$0xf0] }
  0x7e   : > { %v1940_v0 = vsel %vm3359_vm11, %v1935_v41, %v1939_v42  ;;  %v2160_v7 = vsel %vm3296_vm8, %v2889_v45, %v2159_v49  ;;  %v1956_v12 = vshrl.u32 %v1867_v55, 16  ;;  %v1959_v13 = vshll.u32 %v1867_v55, 16  ;;  %v2131_v49 = vld [vmem:[#allocation2 + $0x48] sm:$0xe] }
  0x7f   : > { %v1949_v48 = vrot.slane %v1948_v38, 4  ;;  %v2164_v10 = vsel %vm3296_vm8, %v2890_v50, %v2163_v51  ;;  %v1970_v4 = vshrl.u32 %v1869_v43, 16  ;;  %v1973_v14 = vshll.u32 %v1869_v43, 16  ;;  %v2132_v50 = vld [vmem:[#allocation2 + $0x4c] sm:$0x1] }
  0x80   : > { %1484 = vmatmul.bf16.gmra.mxu0 %v1408_v31  ;;  %v2801_v31 = vld [vmem:[#allocation2 + $0x30] sm:$0xf]  ;;  %v1604_v15 = vpack.c.b16 %v1598_v54, %v1597_v52  ;;  %v2012_v16 = vunpack.c.l.b16 %v1940_v0  ;;  %v2208_v1 = vunpack.c.l.b16 %v2160_v7  ;;  %v2209_v18 = vunpack.c.l.b16 %v2164_v10  ;;  %v1519_v7 = vld [vmem:[#allocation2 + $0x3c] sm:$0x1]  ;;  %v1520_v10 = vld [vmem:[#allocation2 + $0x40] sm:$0xe] }
  0x81   : > { %v2802_v56 = vor.u32 %v3005_v47, %v2801_v31  ;;  %v1954_v6 = vsel %vm3359_vm11, %v1949_v48, %v1953_v44  ;;  %v2723_v19 = vrot.slane %v1514_v58, 9  ;;  %v1556_v2 = vrot.slane %v1515_v59, 5  ;;  %v2129_v47 = vld [vmem:[#allocation2 + $0x40] sm:$0xe]  ;;  %v2130_v48 = vld [vmem:[#allocation2 + $0x44] sm:$0x1] }
  0x82   : > { %v2724_v57 = vrot.slane %v1516_v60, 9  ;;  %v1958_v20 = vrot.slane %v1956_v12, 4  ;;  %v1961_v22 = vrot.slane %v1959_v13, 5  ;;  %v1972_v3 = vrot.slane %v1970_v4, 4  ;;  %v1518_v58 = vld [vmem:[#allocation2 + $0x38] sm:$0xe] }
  0x83   : > { %v1975_v61 = vrot.slane %v1973_v14, 5  ;;  %v1557_v23 = vsel %vm3296_vm8, %v2723_v19, %v1556_v2  ;;  %v2215_v26 = vpack.c.b16 %v2209_v18, %v2208_v1  ;;  %v1965_v28 = vshll.u32 %v1868_v62, 16 }
  0x84   : > { %v1962_v27 = vor.u32 %v1961_v22, %v1958_v20  ;;  %v1979_v32 = vshll.u32 %v1870_v46, 16  ;;  %v1599_v38 = vunpack.c.l.b16 %v1557_v23  ;;  %v2891_v31 = vrot.slane %v2125_v33, 9 }
  0x85   : > { %v1976_v29 = vor.u32 %v1975_v61, %v1972_v3  ;;  %v1967_v8 = vrot.slane %v1965_v28, 5  ;;  %v2167_v41 = vrot.slane %v2126_v34, 5  ;;  %v2892_v42 = vrot.slane %v2127_v36, 9 }
  0x86   : > { %1823 = vmatmul.bf16.gmra.mxu2 %v2798_v11  ;;  %v1517_v11 = vld [vmem:[#allocation2 + $0x34] sm:$0x1]  ;;  %v1963_v40 = vrot.slane %v1962_v27, 4  ;;  %v1981_v30 = vrot.slane %v1979_v32, 5  ;;  %v2893_v59 = vrot.slane %v2129_v47, 9  ;;  %v2175_v60 = vrot.slane %v2130_v48, 5 }
  0x87   : > { %v1560_v5 = vrot.slane %v1517_v11, 5  ;;  %v1977_v9 = vrot.slane %v1976_v29, 4  ;;  %v2168_v55 = vsel %vm3296_vm8, %v2891_v31, %v2167_v41  ;;  %v2894_v0 = vrot.slane %v2131_v49, 9  ;;  %v1521_v11 = vld [vmem:[#allocation2 + $0x44] sm:$0x1] }
  0x88   : > { %v1968_v51 = vsel %vm3359_vm11, %v1963_v40, %v1967_v8  ;;  %v2210_v13 = vunpack.c.l.b16 %v2168_v55  ;;  %v2725_v14 = vrot.slane %v1518_v58, 9  ;;  %v2176_v18 = vsel %vm3296_vm8, %v2893_v59, %v2175_v60 }
  0x89   : > { %v1561_v24 = vsel %vm3296_vm8, %v2724_v57, %v1560_v5  ;;  %v1982_v52 = vsel %vm3359_vm11, %v1977_v9, %v1981_v30  ;;  %v2014_v63 = vunpack.c.l.b16 %v1968_v51  ;;  %v2212_v3 = vunpack.c.l.b16 %v2176_v18 }
  0x8a   : > { %2085 = vmatmul.bf16.gmra.mxu3 %v2017_v37  ;;  %v2128_v37 = vld [vmem:[#allocation2 + $0x3c] sm:$0x1]  ;;  %v1600_v35 = vunpack.c.l.b16 %v1561_v24  ;;  %v2015_v12 = vunpack.c.l.b16 %v1982_v52 }
  0x8b   : > { %1667 = vmatmul.bf16.vlgmr.msra.gmra.mxu1 %v1603_v17  ;;  %v2013_v17 = vunpack.c.l.b16 %v1954_v6  ;;  %v2171_v44 = vrot.slane %v2128_v37, 5  ;;  %v2179_v6 = vrot.slane %v2132_v50, 5 }
  0x8c   : > { %v1605_v54 = vpack.c.b16 %v1600_v35, %v1599_v38  ;;  %v2019_v1 = vpack.c.b16 %v2015_v12, %v2014_v63 }
  0x8d   : > { %v2018_v25 = vpack.c.b16 %v2013_v17, %v2012_v16  ;;  %v2172_v43 = vsel %vm3296_vm8, %v2892_v42, %v2171_v44  ;;  %v2726_v16 = vrot.slane %v1520_v10, 9  ;;  %v1568_v17 = vrot.slane %v1521_v11, 5 }
  0x8e   : > { %v2211_v4 = vunpack.c.l.b16 %v2172_v43  ;;  %v2180_v19 = vsel %vm3296_vm8, %v2894_v0, %v2179_v6 }
  0x8f   : > { %v1569_v22 = vsel %vm3296_vm8, %v2726_v16, %v1568_v17  ;;  %v2213_v61 = vunpack.c.l.b16 %v2180_v19 }
  0x90   : > { %2278 = vmatmul.bf16.vlgmr.msra.gmra.mxu0 %v2214_v21  ;;  %v2805_v21 = vld [vmem:[#allocation2 + $0x40] sm:$0xf]  ;;  %v2216_v2 = vpack.c.b16 %v2211_v4, %v2210_v13  ;;  %v1602_v46 = vunpack.c.l.b16 %v1569_v22 }
  0x91   : > { %v2806_v45 = vor.u32 %v3006_v39, %v2805_v21  ;;  %v2217_v23 = vpack.c.b16 %v2213_v61, %v2212_v3 }
  0x96   : > { %1828 = vmatmul.bf16.gmra.mxu2 %v2802_v56 }
  0x9a   : > { %2090 = vmatmul.bf16.gmra.mxu3 %v2018_v25 }
  0x9b   : > { %1672 = vmatmul.bf16.gmra.mxu1 %v1604_v15  ;;  %v1564_v15 = vrot.slane %v1519_v7, 5 }
  0x9d   : > { %v1565_v20 = vsel %vm3296_vm8, %v2725_v14, %v1564_v15 }
  0x9e   : > { %v1601_v62 = vunpack.c.l.b16 %v1565_v20 }
  0xa0   : > { %2283 = vmatmul.bf16.gmra.mxu0 %v2215_v26  ;;  %v1606_v24 = vpack.c.b16 %v1602_v46, %v1601_v62 }
  0xa6   : > { %1833 = vmatmul.bf16.gmra.mxu2 %v2806_v45 }
  0xa8   : > { %v3605_v56 = vpop.f32.mrf.mxu1 }
  0xa9   : > { %v616_v0 = vadd.f32 %v3058_v53, %v3605_v56 }
  0xaa   : > { %2095 = vmatmul.bf16.gmra.mxu3 %v2019_v1 }
  0xab   : > { %1677 = vmatmul.bf16.gmra.mxu1 %v1605_v54  ;;  %v592_v57 = vpop.f32.mrf.mxu0 }
  0xac   : > { %v612_v34 = vadd.f32 %v3058_v53, %v592_v57 }
  0xb0   : > { %v604_v5 = vpop.f32.mrf.mxu1  ;;  %2288 = vmatmul.bf16.gmra.mxu0 %v2216_v2 }
  0xb1   : > { %v617_v13 = vadd.f32 %v3058_v53, %v604_v5 }
  0xb3   : > { %v594_v25 = vpop.f32.mrf.mxu0 }
  0xb4   : > { %v613_v40 = vadd.f32 %v3058_v53, %v594_v25 }
  0xb6   : > { %2293 = vmatmul.bf16.vlgmr.msra.gmra.mxu2 %v2217_v23 }
  0xb8   : > { %v607_v26 = vpop.f32.mrf.mxu1 }
  0xb9   : > { %v1058_v27 = vpop.f32.mrf.mxu2  ;;  %v618_v56 = vadd.f32 %v3058_v53, %v607_v26 }
  0xbb   : > { %1682 = vmatmul.bf16.gmra.mxu1 %v1606_v24  ;;  %v597_v28 = vpop.f32.mrf.mxu0 }
  0xbc   : > { %v614_v44 = vadd.f32 %v3058_v53, %v597_v28 }
  0xbd   : > { %v1208_v32 = vpop.f32.mrf.mxu3 }
  0xc0   : > { %v609_v29 = vpop.f32.mrf.mxu1 }
  0xc1   : > { %v1060_v33 = vpop.f32.mrf.mxu2  ;;  %v619_v5 = vadd.f32 %v3058_v53, %v609_v29 }
  0xc3   : > { %v599_v36 = vpop.f32.mrf.mxu0 }
  0xc4   : > { %v615_v52 = vadd.f32 %v3058_v53, %v599_v36 }
  0xc5   : > { %v1210_v38 = vpop.f32.mrf.mxu3 }
  0xc8   : > { %v857_v37 = vpop.f32.mrf.mxu1 }
  0xc9   : > { %v877_v35 = vadd.f32 %v857_v37, %v612_v34  ;;  %v1063_v39 = vpop.f32.mrf.mxu2 }
  0xcb   : > { %v1078_v21 = vadd.f32 %v1058_v27, %v877_v35 }
  0xcd   : > { %v1470_v8 = vpop.f32.mrf.mxu0  ;;  %v3618_v30 = vpop.f32.mrf.mxu3  ;;  %v1228_v46 = vadd.f32 %v1208_v32, %v1078_v21 }
  0xcf   : > { %v1490_v26 = vadd.f32 %v1470_v8, %v1228_v46 }
  0xd0   : > { %v859_v9 = vpop.f32.mrf.mxu1 }
  0xd1   : > { %v878_v31 = vadd.f32 %v859_v9, %v613_v40  ;;  %v1065_v42 = vpop.f32.mrf.mxu2 }
  0xd3   : > { %v1079_v41 = vadd.f32 %v1060_v33, %v878_v31 }
  0xd5   : > { %v1472_v45 = vpop.f32.mrf.mxu0  ;;  %v3620_v48 = vpop.f32.mrf.mxu3  ;;  %v1229_v34 = vadd.f32 %v1210_v38, %v1079_v41 }
  0xd7   : > { %v1491_v32 = vadd.f32 %v1472_v45, %v1229_v34 }
  0xd8   : > { %v862_v47 = vpop.f32.mrf.mxu1 }
  0xd9   : > { %v879_v49 = vadd.f32 %v862_v47, %v614_v44  ;;  %v1068_v51 = vpop.f32.mrf.mxu2 }
  0xdb   : > { %v1080_v50 = vadd.f32 %v1063_v39, %v879_v49 }
  0xdd   : > { %v1475_v54 = vpop.f32.mrf.mxu0  ;;  %v3622_v43 = vpop.f32.mrf.mxu3  ;;  %v1230_v38 = vadd.f32 %v3618_v30, %v1080_v50 }
  0xe0   : > { %v864_v55 = vpop.f32.mrf.mxu1 }
  0xe1   : > { %v880_v58 = vadd.f32 %v864_v55, %v615_v52  ;;  %v1070_v60 = vpop.f32.mrf.mxu2 }
  0xe3   : > { %v1081_v59 = vadd.f32 %v1065_v42, %v880_v58  ;;  %v1492_v42 = vadd.f32 %v1475_v54, %v1230_v38 }
  0xe5   : > { %v3625_v6 = vpop.f32.mrf.mxu0  ;;  %v3627_v11 = vpop.f32.mrf.mxu3  ;;  %v1231_v58 = vadd.f32 %v3620_v48, %v1081_v59 }
  0xe8   : > { %v867_v7 = vpop.f32.mrf.mxu1 }
  0xe9   : > { %v881_v10 = vadd.f32 %v867_v7, %v616_v0  ;;  %v1073_v12 = vpop.f32.mrf.mxu2 }
  0xeb   : > { %v3629_v63 = vadd.f32 %v1068_v51, %v881_v10  ;;  %v1493_v10 = vadd.f32 %v3625_v6, %v1231_v58 }
  0xed   : > { %v3631_v4 = vpop.f32.mrf.mxu0  ;;  %v3635_v1 = vpop.f32.mrf.mxu3 }
  0xf0   : > { %v869_v14 = vpop.f32.mrf.mxu1 }
  0xf1   : > { %v882_v15 = vadd.f32 %v869_v14, %v617_v13  ;;  %v1075_v17 = vpop.f32.mrf.mxu2 }
  0xf3   : > { %v3633_v16 = vadd.f32 %v1070_v60, %v882_v15 }
  0xf5   : > { %v3637_v18 = vpop.f32.mrf.mxu0  ;;  %v3641_v22 = vpop.f32.mrf.mxu3 }
  0xf8   : > { %v872_v19 = vpop.f32.mrf.mxu1 }
  0xf9   : > { %v883_v2 = vadd.f32 %v872_v19, %v618_v56  ;;  %v1819_v20 = vpop.f32.mrf.mxu2  ;;  %v1232_v56 = vadd.f32 %v3622_v43, %v3629_v63 }
  0xfb   : > { %v3639_v57 = vadd.f32 %v1073_v12, %v883_v2 }
  0xfd   : > { %v3643_v3 = vpop.f32.mrf.mxu0  ;;  %v2081_v25 = vpop.f32.mrf.mxu3 }
 0x100   : > { %v874_v61 = vpop.f32.mrf.mxu1 }
 0x101   : > { %v884_v62 = vadd.f32 %v874_v61, %v619_v5  ;;  %v1821_v24 = vpop.f32.mrf.mxu2  ;;  %v1494_v5 = vadd.f32 %v3631_v4, %v1232_v56 }
 0x103   : > { %v3645_v23 = vadd.f32 %v1075_v17, %v884_v62 }
 0x105   : > { %v3647_v27 = vpop.f32.mrf.mxu0  ;;  %v2083_v35 = vpop.f32.mrf.mxu3 }
 0x108   : > { %v1668_v28 = vpop.f32.mrf.mxu1 }
 0x109   : > { %v1688_v33 = vadd.f32 %v1668_v28, %v1490_v26  ;;  %v1824_v37 = vpop.f32.mrf.mxu2  ;;  %v1233_v26 = vadd.f32 %v3627_v11, %v3633_v16 }
 0x10b   : > { %v1839_v36 = vadd.f32 %v1819_v20, %v1688_v33  ;;  %v1495_v34 = vadd.f32 %v3637_v18, %v1233_v26 }
 0x10d   : > { %v2101_v29 = vadd.f32 %v2081_v25, %v1839_v36  ;;  %v2279_v53 = vpop.f32.mrf.mxu0  ;;  %v2086_v31 = vpop.f32.mrf.mxu3 }
 0x10f   : > { %v2299_v39 = vadd.f32 %v2279_v53, %v2101_v29 }
 0x110   : > { %v1670_v21 = vpop.f32.mrf.mxu1 }
 0x111   : > { %v1689_v40 = vadd.f32 %v1670_v21, %v1491_v32  ;;  %2307 = vst [vmem:[%s3654_s13] sm:$0xff] %v2299_v39  ;;  %v1826_v9 = vpop.f32.mrf.mxu2  ;;  %v2337_v52 = vmul.f32 %v2299_v39, %v2299_v39  ;;  %v1234_v21 = vadd.f32 %v3635_v1, %v3639_v57 }
 0x113   : > { %v1840_v8 = vadd.f32 %v1821_v24, %v1689_v40  ;;  %v1496_v38 = vadd.f32 %v3643_v3, %v1234_v21 }
 0x115   : > { %v2102_v41 = vadd.f32 %v2083_v35, %v1840_v8  ;;  %v2281_v44 = vpop.f32.mrf.mxu0  ;;  %v2088_v7 = vpop.f32.mrf.mxu3 }
 0x117   : > { %v2300_v49 = vadd.f32 %v2281_v44, %v2102_v41 }
 0x118   : > { %v1673_v47 = vpop.f32.mrf.mxu1 }
 0x119   : > { %v1690_v51 = vadd.f32 %v1673_v47, %v1492_v42  ;;  %2308 = vst [vmem:[%s3654_s13 + $0x8] sm:$0xff] %v2300_v49  ;;  %v2323_v45 = vadd.f32 %v2300_v49, %v2299_v39  ;;  %v2338_v55 = vmul.f32 %v2300_v49, %v2300_v49  ;;  %v1829_v0 = vpop.f32.mrf.mxu2  ;;  %v1235_v47 = vadd.f32 %v3641_v22, %v3645_v23 }
 0x11b   : > { %v1841_v60 = vadd.f32 %v1824_v37, %v1690_v51  ;;  %v2345_v30 = vadd.f32 %v2338_v55, %v2337_v52  ;;  %v1497_v52 = vadd.f32 %v3647_v27, %v1235_v47 }
 0x11d   : > { %v2103_v50 = vadd.f32 %v2086_v31, %v1841_v60  ;;  %v2284_v12 = vpop.f32.mrf.mxu0  ;;  %v2091_v20 = vpop.f32.mrf.mxu3 }
 0x11f   : > { %v2301_v13 = vadd.f32 %v2284_v12, %v2103_v50 }
 0x120   : > { %v1675_v54 = vpop.f32.mrf.mxu1 }
 0x121   : > { %v1691_v14 = vadd.f32 %v1675_v54, %v1493_v10  ;;  %2309 = vst [vmem:[%s3654_s13 + $0x10] sm:$0xff] %v2301_v13  ;;  %v2324_v15 = vadd.f32 %v2323_v45, %v2301_v13  ;;  %v2339_v17 = vmul.f32 %v2301_v13, %v2301_v13  ;;  %v1831_v48 = vpop.f32.mrf.mxu2 }
 0x123   : > { %v1842_v19 = vadd.f32 %v1826_v9, %v1691_v14  ;;  %v2346_v59 = vadd.f32 %v2345_v30, %v2339_v17 }
 0x125   : > { %v2104_v2 = vadd.f32 %v2088_v7, %v1842_v19  ;;  %v2286_v61 = vpop.f32.mrf.mxu0  ;;  %v2093_v4 = vpop.f32.mrf.mxu3 }
 0x127   : > { %v2302_v62 = vadd.f32 %v2286_v61, %v2104_v2 }
 0x128   : > { %v1678_v6 = vpop.f32.mrf.mxu1 }
 0x129   : > { %v1692_v46 = vadd.f32 %v1678_v6, %v1494_v5  ;;  %2310 = vst [vmem:[%s3654_s13 + $0x18] sm:$0xff] %v2302_v62  ;;  %v2325_v24 = vadd.f32 %v2324_v15, %v2302_v62  ;;  %v2340_v25 = vmul.f32 %v2302_v62, %v2302_v62  ;;  %v1834_v43 = vpop.f32.mrf.mxu2 }
 0x12b   : > { %v1843_v28 = vadd.f32 %v1829_v0, %v1692_v46  ;;  %v2347_v63 = vadd.f32 %v2346_v59, %v2340_v25 }
 0x12d   : > { %v2105_v33 = vadd.f32 %v2091_v20, %v1843_v28  ;;  %v2289_v36 = vpop.f32.mrf.mxu0  ;;  %v2096_v41 = vpop.f32.mrf.mxu3 }
 0x12f   : > { %v2303_v35 = vadd.f32 %v2289_v36, %v2105_v33 }
 0x130   : > { %v1680_v37 = vpop.f32.mrf.mxu1 }
 0x131   : > { %v1693_v29 = vadd.f32 %v1680_v37, %v1495_v34  ;;  %2311 = vst [vmem:[%s3654_s13 + $0x20] sm:$0xff] %v2303_v35  ;;  %v2326_v32 = vadd.f32 %v2325_v24, %v2303_v35  ;;  %v2341_v53 = vmul.f32 %v2303_v35, %v2303_v35  ;;  %v1836_v11 = vpop.f32.mrf.mxu2 }
 0x133   : > { %v1844_v39 = vadd.f32 %v1831_v48, %v1693_v29  ;;  %v2348_v16 = vadd.f32 %v2347_v63, %v2341_v53 }
 0x135   : > { %v2106_v40 = vadd.f32 %v2093_v4, %v1844_v39  ;;  %v2291_v8 = vpop.f32.mrf.mxu0  ;;  %v2098_v30 = vpop.f32.mrf.mxu3 }
 0x137   : > { %v2304_v9 = vadd.f32 %v2291_v8, %v2106_v40 }
 0x138   : > { %v1683_v18 = vpop.f32.mrf.mxu1 }
 0x139   : > { %v1694_v31 = vadd.f32 %v1683_v18, %v1496_v38  ;;  %2312 = vst [vmem:[%s3654_s13 + $0x28] sm:$0xff] %v2304_v9  ;;  %v2327_v42 = vadd.f32 %v2326_v32, %v2304_v9  ;;  %v2342_v44 = vmul.f32 %v2304_v9, %v2304_v9  ;;  %v2294_v57 = vpop.f32.mrf.mxu2 }
 0x13b   : > { %v1845_v49 = vadd.f32 %v1834_v43, %v1694_v31  ;;  %v2349_v1 = vadd.f32 %v2348_v16, %v2342_v44 }
 0x13d   : > { %v2107_v51 = vadd.f32 %v2096_v41, %v1845_v49 }
 0x13f   : > { %v2305_v3 = vadd.f32 %v2294_v57, %v2107_v51 }
 0x140   : > { %v1685_v45 = vpop.f32.mrf.mxu1 }
 0x141   : > { %v1695_v55 = vadd.f32 %v1685_v45, %v1497_v52  ;;  %2313 = vst [vmem:[%s3654_s13 + $0x30] sm:$0xff] %v2305_v3  ;;  %v2328_v58 = vadd.f32 %v2327_v42, %v2305_v3  ;;  %v2343_v60 = vmul.f32 %v2305_v3, %v2305_v3  ;;  %v2296_v10 = vpop.f32.mrf.mxu2 }
 0x143   : > { %v1846_v0 = vadd.f32 %v1836_v11, %v1695_v55  ;;  %v2350_v7 = vadd.f32 %v2349_v1, %v2343_v60 }
 0x145   : > { %v2108_v50 = vadd.f32 %v2098_v30, %v1846_v0 }
 0x147   : > { %v2306_v22 = vadd.f32 %v2296_v10, %v2108_v50 }
 0x149   : > { %2314 = vst [vmem:[%s3654_s13 + $0x38] sm:$0xff] %v2306_v22  ;;  %v2329_v23 = vadd.f32 %v2328_v58, %v2306_v22  ;;  %v2344_v12 = vmul.f32 %v2306_v22, %v2306_v22 }
 0x14b   : > { %v2330_v54 = vrot.slane %v2329_v23, 4  ;;  %v2351_v13 = vadd.f32 %v2350_v7, %v2344_v12 }
 0x14d   : > { %v2331_v14 = vadd.f32 %v2330_v54, %v2329_v23  ;;  %v2352_v27 = vrot.slane %v2351_v13, 4 }
 0x14f   : > { %v2332_v15 = vrot.slane %v2331_v14, 2  ;;  %v2353_v17 = vadd.f32 %v2352_v27, %v2351_v13 }
 0x151   : > { %v2333_v56 = vadd.f32 %v2332_v15, %v2331_v14  ;;  %v2354_v19 = vrot.slane %v2353_v17, 2 }
 0x153   : > { %v2334_v48 = vrot.slane %v2333_v56, 1  ;;  %v2355_v59 = vadd.f32 %v2354_v19, %v2353_v17 }
 0x155   : > { %v2335_v2 = vadd.f32 %v2334_v48, %v2333_v56  ;;  %v2356_v20 = vrot.slane %v2355_v59, 1 }
 0x157   : > { %2336 = vst [vmem:[%s262_s16] sm:$0x1] %v2335_v2  ;;  %v2357_v5 = vadd.f32 %v2356_v20, %v2355_v59 }
 0x159   : > { %2358 = vst [vmem:[%s262_s16 + $0x1] sm:$0x1] %v2357_v5 }
 0x15a PF: > { %s17_s21 = sadd.s32 1, %s3065_s21  }
 0x15b   : > { %p14_p4 = scmp.ge.s32.totalorder %s17_s21, 4  }
 0x15d   :  { %16 = sbr.rel (!%p14_p4) target bundleno = 1 (0x1), region = 92 }

</bundles_post_ra>
